<compile_context>
chip_gen: v7x
topology: tpu7x:2x2x1
jax: 0.10.0
libtpu: 0.0.40
codegen_flags: <defaults>
</compile_context>

<pallas_src>
import functools

import jax
import jax.numpy as jnp
from jax.experimental import pallas as pl
from jax.experimental.pallas import tpu as pltpu


# ----------------------------- config (scaled-down phobert-like) ------------
VOCAB = 128
HIDDEN = 64
N_LAYERS = 2
N_HEADS = 4
HEAD_DIM = HIDDEN // N_HEADS
INTERMEDIATE = 128
MAX_SEQ = 16
N_CLASSES = 2
PAD_OUT = 128          # lane-dense padded logits width (sliced to 2 outside)
LN_EPS = 1e-12


# ----------------------------- fused Pallas kernel ---------------------------
def _encoder_kernel(emb_ref, bias_ref, emb_g_ref, emb_b_ref,
                    wqkv_ref, bqkv_ref, wo_ref, bo_ref,
                    ln1_g_ref, ln1_b_ref, w1_ref, b1_ref,
                    w2_ref, b2_ref, ln2_g_ref, ln2_b_ref,
                    pool_w_ref, pool_b_ref, fc_w_ref, fc_b_ref,
                    out_ref, *, batch, seq):
    """Whole model forward, resident in VMEM.

    emb:  [B*S, H]   (word + pos + type embeddings, pre-LayerNorm)
    bias: [B, S]     additive attention mask bias (0 / -1e9)
    per-layer weights are stacked along a leading layer axis.
    out:  [B, PAD_OUT] padded logits.
    """
    f32 = jnp.float32

    def layernorm(h, g, b):
        mu = jnp.mean(h, axis=-1, keepdims=True)
        var = jnp.mean(jnp.square(h - mu), axis=-1, keepdims=True)
        return (h - mu) * jax.lax.rsqrt(var + LN_EPS) * g + b

    # Embedding LayerNorm (no residual input needed).
    x = layernorm(emb_ref[...], emb_g_ref[...], emb_b_ref[...])   # [B*S, H]
    bias = bias_ref[...]                                          # [B, S]
    scale = 1.0 / (HEAD_DIM ** 0.5)

    for l in range(N_LAYERS):
        # Fused QKV projection: one [B*S, H] x [H, 3H] matmul.
        qkv = jnp.dot(x, wqkv_ref[l], preferred_element_type=f32) + bqkv_ref[l]

        ctx_rows = []
        for b in range(batch):                         # static unroll (tiny B)
            r0, r1 = b * seq, (b + 1) * seq
            qkv_b = qkv[r0:r1, :]                      # [S, 3H]
            bias_b = bias[b:b + 1, :]                  # [1, S] -> bcast rows
            heads = []
            for h in range(N_HEADS):                   # static unroll
                c0 = h * HEAD_DIM
                q = qkv_b[:, c0:c0 + HEAD_DIM]
                k = qkv_b[:, HIDDEN + c0:HIDDEN + c0 + HEAD_DIM]
                v = qkv_b[:, 2 * HIDDEN + c0:2 * HIDDEN + c0 + HEAD_DIM]
                s = jnp.dot(q, k.T, preferred_element_type=f32) * scale + bias_b
                m = jnp.max(s, axis=-1, keepdims=True)
                p = jnp.exp(s - m)
                p = p * pl.reciprocal(jnp.sum(p, axis=-1, keepdims=True),
                                      approx=True)
                heads.append(jnp.dot(p, v, preferred_element_type=f32))
            ctx_rows.append(jnp.concatenate(heads, axis=-1))       # [S, H]
        ctx = jnp.concatenate(ctx_rows, axis=0)                    # [B*S, H]

        attn = jnp.dot(ctx, wo_ref[l], preferred_element_type=f32) + bo_ref[l]
        x1 = layernorm(attn + x, ln1_g_ref[l], ln1_b_ref[l])

        hmid = jnp.dot(x1, w1_ref[l], preferred_element_type=f32) + b1_ref[l]
        # TODO(synk): phobert uses exact erf-GELU; tanh approximation used here.
        hmid = jax.nn.gelu(hmid, approximate=True)
        ff = jnp.dot(hmid, w2_ref[l], preferred_element_type=f32) + b2_ref[l]
        x = layernorm(ff + x1, ln2_g_ref[l], ln2_b_ref[l])

    # BERT pooler on the CLS hidden state of each sequence.
    cls = jnp.concatenate(
        [x[b * seq:b * seq + 1, :] for b in range(batch)], axis=0)  # [B, H]
    pooled = jnp.tanh(
        jnp.dot(cls, pool_w_ref[...], preferred_element_type=f32)
        + pool_b_ref[...])

    # Dropout(p=0.3): identity at inference time.
    # Final classifier, padded to a 128-wide lane-dense output.
    out_ref[...] = (jnp.dot(pooled, fc_w_ref[...], preferred_element_type=f32)
                    + fc_b_ref[...])


def fused_model_call(emb, mask_bias, params, batch, seq):
    vmem = pl.BlockSpec(memory_space=pltpu.MemorySpace.VMEM)
    inputs = (emb, mask_bias,
              params["emb_ln_g"], params["emb_ln_b"],
              params["wqkv"], params["bqkv"], params["wo"], params["bo"],
              params["ln1_g"], params["ln1_b"],
              params["w1"], params["b1"], params["w2"], params["b2"],
              params["ln2_g"], params["ln2_b"],
              params["pool_w"], params["pool_b"],
              params["fc_w_pad"], params["fc_b_pad"])
    return pl.pallas_call(
        functools.partial(_encoder_kernel, batch=batch, seq=seq),
        out_shape=jax.ShapeDtypeStruct((batch, PAD_OUT), jnp.float32),
        in_specs=[vmem] * len(inputs),
        out_specs=vmem,
    )(*inputs)


# ----------------------------- parameter init -------------------------------
def init_params(key):
    keys = iter(jax.random.split(key, 64))

    def nrm(shape, std=0.02):
        return std * jax.random.normal(next(keys), shape, dtype=jnp.float32)

    wqkv, wo, w1, w2 = [], [], [], []
    for _ in range(N_LAYERS):
        wq, wk, wv = (nrm((HIDDEN, HIDDEN)) for _ in range(3))
        wqkv.append(jnp.concatenate([wq, wk, wv], axis=1))   # [H, 3H]
        wo.append(nrm((HIDDEN, HIDDEN)))
        w1.append(nrm((HIDDEN, INTERMEDIATE)))
        w2.append(nrm((INTERMEDIATE, HIDDEN)))

    L = N_LAYERS
    params = {
        "word_emb": nrm((VOCAB, HIDDEN)),
        "pos_emb": nrm((MAX_SEQ, HIDDEN)),
        "type_emb": nrm((1, HIDDEN)),
        "emb_ln_g": jnp.ones((1, HIDDEN), jnp.float32),
        "emb_ln_b": jnp.zeros((1, HIDDEN), jnp.float32),
        "wqkv": jnp.stack(wqkv),                              # [L, H, 3H]
        "bqkv": jnp.zeros((L, 1, 3 * HIDDEN), jnp.float32),
        "wo": jnp.stack(wo),                                  # [L, H, H]
        "bo": jnp.zeros((L, 1, HIDDEN), jnp.float32),
        "ln1_g": jnp.ones((L, 1, HIDDEN), jnp.float32),
        "ln1_b": jnp.zeros((L, 1, HIDDEN), jnp.float32),
        "w1": jnp.stack(w1),                                  # [L, H, I]
        "b1": jnp.zeros((L, 1, INTERMEDIATE), jnp.float32),
        "w2": jnp.stack(w2),                                  # [L, I, H]
        "b2": jnp.zeros((L, 1, HIDDEN), jnp.float32),
        "ln2_g": jnp.ones((L, 1, HIDDEN), jnp.float32),
        "ln2_b": jnp.zeros((L, 1, HIDDEN), jnp.float32),
        "pool_w": nrm((HIDDEN, HIDDEN)),
        "pool_b": jnp.zeros((1, HIDDEN), jnp.float32),
    }
    # fc: nn.init.normal_(weight, std=0.02); nn.init.normal_(bias, 0) -> std=1.
    fc_w = nrm((HIDDEN, N_CLASSES), std=0.02)
    fc_b = jax.random.normal(next(keys), (N_CLASSES,), dtype=jnp.float32)
    params["fc_w_pad"] = jnp.zeros((HIDDEN, PAD_OUT),
                                   jnp.float32).at[:, :N_CLASSES].set(fc_w)
    params["fc_b_pad"] = jnp.zeros((1, PAD_OUT),
                                   jnp.float32).at[0, :N_CLASSES].set(fc_b)
    return params


# ----------------------------- forward pass ----------------------------------
def forward(params, input_ids, attention_mask):
    B, S = input_ids.shape

    # Embedding gather + position/type add kept as XLA glue (single fused op).
    emb = (jnp.take(params["word_emb"], input_ids, axis=0)
           + params["pos_emb"][:S][None, :, :]
           + params["type_emb"][0][None, None, :]).reshape(B * S, HIDDEN)

    # Additive attention-mask bias: 0 where attended, -1e9 where masked.
    mask_bias = (1.0 - attention_mask.astype(jnp.float32)) * -1e9   # [B, S]

    padded_logits = fused_model_call(emb, mask_bias, params, batch=B, seq=S)
    return padded_logits[:, :N_CLASSES]                             # [B, 2]


# ----------------------------- main ------------------------------------------
if __name__ == "__main__":
    key = jax.random.PRNGKey(0)
    k_param, k_ids = jax.random.split(key)

    params = init_params(k_param)

    B, S = 2, MAX_SEQ
    input_ids = jax.random.randint(k_ids, (B, S), 0, VOCAB, dtype=jnp.int32)
    # Second sequence padded at the tail (last 4 positions masked).
    attention_mask = jnp.array(
        [[1] * S, [1] * (S - 4) + [0] * 4], dtype=jnp.int32)

    logits = jax.jit(forward)(params, input_ids, attention_mask)
    logits = jax.block_until_ready(logits)
    assert logits.shape == (B, N_CLASSES)
    assert jnp.all(jnp.isfinite(logits))
    print("KERNEL_OK")
</pallas_src>

<mosaic_0001>
module attributes {stable_mosaic.version = 11 : i64} {
  func.func @_encoder_kernel(%arg0: memref<32x64xf32, #tpu.memory_space<vmem>>, %arg1: memref<2x16xf32, #tpu.memory_space<vmem>>, %arg2: memref<1x64xf32, #tpu.memory_space<vmem>>, %arg3: memref<1x64xf32, #tpu.memory_space<vmem>>, %arg4: memref<2x64x192xf32, #tpu.memory_space<vmem>>, %arg5: memref<2x1x192xf32, #tpu.memory_space<vmem>>, %arg6: memref<2x64x64xf32, #tpu.memory_space<vmem>>, %arg7: memref<2x1x64xf32, #tpu.memory_space<vmem>>, %arg8: memref<2x1x64xf32, #tpu.memory_space<vmem>>, %arg9: memref<2x1x64xf32, #tpu.memory_space<vmem>>, %arg10: memref<2x64x128xf32, #tpu.memory_space<vmem>>, %arg11: memref<2x1x128xf32, #tpu.memory_space<vmem>>, %arg12: memref<2x128x64xf32, #tpu.memory_space<vmem>>, %arg13: memref<2x1x64xf32, #tpu.memory_space<vmem>>, %arg14: memref<2x1x64xf32, #tpu.memory_space<vmem>>, %arg15: memref<2x1x64xf32, #tpu.memory_space<vmem>>, %arg16: memref<64x64xf32, #tpu.memory_space<vmem>>, %arg17: memref<1x64xf32, #tpu.memory_space<vmem>>, %arg18: memref<64x128xf32, #tpu.memory_space<vmem>>, %arg19: memref<1x128xf32, #tpu.memory_space<vmem>>, %arg20: memref<2x128xf32, #tpu.memory_space<vmem>>) attributes {dimension_semantics = [], scalar_prefetch = 0 : i64, scratch_operands = 0 : i64, tpu.core_type = #tpu.core_type<tc>} {
    %c0 = arith.constant 0 : index
    %c0_0 = arith.constant 0 : index
    %0 = vector.load %arg0[%c0, %c0_0] : memref<32x64xf32, #tpu.memory_space<vmem>>, vector<32x64xf32>
    %c0_1 = arith.constant 0 : index
    %c0_2 = arith.constant 0 : index
    %1 = vector.load %arg2[%c0_1, %c0_2] : memref<1x64xf32, #tpu.memory_space<vmem>>, vector<1x64xf32>
    %c0_3 = arith.constant 0 : index
    %c0_4 = arith.constant 0 : index
    %2 = vector.load %arg3[%c0_3, %c0_4] : memref<1x64xf32, #tpu.memory_space<vmem>>, vector<1x64xf32>
    %cst = arith.constant dense<0.000000e+00> : vector<32xf32>
    %3 = vector.multi_reduction <add>, %0, %cst [1] : vector<32x64xf32> to vector<32xf32>
    %4 = vector.shape_cast %3 : vector<32xf32> to vector<32x1xf32>
    %cst_5 = arith.constant 6.400000e+01 : f32
    %5 = vector.broadcast %cst_5 : f32 to vector<32x1xf32>
    %6 = arith.divf %4, %5 : vector<32x1xf32>
    %7 = vector.broadcast %6 : vector<32x1xf32> to vector<32x64xf32>
    %8 = arith.subf %0, %7 : vector<32x64xf32>
    %9 = arith.mulf %8, %8 : vector<32x64xf32>
    %cst_6 = arith.constant dense<0.000000e+00> : vector<32xf32>
    %10 = vector.multi_reduction <add>, %9, %cst_6 [1] : vector<32x64xf32> to vector<32xf32>
    %11 = vector.shape_cast %10 : vector<32xf32> to vector<32x1xf32>
    %cst_7 = arith.constant 6.400000e+01 : f32
    %12 = vector.broadcast %cst_7 : f32 to vector<32x1xf32>
    %13 = arith.divf %11, %12 : vector<32x1xf32>
    %14 = vector.broadcast %6 : vector<32x1xf32> to vector<32x64xf32>
    %15 = arith.subf %0, %14 : vector<32x64xf32>
    %cst_8 = arith.constant 9.99999996E-13 : f32
    %16 = vector.broadcast %cst_8 : f32 to vector<32x1xf32>
    %17 = arith.addf %13, %16 : vector<32x1xf32>
    %18 = math.rsqrt %17 : vector<32x1xf32>
    %19 = vector.broadcast %18 : vector<32x1xf32> to vector<32x64xf32>
    %20 = arith.mulf %15, %19 : vector<32x64xf32>
    %21 = vector.broadcast %1 : vector<1x64xf32> to vector<32x64xf32>
    %22 = arith.mulf %20, %21 : vector<32x64xf32>
    %23 = vector.broadcast %2 : vector<1x64xf32> to vector<32x64xf32>
    %24 = arith.addf %22, %23 : vector<32x64xf32>
    %c0_9 = arith.constant 0 : index
    %c0_10 = arith.constant 0 : index
    %25 = vector.load %arg1[%c0_9, %c0_10] : memref<2x16xf32, #tpu.memory_space<vmem>>, vector<2x16xf32>
    %c0_11 = arith.constant 0 : index
    %c0_12 = arith.constant 0 : index
    %c0_13 = arith.constant 0 : index
    %26 = vector.load %arg4[%c0_11, %c0_12, %c0_13] : memref<2x64x192xf32, #tpu.memory_space<vmem>>, vector<1x64x192xf32>
    %27 = vector.shape_cast %26 : vector<1x64x192xf32> to vector<64x192xf32>
    %cst_14 = arith.constant dense<0.000000e+00> : vector<32x192xf32>
    %28 = tpu.matmul %24, %27, %cst_14 {dimension_numbers = #tpu.dot_dimension_numbers<[1], [0], [0], [1], [0, 0, 1, 1], [], []>} : vector<32x64xf32>, vector<64x192xf32>, vector<32x192xf32> -> vector<32x192xf32>
    %c0_15 = arith.constant 0 : index
    %c0_16 = arith.constant 0 : index
    %c0_17 = arith.constant 0 : index
    %29 = vector.load %arg5[%c0_15, %c0_16, %c0_17] : memref<2x1x192xf32, #tpu.memory_space<vmem>>, vector<1x1x192xf32>
    %30 = vector.shape_cast %29 : vector<1x1x192xf32> to vector<1x192xf32>
    %31 = vector.broadcast %30 : vector<1x192xf32> to vector<32x192xf32>
    %32 = arith.addf %28, %31 : vector<32x192xf32>
    %33 = vector.extract_strided_slice %32 {offsets = [0, 0], sizes = [16, 192], strides = [1, 1]} : vector<32x192xf32> to vector<16x192xf32>
    %34 = vector.extract_strided_slice %25 {offsets = [0, 0], sizes = [1, 16], strides = [1, 1]} : vector<2x16xf32> to vector<1x16xf32>
    %35 = vector.extract_strided_slice %33 {offsets = [0, 0], sizes = [16, 16], strides = [1, 1]} : vector<16x192xf32> to vector<16x16xf32>
    %36 = vector.extract_strided_slice %33 {offsets = [0, 64], sizes = [16, 16], strides = [1, 1]} : vector<16x192xf32> to vector<16x16xf32>
    %37 = vector.extract_strided_slice %33 {offsets = [0, 128], sizes = [16, 16], strides = [1, 1]} : vector<16x192xf32> to vector<16x16xf32>
    %38 = tpu.transpose %36, [1, 0] : vector<16x16xf32> -> vector<16x16xf32>
    %cst_18 = arith.constant dense<0.000000e+00> : vector<16x16xf32>
    %39 = tpu.matmul %35, %38, %cst_18 {dimension_numbers = #tpu.dot_dimension_numbers<[1], [0], [0], [1], [0, 0, 1, 1], [], []>} : vector<16x16xf32>, vector<16x16xf32>, vector<16x16xf32> -> vector<16x16xf32>
    %cst_19 = arith.constant 2.500000e-01 : f32
    %40 = vector.broadcast %cst_19 : f32 to vector<16x16xf32>
    %41 = arith.mulf %39, %40 : vector<16x16xf32>
    %42 = vector.broadcast %34 : vector<1x16xf32> to vector<16x16xf32>
    %43 = arith.addf %41, %42 : vector<16x16xf32>
    %cst_20 = arith.constant dense<0xFF800000> : vector<16xf32>
    %44 = vector.multi_reduction <maximumf>, %43, %cst_20 [1] : vector<16x16xf32> to vector<16xf32>
    %45 = vector.shape_cast %44 : vector<16xf32> to vector<16x1xf32>
    %46 = vector.broadcast %45 : vector<16x1xf32> to vector<16x16xf32>
    %47 = arith.subf %43, %46 : vector<16x16xf32>
    %48 = math.exp %47 : vector<16x16xf32>
    %cst_21 = arith.constant dense<0.000000e+00> : vector<16xf32>
    %49 = vector.multi_reduction <add>, %48, %cst_21 [1] : vector<16x16xf32> to vector<16xf32>
    %50 = vector.shape_cast %49 : vector<16xf32> to vector<16x1xf32>
    %51 = tpu.reciprocal %50 {approx = true} : vector<16x1xf32> -> vector<16x1xf32>
    %52 = vector.broadcast %51 : vector<16x1xf32> to vector<16x16xf32>
    %53 = arith.mulf %48, %52 : vector<16x16xf32>
    %cst_22 = arith.constant dense<0.000000e+00> : vector<16x16xf32>
    %54 = tpu.matmul %53, %37, %cst_22 {dimension_numbers = #tpu.dot_dimension_numbers<[1], [0], [0], [1], [0, 0, 1, 1], [], []>} : vector<16x16xf32>, vector<16x16xf32>, vector<16x16xf32> -> vector<16x16xf32>
    %55 = vector.extract_strided_slice %33 {offsets = [0, 16], sizes = [16, 16], strides = [1, 1]} : vector<16x192xf32> to vector<16x16xf32>
    %56 = vector.extract_strided_slice %33 {offsets = [0, 80], sizes = [16, 16], strides = [1, 1]} : vector<16x192xf32> to vector<16x16xf32>
    %57 = vector.extract_strided_slice %33 {offsets = [0, 144], sizes = [16, 16], strides = [1, 1]} : vector<16x192xf32> to vector<16x16xf32>
    %58 = tpu.transpose %56, [1, 0] : vector<16x16xf32> -> vector<16x16xf32>
    %cst_23 = arith.constant dense<0.000000e+00> : vector<16x16xf32>
    %59 = tpu.matmul %55, %58, %cst_23 {dimension_numbers = #tpu.dot_dimension_numbers<[1], [0], [0], [1], [0, 0, 1, 1], [], []>} : vector<16x16xf32>, vector<16x16xf32>, vector<16x16xf32> -> vector<16x16xf32>
    %cst_24 = arith.constant 2.500000e-01 : f32
    %60 = vector.broadcast %cst_24 : f32 to vector<16x16xf32>
    %61 = arith.mulf %59, %60 : vector<16x16xf32>
    %62 = vector.broadcast %34 : vector<1x16xf32> to vector<16x16xf32>
    %63 = arith.addf %61, %62 : vector<16x16xf32>
    %cst_25 = arith.constant dense<0xFF800000> : vector<16xf32>
    %64 = vector.multi_reduction <maximumf>, %63, %cst_25 [1] : vector<16x16xf32> to vector<16xf32>
    %65 = vector.shape_cast %64 : vector<16xf32> to vector<16x1xf32>
    %66 = vector.broadcast %65 : vector<16x1xf32> to vector<16x16xf32>
    %67 = arith.subf %63, %66 : vector<16x16xf32>
    %68 = math.exp %67 : vector<16x16xf32>
    %cst_26 = arith.constant dense<0.000000e+00> : vector<16xf32>
    %69 = vector.multi_reduction <add>, %68, %cst_26 [1] : vector<16x16xf32> to vector<16xf32>
    %70 = vector.shape_cast %69 : vector<16xf32> to vector<16x1xf32>
    %71 = tpu.reciprocal %70 {approx = true} : vector<16x1xf32> -> vector<16x1xf32>
    %72 = vector.broadcast %71 : vector<16x1xf32> to vector<16x16xf32>
    %73 = arith.mulf %68, %72 : vector<16x16xf32>
    %cst_27 = arith.constant dense<0.000000e+00> : vector<16x16xf32>
    %74 = tpu.matmul %73, %57, %cst_27 {dimension_numbers = #tpu.dot_dimension_numbers<[1], [0], [0], [1], [0, 0, 1, 1], [], []>} : vector<16x16xf32>, vector<16x16xf32>, vector<16x16xf32> -> vector<16x16xf32>
    %75 = vector.extract_strided_slice %33 {offsets = [0, 32], sizes = [16, 16], strides = [1, 1]} : vector<16x192xf32> to vector<16x16xf32>
    %76 = vector.extract_strided_slice %33 {offsets = [0, 96], sizes = [16, 16], strides = [1, 1]} : vector<16x192xf32> to vector<16x16xf32>
    %77 = vector.extract_strided_slice %33 {offsets = [0, 160], sizes = [16, 16], strides = [1, 1]} : vector<16x192xf32> to vector<16x16xf32>
    %78 = tpu.transpose %76, [1, 0] : vector<16x16xf32> -> vector<16x16xf32>
    %cst_28 = arith.constant dense<0.000000e+00> : vector<16x16xf32>
    %79 = tpu.matmul %75, %78, %cst_28 {dimension_numbers = #tpu.dot_dimension_numbers<[1], [0], [0], [1], [0, 0, 1, 1], [], []>} : vector<16x16xf32>, vector<16x16xf32>, vector<16x16xf32> -> vector<16x16xf32>
    %cst_29 = arith.constant 2.500000e-01 : f32
    %80 = vector.broadcast %cst_29 : f32 to vector<16x16xf32>
    %81 = arith.mulf %79, %80 : vector<16x16xf32>
    %82 = vector.broadcast %34 : vector<1x16xf32> to vector<16x16xf32>
    %83 = arith.addf %81, %82 : vector<16x16xf32>
    %cst_30 = arith.constant dense<0xFF800000> : vector<16xf32>
    %84 = vector.multi_reduction <maximumf>, %83, %cst_30 [1] : vector<16x16xf32> to vector<16xf32>
    %85 = vector.shape_cast %84 : vector<16xf32> to vector<16x1xf32>
    %86 = vector.broadcast %85 : vector<16x1xf32> to vector<16x16xf32>
    %87 = arith.subf %83, %86 : vector<16x16xf32>
    %88 = math.exp %87 : vector<16x16xf32>
    %cst_31 = arith.constant dense<0.000000e+00> : vector<16xf32>
    %89 = vector.multi_reduction <add>, %88, %cst_31 [1] : vector<16x16xf32> to vector<16xf32>
    %90 = vector.shape_cast %89 : vector<16xf32> to vector<16x1xf32>
    %91 = tpu.reciprocal %90 {approx = true} : vector<16x1xf32> -> vector<16x1xf32>
    %92 = vector.broadcast %91 : vector<16x1xf32> to vector<16x16xf32>
    %93 = arith.mulf %88, %92 : vector<16x16xf32>
    %cst_32 = arith.constant dense<0.000000e+00> : vector<16x16xf32>
    %94 = tpu.matmul %93, %77, %cst_32 {dimension_numbers = #tpu.dot_dimension_numbers<[1], [0], [0], [1], [0, 0, 1, 1], [], []>} : vector<16x16xf32>, vector<16x16xf32>, vector<16x16xf32> -> vector<16x16xf32>
    %95 = vector.extract_strided_slice %33 {offsets = [0, 48], sizes = [16, 16], strides = [1, 1]} : vector<16x192xf32> to vector<16x16xf32>
    %96 = vector.extract_strided_slice %33 {offsets = [0, 112], sizes = [16, 16], strides = [1, 1]} : vector<16x192xf32> to vector<16x16xf32>
    %97 = vector.extract_strided_slice %33 {offsets = [0, 176], sizes = [16, 16], strides = [1, 1]} : vector<16x192xf32> to vector<16x16xf32>
    %98 = tpu.transpose %96, [1, 0] : vector<16x16xf32> -> vector<16x16xf32>
    %cst_33 = arith.constant dense<0.000000e+00> : vector<16x16xf32>
    %99 = tpu.matmul %95, %98, %cst_33 {dimension_numbers = #tpu.dot_dimension_numbers<[1], [0], [0], [1], [0, 0, 1, 1], [], []>} : vector<16x16xf32>, vector<16x16xf32>, vector<16x16xf32> -> vector<16x16xf32>
    %cst_34 = arith.constant 2.500000e-01 : f32
    %100 = vector.broadcast %cst_34 : f32 to vector<16x16xf32>
    %101 = arith.mulf %99, %100 : vector<16x16xf32>
    %102 = vector.broadcast %34 : vector<1x16xf32> to vector<16x16xf32>
    %103 = arith.addf %101, %102 : vector<16x16xf32>
    %cst_35 = arith.constant dense<0xFF800000> : vector<16xf32>
    %104 = vector.multi_reduction <maximumf>, %103, %cst_35 [1] : vector<16x16xf32> to vector<16xf32>
    %105 = vector.shape_cast %104 : vector<16xf32> to vector<16x1xf32>
    %106 = vector.broadcast %105 : vector<16x1xf32> to vector<16x16xf32>
    %107 = arith.subf %103, %106 : vector<16x16xf32>
    %108 = math.exp %107 : vector<16x16xf32>
    %cst_36 = arith.constant dense<0.000000e+00> : vector<16xf32>
    %109 = vector.multi_reduction <add>, %108, %cst_36 [1] : vector<16x16xf32> to vector<16xf32>
    %110 = vector.shape_cast %109 : vector<16xf32> to vector<16x1xf32>
    %111 = tpu.reciprocal %110 {approx = true} : vector<16x1xf32> -> vector<16x1xf32>
    %112 = vector.broadcast %111 : vector<16x1xf32> to vector<16x16xf32>
    %113 = arith.mulf %108, %112 : vector<16x16xf32>
    %cst_37 = arith.constant dense<0.000000e+00> : vector<16x16xf32>
    %114 = tpu.matmul %113, %97, %cst_37 {dimension_numbers = #tpu.dot_dimension_numbers<[1], [0], [0], [1], [0, 0, 1, 1], [], []>} : vector<16x16xf32>, vector<16x16xf32>, vector<16x16xf32> -> vector<16x16xf32>
    %115 = tpu.concatenate %54, %74, %94, %114 in 1 : vector<16x16xf32>, vector<16x16xf32>, vector<16x16xf32>, vector<16x16xf32> -> vector<16x64xf32>
    %116 = vector.extract_strided_slice %32 {offsets = [16, 0], sizes = [16, 192], strides = [1, 1]} : vector<32x192xf32> to vector<16x192xf32>
    %117 = vector.extract_strided_slice %25 {offsets = [1, 0], sizes = [1, 16], strides = [1, 1]} : vector<2x16xf32> to vector<1x16xf32>
    %118 = vector.extract_strided_slice %116 {offsets = [0, 0], sizes = [16, 16], strides = [1, 1]} : vector<16x192xf32> to vector<16x16xf32>
    %119 = vector.extract_strided_slice %116 {offsets = [0, 64], sizes = [16, 16], strides = [1, 1]} : vector<16x192xf32> to vector<16x16xf32>
    %120 = vector.extract_strided_slice %116 {offsets = [0, 128], sizes = [16, 16], strides = [1, 1]} : vector<16x192xf32> to vector<16x16xf32>
    %121 = tpu.transpose %119, [1, 0] : vector<16x16xf32> -> vector<16x16xf32>
    %cst_38 = arith.constant dense<0.000000e+00> : vector<16x16xf32>
    %122 = tpu.matmul %118, %121, %cst_38 {dimension_numbers = #tpu.dot_dimension_numbers<[1], [0], [0], [1], [0, 0, 1, 1], [], []>} : vector<16x16xf32>, vector<16x16xf32>, vector<16x16xf32> -> vector<16x16xf32>
    %cst_39 = arith.constant 2.500000e-01 : f32
    %123 = vector.broadcast %cst_39 : f32 to vector<16x16xf32>
    %124 = arith.mulf %122, %123 : vector<16x16xf32>
    %125 = vector.broadcast %117 : vector<1x16xf32> to vector<16x16xf32>
    %126 = arith.addf %124, %125 : vector<16x16xf32>
    %cst_40 = arith.constant dense<0xFF800000> : vector<16xf32>
    %127 = vector.multi_reduction <maximumf>, %126, %cst_40 [1] : vector<16x16xf32> to vector<16xf32>
    %128 = vector.shape_cast %127 : vector<16xf32> to vector<16x1xf32>
    %129 = vector.broadcast %128 : vector<16x1xf32> to vector<16x16xf32>
    %130 = arith.subf %126, %129 : vector<16x16xf32>
    %131 = math.exp %130 : vector<16x16xf32>
    %cst_41 = arith.constant dense<0.000000e+00> : vector<16xf32>
    %132 = vector.multi_reduction <add>, %131, %cst_41 [1] : vector<16x16xf32> to vector<16xf32>
    %133 = vector.shape_cast %132 : vector<16xf32> to vector<16x1xf32>
    %134 = tpu.reciprocal %133 {approx = true} : vector<16x1xf32> -> vector<16x1xf32>
    %135 = vector.broadcast %134 : vector<16x1xf32> to vector<16x16xf32>
    %136 = arith.mulf %131, %135 : vector<16x16xf32>
    %cst_42 = arith.constant dense<0.000000e+00> : vector<16x16xf32>
    %137 = tpu.matmul %136, %120, %cst_42 {dimension_numbers = #tpu.dot_dimension_numbers<[1], [0], [0], [1], [0, 0, 1, 1], [], []>} : vector<16x16xf32>, vector<16x16xf32>, vector<16x16xf32> -> vector<16x16xf32>
    %138 = vector.extract_strided_slice %116 {offsets = [0, 16], sizes = [16, 16], strides = [1, 1]} : vector<16x192xf32> to vector<16x16xf32>
    %139 = vector.extract_strided_slice %116 {offsets = [0, 80], sizes = [16, 16], strides = [1, 1]} : vector<16x192xf32> to vector<16x16xf32>
    %140 = vector.extract_strided_slice %116 {offsets = [0, 144], sizes = [16, 16], strides = [1, 1]} : vector<16x192xf32> to vector<16x16xf32>
    %141 = tpu.transpose %139, [1, 0] : vector<16x16xf32> -> vector<16x16xf32>
    %cst_43 = arith.constant dense<0.000000e+00> : vector<16x16xf32>
    %142 = tpu.matmul %138, %141, %cst_43 {dimension_numbers = #tpu.dot_dimension_numbers<[1], [0], [0], [1], [0, 0, 1, 1], [], []>} : vector<16x16xf32>, vector<16x16xf32>, vector<16x16xf32> -> vector<16x16xf32>
    %cst_44 = arith.constant 2.500000e-01 : f32
    %143 = vector.broadcast %cst_44 : f32 to vector<16x16xf32>
    %144 = arith.mulf %142, %143 : vector<16x16xf32>
    %145 = vector.broadcast %117 : vector<1x16xf32> to vector<16x16xf32>
    %146 = arith.addf %144, %145 : vector<16x16xf32>
    %cst_45 = arith.constant dense<0xFF800000> : vector<16xf32>
    %147 = vector.multi_reduction <maximumf>, %146, %cst_45 [1] : vector<16x16xf32> to vector<16xf32>
    %148 = vector.shape_cast %147 : vector<16xf32> to vector<16x1xf32>
    %149 = vector.broadcast %148 : vector<16x1xf32> to vector<16x16xf32>
    %150 = arith.subf %146, %149 : vector<16x16xf32>
    %151 = math.exp %150 : vector<16x16xf32>
    %cst_46 = arith.constant dense<0.000000e+00> : vector<16xf32>
    %152 = vector.multi_reduction <add>, %151, %cst_46 [1] : vector<16x16xf32> to vector<16xf32>
    %153 = vector.shape_cast %152 : vector<16xf32> to vector<16x1xf32>
    %154 = tpu.reciprocal %153 {approx = true} : vector<16x1xf32> -> vector<16x1xf32>
    %155 = vector.broadcast %154 : vector<16x1xf32> to vector<16x16xf32>
    %156 = arith.mulf %151, %155 : vector<16x16xf32>
    %cst_47 = arith.constant dense<0.000000e+00> : vector<16x16xf32>
    %157 = tpu.matmul %156, %140, %cst_47 {dimension_numbers = #tpu.dot_dimension_numbers<[1], [0], [0], [1], [0, 0, 1, 1], [], []>} : vector<16x16xf32>, vector<16x16xf32>, vector<16x16xf32> -> vector<16x16xf32>
    %158 = vector.extract_strided_slice %116 {offsets = [0, 32], sizes = [16, 16], strides = [1, 1]} : vector<16x192xf32> to vector<16x16xf32>
    %159 = vector.extract_strided_slice %116 {offsets = [0, 96], sizes = [16, 16], strides = [1, 1]} : vector<16x192xf32> to vector<16x16xf32>
    %160 = vector.extract_strided_slice %116 {offsets = [0, 160], sizes = [16, 16], strides = [1, 1]} : vector<16x192xf32> to vector<16x16xf32>
    %161 = tpu.transpose %159, [1, 0] : vector<16x16xf32> -> vector<16x16xf32>
    %cst_48 = arith.constant dense<0.000000e+00> : vector<16x16xf32>
    %162 = tpu.matmul %158, %161, %cst_48 {dimension_numbers = #tpu.dot_dimension_numbers<[1], [0], [0], [1], [0, 0, 1, 1], [], []>} : vector<16x16xf32>, vector<16x16xf32>, vector<16x16xf32> -> vector<16x16xf32>
    %cst_49 = arith.constant 2.500000e-01 : f32
    %163 = vector.broadcast %cst_49 : f32 to vector<16x16xf32>
    %164 = arith.mulf %162, %163 : vector<16x16xf32>
    %165 = vector.broadcast %117 : vector<1x16xf32> to vector<16x16xf32>
    %166 = arith.addf %164, %165 : vector<16x16xf32>
    %cst_50 = arith.constant dense<0xFF800000> : vector<16xf32>
    %167 = vector.multi_reduction <maximumf>, %166, %cst_50 [1] : vector<16x16xf32> to vector<16xf32>
    %168 = vector.shape_cast %167 : vector<16xf32> to vector<16x1xf32>
    %169 = vector.broadcast %168 : vector<16x1xf32> to vector<16x16xf32>
    %170 = arith.subf %166, %169 : vector<16x16xf32>
    %171 = math.exp %170 : vector<16x16xf32>
    %cst_51 = arith.constant dense<0.000000e+00> : vector<16xf32>
    %172 = vector.multi_reduction <add>, %171, %cst_51 [1] : vector<16x16xf32> to vector<16xf32>
    %173 = vector.shape_cast %172 : vector<16xf32> to vector<16x1xf32>
    %174 = tpu.reciprocal %173 {approx = true} : vector<16x1xf32> -> vector<16x1xf32>
    %175 = vector.broadcast %174 : vector<16x1xf32> to vector<16x16xf32>
    %176 = arith.mulf %171, %175 : vector<16x16xf32>
    %cst_52 = arith.constant dense<0.000000e+00> : vector<16x16xf32>
    %177 = tpu.matmul %176, %160, %cst_52 {dimension_numbers = #tpu.dot_dimension_numbers<[1], [0], [0], [1], [0, 0, 1, 1], [], []>} : vector<16x16xf32>, vector<16x16xf32>, vector<16x16xf32> -> vector<16x16xf32>
    %178 = vector.extract_strided_slice %116 {offsets = [0, 48], sizes = [16, 16], strides = [1, 1]} : vector<16x192xf32> to vector<16x16xf32>
    %179 = vector.extract_strided_slice %116 {offsets = [0, 112], sizes = [16, 16], strides = [1, 1]} : vector<16x192xf32> to vector<16x16xf32>
    %180 = vector.extract_strided_slice %116 {offsets = [0, 176], sizes = [16, 16], strides = [1, 1]} : vector<16x192xf32> to vector<16x16xf32>
    %181 = tpu.transpose %179, [1, 0] : vector<16x16xf32> -> vector<16x16xf32>
    %cst_53 = arith.constant dense<0.000000e+00> : vector<16x16xf32>
    %182 = tpu.matmul %178, %181, %cst_53 {dimension_numbers = #tpu.dot_dimension_numbers<[1], [0], [0], [1], [0, 0, 1, 1], [], []>} : vector<16x16xf32>, vector<16x16xf32>, vector<16x16xf32> -> vector<16x16xf32>
    %cst_54 = arith.constant 2.500000e-01 : f32
    %183 = vector.broadcast %cst_54 : f32 to vector<16x16xf32>
    %184 = arith.mulf %182, %183 : vector<16x16xf32>
    %185 = vector.broadcast %117 : vector<1x16xf32> to vector<16x16xf32>
    %186 = arith.addf %184, %185 : vector<16x16xf32>
    %cst_55 = arith.constant dense<0xFF800000> : vector<16xf32>
    %187 = vector.multi_reduction <maximumf>, %186, %cst_55 [1] : vector<16x16xf32> to vector<16xf32>
    %188 = vector.shape_cast %187 : vector<16xf32> to vector<16x1xf32>
    %189 = vector.broadcast %188 : vector<16x1xf32> to vector<16x16xf32>
    %190 = arith.subf %186, %189 : vector<16x16xf32>
    %191 = math.exp %190 : vector<16x16xf32>
    %cst_56 = arith.constant dense<0.000000e+00> : vector<16xf32>
    %192 = vector.multi_reduction <add>, %191, %cst_56 [1] : vector<16x16xf32> to vector<16xf32>
    %193 = vector.shape_cast %192 : vector<16xf32> to vector<16x1xf32>
    %194 = tpu.reciprocal %193 {approx = true} : vector<16x1xf32> -> vector<16x1xf32>
    %195 = vector.broadcast %194 : vector<16x1xf32> to vector<16x16xf32>
    %196 = arith.mulf %191, %195 : vector<16x16xf32>
    %cst_57 = arith.constant dense<0.000000e+00> : vector<16x16xf32>
    %197 = tpu.matmul %196, %180, %cst_57 {dimension_numbers = #tpu.dot_dimension_numbers<[1], [0], [0], [1], [0, 0, 1, 1], [], []>} : vector<16x16xf32>, vector<16x16xf32>, vector<16x16xf32> -> vector<16x16xf32>
    %198 = tpu.concatenate %137, %157, %177, %197 in 1 : vector<16x16xf32>, vector<16x16xf32>, vector<16x16xf32>, vector<16x16xf32> -> vector<16x64xf32>
    %199 = tpu.concatenate %115, %198 in 0 : vector<16x64xf32>, vector<16x64xf32> -> vector<32x64xf32>
    %c0_58 = arith.constant 0 : index
    %c0_59 = arith.constant 0 : index
    %c0_60 = arith.constant 0 : index
    %200 = vector.load %arg6[%c0_58, %c0_59, %c0_60] : memref<2x64x64xf32, #tpu.memory_space<vmem>>, vector<1x64x64xf32>
    %201 = vector.shape_cast %200 : vector<1x64x64xf32> to vector<64x64xf32>
    %cst_61 = arith.constant dense<0.000000e+00> : vector<32x64xf32>
    %202 = tpu.matmul %199, %201, %cst_61 {dimension_numbers = #tpu.dot_dimension_numbers<[1], [0], [0], [1], [0, 0, 1, 1], [], []>} : vector<32x64xf32>, vector<64x64xf32>, vector<32x64xf32> -> vector<32x64xf32>
    %c0_62 = arith.constant 0 : index
    %c0_63 = arith.constant 0 : index
    %c0_64 = arith.constant 0 : index
    %203 = vector.load %arg7[%c0_62, %c0_63, %c0_64] : memref<2x1x64xf32, #tpu.memory_space<vmem>>, vector<1x1x64xf32>
    %204 = vector.shape_cast %203 : vector<1x1x64xf32> to vector<1x64xf32>
    %205 = vector.broadcast %204 : vector<1x64xf32> to vector<32x64xf32>
    %206 = arith.addf %202, %205 : vector<32x64xf32>
    %207 = arith.addf %206, %24 : vector<32x64xf32>
    %c0_65 = arith.constant 0 : index
    %c0_66 = arith.constant 0 : index
    %c0_67 = arith.constant 0 : index
    %208 = vector.load %arg8[%c0_65, %c0_66, %c0_67] : memref<2x1x64xf32, #tpu.memory_space<vmem>>, vector<1x1x64xf32>
    %209 = vector.shape_cast %208 : vector<1x1x64xf32> to vector<1x64xf32>
    %c0_68 = arith.constant 0 : index
    %c0_69 = arith.constant 0 : index
    %c0_70 = arith.constant 0 : index
    %210 = vector.load %arg9[%c0_68, %c0_69, %c0_70] : memref<2x1x64xf32, #tpu.memory_space<vmem>>, vector<1x1x64xf32>
    %211 = vector.shape_cast %210 : vector<1x1x64xf32> to vector<1x64xf32>
    %cst_71 = arith.constant dense<0.000000e+00> : vector<32xf32>
    %212 = vector.multi_reduction <add>, %207, %cst_71 [1] : vector<32x64xf32> to vector<32xf32>
    %213 = vector.shape_cast %212 : vector<32xf32> to vector<32x1xf32>
    %cst_72 = arith.constant 6.400000e+01 : f32
    %214 = vector.broadcast %cst_72 : f32 to vector<32x1xf32>
    %215 = arith.divf %213, %214 : vector<32x1xf32>
    %216 = vector.broadcast %215 : vector<32x1xf32> to vector<32x64xf32>
    %217 = arith.subf %207, %216 : vector<32x64xf32>
    %218 = arith.mulf %217, %217 : vector<32x64xf32>
    %cst_73 = arith.constant dense<0.000000e+00> : vector<32xf32>
    %219 = vector.multi_reduction <add>, %218, %cst_73 [1] : vector<32x64xf32> to vector<32xf32>
    %220 = vector.shape_cast %219 : vector<32xf32> to vector<32x1xf32>
    %cst_74 = arith.constant 6.400000e+01 : f32
    %221 = vector.broadcast %cst_74 : f32 to vector<32x1xf32>
    %222 = arith.divf %220, %221 : vector<32x1xf32>
    %223 = vector.broadcast %215 : vector<32x1xf32> to vector<32x64xf32>
    %224 = arith.subf %207, %223 : vector<32x64xf32>
    %cst_75 = arith.constant 9.99999996E-13 : f32
    %225 = vector.broadcast %cst_75 : f32 to vector<32x1xf32>
    %226 = arith.addf %222, %225 : vector<32x1xf32>
    %227 = math.rsqrt %226 : vector<32x1xf32>
    %228 = vector.broadcast %227 : vector<32x1xf32> to vector<32x64xf32>
    %229 = arith.mulf %224, %228 : vector<32x64xf32>
    %230 = vector.broadcast %209 : vector<1x64xf32> to vector<32x64xf32>
    %231 = arith.mulf %229, %230 : vector<32x64xf32>
    %232 = vector.broadcast %211 : vector<1x64xf32> to vector<32x64xf32>
    %233 = arith.addf %231, %232 : vector<32x64xf32>
    %c0_76 = arith.constant 0 : index
    %c0_77 = arith.constant 0 : index
    %c0_78 = arith.constant 0 : index
    %234 = vector.load %arg10[%c0_76, %c0_77, %c0_78] : memref<2x64x128xf32, #tpu.memory_space<vmem>>, vector<1x64x128xf32>
    %235 = vector.shape_cast %234 : vector<1x64x128xf32> to vector<64x128xf32>
    %cst_79 = arith.constant dense<0.000000e+00> : vector<32x128xf32>
    %236 = tpu.matmul %233, %235, %cst_79 {dimension_numbers = #tpu.dot_dimension_numbers<[1], [0], [0], [1], [0, 0, 1, 1], [], []>} : vector<32x64xf32>, vector<64x128xf32>, vector<32x128xf32> -> vector<32x128xf32>
    %c0_80 = arith.constant 0 : index
    %c0_81 = arith.constant 0 : index
    %c0_82 = arith.constant 0 : index
    %237 = vector.load %arg11[%c0_80, %c0_81, %c0_82] : memref<2x1x128xf32, #tpu.memory_space<vmem>>, vector<1x1x128xf32>
    %238 = vector.shape_cast %237 : vector<1x1x128xf32> to vector<1x128xf32>
    %239 = vector.broadcast %238 : vector<1x128xf32> to vector<32x128xf32>
    %240 = arith.addf %236, %239 : vector<32x128xf32>
    %241 = arith.mulf %240, %240 : vector<32x128xf32>
    %242 = arith.mulf %240, %241 : vector<32x128xf32>
    %cst_83 = arith.constant 4.471500e-02 : f32
    %243 = vector.broadcast %cst_83 : f32 to vector<32x128xf32>
    %244 = arith.mulf %243, %242 : vector<32x128xf32>
    %245 = arith.addf %240, %244 : vector<32x128xf32>
    %cst_84 = arith.constant 0.797884583 : f32
    %246 = vector.broadcast %cst_84 : f32 to vector<32x128xf32>
    %247 = arith.mulf %246, %245 : vector<32x128xf32>
    %248 = math.tanh %247 : vector<32x128xf32>
    %cst_85 = arith.constant 1.000000e+00 : f32
    %249 = vector.broadcast %cst_85 : f32 to vector<32x128xf32>
    %250 = arith.addf %249, %248 : vector<32x128xf32>
    %cst_86 = arith.constant 5.000000e-01 : f32
    %251 = vector.broadcast %cst_86 : f32 to vector<32x128xf32>
    %252 = arith.mulf %251, %250 : vector<32x128xf32>
    %253 = arith.mulf %240, %252 : vector<32x128xf32>
    %c0_87 = arith.constant 0 : index
    %c0_88 = arith.constant 0 : index
    %c0_89 = arith.constant 0 : index
    %254 = vector.load %arg12[%c0_87, %c0_88, %c0_89] : memref<2x128x64xf32, #tpu.memory_space<vmem>>, vector<1x128x64xf32>
    %255 = vector.shape_cast %254 : vector<1x128x64xf32> to vector<128x64xf32>
    %cst_90 = arith.constant dense<0.000000e+00> : vector<32x64xf32>
    %256 = tpu.matmul %253, %255, %cst_90 {dimension_numbers = #tpu.dot_dimension_numbers<[1], [0], [0], [1], [0, 0, 1, 1], [], []>} : vector<32x128xf32>, vector<128x64xf32>, vector<32x64xf32> -> vector<32x64xf32>
    %c0_91 = arith.constant 0 : index
    %c0_92 = arith.constant 0 : index
    %c0_93 = arith.constant 0 : index
    %257 = vector.load %arg13[%c0_91, %c0_92, %c0_93] : memref<2x1x64xf32, #tpu.memory_space<vmem>>, vector<1x1x64xf32>
    %258 = vector.shape_cast %257 : vector<1x1x64xf32> to vector<1x64xf32>
    %259 = vector.broadcast %258 : vector<1x64xf32> to vector<32x64xf32>
    %260 = arith.addf %256, %259 : vector<32x64xf32>
    %261 = arith.addf %260, %233 : vector<32x64xf32>
    %c0_94 = arith.constant 0 : index
    %c0_95 = arith.constant 0 : index
    %c0_96 = arith.constant 0 : index
    %262 = vector.load %arg14[%c0_94, %c0_95, %c0_96] : memref<2x1x64xf32, #tpu.memory_space<vmem>>, vector<1x1x64xf32>
    %263 = vector.shape_cast %262 : vector<1x1x64xf32> to vector<1x64xf32>
    %c0_97 = arith.constant 0 : index
    %c0_98 = arith.constant 0 : index
    %c0_99 = arith.constant 0 : index
    %264 = vector.load %arg15[%c0_97, %c0_98, %c0_99] : memref<2x1x64xf32, #tpu.memory_space<vmem>>, vector<1x1x64xf32>
    %265 = vector.shape_cast %264 : vector<1x1x64xf32> to vector<1x64xf32>
    %cst_100 = arith.constant dense<0.000000e+00> : vector<32xf32>
    %266 = vector.multi_reduction <add>, %261, %cst_100 [1] : vector<32x64xf32> to vector<32xf32>
    %267 = vector.shape_cast %266 : vector<32xf32> to vector<32x1xf32>
    %cst_101 = arith.constant 6.400000e+01 : f32
    %268 = vector.broadcast %cst_101 : f32 to vector<32x1xf32>
    %269 = arith.divf %267, %268 : vector<32x1xf32>
    %270 = vector.broadcast %269 : vector<32x1xf32> to vector<32x64xf32>
    %271 = arith.subf %261, %270 : vector<32x64xf32>
    %272 = arith.mulf %271, %271 : vector<32x64xf32>
    %cst_102 = arith.constant dense<0.000000e+00> : vector<32xf32>
    %273 = vector.multi_reduction <add>, %272, %cst_102 [1] : vector<32x64xf32> to vector<32xf32>
    %274 = vector.shape_cast %273 : vector<32xf32> to vector<32x1xf32>
    %cst_103 = arith.constant 6.400000e+01 : f32
    %275 = vector.broadcast %cst_103 : f32 to vector<32x1xf32>
    %276 = arith.divf %274, %275 : vector<32x1xf32>
    %277 = vector.broadcast %269 : vector<32x1xf32> to vector<32x64xf32>
    %278 = arith.subf %261, %277 : vector<32x64xf32>
    %cst_104 = arith.constant 9.99999996E-13 : f32
    %279 = vector.broadcast %cst_104 : f32 to vector<32x1xf32>
    %280 = arith.addf %276, %279 : vector<32x1xf32>
    %281 = math.rsqrt %280 : vector<32x1xf32>
    %282 = vector.broadcast %281 : vector<32x1xf32> to vector<32x64xf32>
    %283 = arith.mulf %278, %282 : vector<32x64xf32>
    %284 = vector.broadcast %263 : vector<1x64xf32> to vector<32x64xf32>
    %285 = arith.mulf %283, %284 : vector<32x64xf32>
    %286 = vector.broadcast %265 : vector<1x64xf32> to vector<32x64xf32>
    %287 = arith.addf %285, %286 : vector<32x64xf32>
    %c1 = arith.constant 1 : index
    %c0_105 = arith.constant 0 : index
    %c0_106 = arith.constant 0 : index
    %288 = vector.load %arg4[%c1, %c0_105, %c0_106] : memref<2x64x192xf32, #tpu.memory_space<vmem>>, vector<1x64x192xf32>
    %289 = vector.shape_cast %288 : vector<1x64x192xf32> to vector<64x192xf32>
    %cst_107 = arith.constant dense<0.000000e+00> : vector<32x192xf32>
    %290 = tpu.matmul %287, %289, %cst_107 {dimension_numbers = #tpu.dot_dimension_numbers<[1], [0], [0], [1], [0, 0, 1, 1], [], []>} : vector<32x64xf32>, vector<64x192xf32>, vector<32x192xf32> -> vector<32x192xf32>
    %c1_108 = arith.constant 1 : index
    %c0_109 = arith.constant 0 : index
    %c0_110 = arith.constant 0 : index
    %291 = vector.load %arg5[%c1_108, %c0_109, %c0_110] : memref<2x1x192xf32, #tpu.memory_space<vmem>>, vector<1x1x192xf32>
    %292 = vector.shape_cast %291 : vector<1x1x192xf32> to vector<1x192xf32>
    %293 = vector.broadcast %292 : vector<1x192xf32> to vector<32x192xf32>
    %294 = arith.addf %290, %293 : vector<32x192xf32>
    %295 = vector.extract_strided_slice %294 {offsets = [0, 0], sizes = [16, 192], strides = [1, 1]} : vector<32x192xf32> to vector<16x192xf32>
    %296 = vector.extract_strided_slice %25 {offsets = [0, 0], sizes = [1, 16], strides = [1, 1]} : vector<2x16xf32> to vector<1x16xf32>
    %297 = vector.extract_strided_slice %295 {offsets = [0, 0], sizes = [16, 16], strides = [1, 1]} : vector<16x192xf32> to vector<16x16xf32>
    %298 = vector.extract_strided_slice %295 {offsets = [0, 64], sizes = [16, 16], strides = [1, 1]} : vector<16x192xf32> to vector<16x16xf32>
    %299 = vector.extract_strided_slice %295 {offsets = [0, 128], sizes = [16, 16], strides = [1, 1]} : vector<16x192xf32> to vector<16x16xf32>
    %300 = tpu.transpose %298, [1, 0] : vector<16x16xf32> -> vector<16x16xf32>
    %cst_111 = arith.constant dense<0.000000e+00> : vector<16x16xf32>
    %301 = tpu.matmul %297, %300, %cst_111 {dimension_numbers = #tpu.dot_dimension_numbers<[1], [0], [0], [1], [0, 0, 1, 1], [], []>} : vector<16x16xf32>, vector<16x16xf32>, vector<16x16xf32> -> vector<16x16xf32>
    %cst_112 = arith.constant 2.500000e-01 : f32
    %302 = vector.broadcast %cst_112 : f32 to vector<16x16xf32>
    %303 = arith.mulf %301, %302 : vector<16x16xf32>
    %304 = vector.broadcast %296 : vector<1x16xf32> to vector<16x16xf32>
    %305 = arith.addf %303, %304 : vector<16x16xf32>
    %cst_113 = arith.constant dense<0xFF800000> : vector<16xf32>
    %306 = vector.multi_reduction <maximumf>, %305, %cst_113 [1] : vector<16x16xf32> to vector<16xf32>
    %307 = vector.shape_cast %306 : vector<16xf32> to vector<16x1xf32>
    %308 = vector.broadcast %307 : vector<16x1xf32> to vector<16x16xf32>
    %309 = arith.subf %305, %308 : vector<16x16xf32>
    %310 = math.exp %309 : vector<16x16xf32>
    %cst_114 = arith.constant dense<0.000000e+00> : vector<16xf32>
    %311 = vector.multi_reduction <add>, %310, %cst_114 [1] : vector<16x16xf32> to vector<16xf32>
    %312 = vector.shape_cast %311 : vector<16xf32> to vector<16x1xf32>
    %313 = tpu.reciprocal %312 {approx = true} : vector<16x1xf32> -> vector<16x1xf32>
    %314 = vector.broadcast %313 : vector<16x1xf32> to vector<16x16xf32>
    %315 = arith.mulf %310, %314 : vector<16x16xf32>
    %cst_115 = arith.constant dense<0.000000e+00> : vector<16x16xf32>
    %316 = tpu.matmul %315, %299, %cst_115 {dimension_numbers = #tpu.dot_dimension_numbers<[1], [0], [0], [1], [0, 0, 1, 1], [], []>} : vector<16x16xf32>, vector<16x16xf32>, vector<16x16xf32> -> vector<16x16xf32>
    %317 = vector.extract_strided_slice %295 {offsets = [0, 16], sizes = [16, 16], strides = [1, 1]} : vector<16x192xf32> to vector<16x16xf32>
    %318 = vector.extract_strided_slice %295 {offsets = [0, 80], sizes = [16, 16], strides = [1, 1]} : vector<16x192xf32> to vector<16x16xf32>
    %319 = vector.extract_strided_slice %295 {offsets = [0, 144], sizes = [16, 16], strides = [1, 1]} : vector<16x192xf32> to vector<16x16xf32>
    %320 = tpu.transpose %318, [1, 0] : vector<16x16xf32> -> vector<16x16xf32>
    %cst_116 = arith.constant dense<0.000000e+00> : vector<16x16xf32>
    %321 = tpu.matmul %317, %320, %cst_116 {dimension_numbers = #tpu.dot_dimension_numbers<[1], [0], [0], [1], [0, 0, 1, 1], [], []>} : vector<16x16xf32>, vector<16x16xf32>, vector<16x16xf32> -> vector<16x16xf32>
    %cst_117 = arith.constant 2.500000e-01 : f32
    %322 = vector.broadcast %cst_117 : f32 to vector<16x16xf32>
    %323 = arith.mulf %321, %322 : vector<16x16xf32>
    %324 = vector.broadcast %296 : vector<1x16xf32> to vector<16x16xf32>
    %325 = arith.addf %323, %324 : vector<16x16xf32>
    %cst_118 = arith.constant dense<0xFF800000> : vector<16xf32>
    %326 = vector.multi_reduction <maximumf>, %325, %cst_118 [1] : vector<16x16xf32> to vector<16xf32>
    %327 = vector.shape_cast %326 : vector<16xf32> to vector<16x1xf32>
    %328 = vector.broadcast %327 : vector<16x1xf32> to vector<16x16xf32>
    %329 = arith.subf %325, %328 : vector<16x16xf32>
    %330 = math.exp %329 : vector<16x16xf32>
    %cst_119 = arith.constant dense<0.000000e+00> : vector<16xf32>
    %331 = vector.multi_reduction <add>, %330, %cst_119 [1] : vector<16x16xf32> to vector<16xf32>
    %332 = vector.shape_cast %331 : vector<16xf32> to vector<16x1xf32>
    %333 = tpu.reciprocal %332 {approx = true} : vector<16x1xf32> -> vector<16x1xf32>
    %334 = vector.broadcast %333 : vector<16x1xf32> to vector<16x16xf32>
    %335 = arith.mulf %330, %334 : vector<16x16xf32>
    %cst_120 = arith.constant dense<0.000000e+00> : vector<16x16xf32>
    %336 = tpu.matmul %335, %319, %cst_120 {dimension_numbers = #tpu.dot_dimension_numbers<[1], [0], [0], [1], [0, 0, 1, 1], [], []>} : vector<16x16xf32>, vector<16x16xf32>, vector<16x16xf32> -> vector<16x16xf32>
    %337 = vector.extract_strided_slice %295 {offsets = [0, 32], sizes = [16, 16], strides = [1, 1]} : vector<16x192xf32> to vector<16x16xf32>
    %338 = vector.extract_strided_slice %295 {offsets = [0, 96], sizes = [16, 16], strides = [1, 1]} : vector<16x192xf32> to vector<16x16xf32>
    %339 = vector.extract_strided_slice %295 {offsets = [0, 160], sizes = [16, 16], strides = [1, 1]} : vector<16x192xf32> to vector<16x16xf32>
    %340 = tpu.transpose %338, [1, 0] : vector<16x16xf32> -> vector<16x16xf32>
    %cst_121 = arith.constant dense<0.000000e+00> : vector<16x16xf32>
    %341 = tpu.matmul %337, %340, %cst_121 {dimension_numbers = #tpu.dot_dimension_numbers<[1], [0], [0], [1], [0, 0, 1, 1], [], []>} : vector<16x16xf32>, vector<16x16xf32>, vector<16x16xf32> -> vector<16x16xf32>
    %cst_122 = arith.constant 2.500000e-01 : f32
    %342 = vector.broadcast %cst_122 : f32 to vector<16x16xf32>
    %343 = arith.mulf %341, %342 : vector<16x16xf32>
    %344 = vector.broadcast %296 : vector<1x16xf32> to vector<16x16xf32>
    %345 = arith.addf %343, %344 : vector<16x16xf32>
    %cst_123 = arith.constant dense<0xFF800000> : vector<16xf32>
    %346 = vector.multi_reduction <maximumf>, %345, %cst_123 [1] : vector<16x16xf32> to vector<16xf32>
    %347 = vector.shape_cast %346 : vector<16xf32> to vector<16x1xf32>
    %348 = vector.broadcast %347 : vector<16x1xf32> to vector<16x16xf32>
    %349 = arith.subf %345, %348 : vector<16x16xf32>
    %350 = math.exp %349 : vector<16x16xf32>
    %cst_124 = arith.constant dense<0.000000e+00> : vector<16xf32>
    %351 = vector.multi_reduction <add>, %350, %cst_124 [1] : vector<16x16xf32> to vector<16xf32>
    %352 = vector.shape_cast %351 : vector<16xf32> to vector<16x1xf32>
    %353 = tpu.reciprocal %352 {approx = true} : vector<16x1xf32> -> vector<16x1xf32>
    %354 = vector.broadcast %353 : vector<16x1xf32> to vector<16x16xf32>
    %355 = arith.mulf %350, %354 : vector<16x16xf32>
    %cst_125 = arith.constant dense<0.000000e+00> : vector<16x16xf32>
    %356 = tpu.matmul %355, %339, %cst_125 {dimension_numbers = #tpu.dot_dimension_numbers<[1], [0], [0], [1], [0, 0, 1, 1], [], []>} : vector<16x16xf32>, vector<16x16xf32>, vector<16x16xf32> -> vector<16x16xf32>
    %357 = vector.extract_strided_slice %295 {offsets = [0, 48], sizes = [16, 16], strides = [1, 1]} : vector<16x192xf32> to vector<16x16xf32>
    %358 = vector.extract_strided_slice %295 {offsets = [0, 112], sizes = [16, 16], strides = [1, 1]} : vector<16x192xf32> to vector<16x16xf32>
    %359 = vector.extract_strided_slice %295 {offsets = [0, 176], sizes = [16, 16], strides = [1, 1]} : vector<16x192xf32> to vector<16x16xf32>
    %360 = tpu.transpose %358, [1, 0] : vector<16x16xf32> -> vector<16x16xf32>
    %cst_126 = arith.constant dense<0.000000e+00> : vector<16x16xf32>
    %361 = tpu.matmul %357, %360, %cst_126 {dimension_numbers = #tpu.dot_dimension_numbers<[1], [0], [0], [1], [0, 0, 1, 1], [], []>} : vector<16x16xf32>, vector<16x16xf32>, vector<16x16xf32> -> vector<16x16xf32>
    %cst_127 = arith.constant 2.500000e-01 : f32
    %362 = vector.broadcast %cst_127 : f32 to vector<16x16xf32>
    %363 = arith.mulf %361, %362 : vector<16x16xf32>
    %364 = vector.broadcast %296 : vector<1x16xf32> to vector<16x16xf32>
    %365 = arith.addf %363, %364 : vector<16x16xf32>
    %cst_128 = arith.constant dense<0xFF800000> : vector<16xf32>
    %366 = vector.multi_reduction <maximumf>, %365, %cst_128 [1] : vector<16x16xf32> to vector<16xf32>
    %367 = vector.shape_cast %366 : vector<16xf32> to vector<16x1xf32>
    %368 = vector.broadcast %367 : vector<16x1xf32> to vector<16x16xf32>
    %369 = arith.subf %365, %368 : vector<16x16xf32>
    %370 = math.exp %369 : vector<16x16xf32>
    %cst_129 = arith.constant dense<0.000000e+00> : vector<16xf32>
    %371 = vector.multi_reduction <add>, %370, %cst_129 [1] : vector<16x16xf32> to vector<16xf32>
    %372 = vector.shape_cast %371 : vector<16xf32> to vector<16x1xf32>
    %373 = tpu.reciprocal %372 {approx = true} : vector<16x1xf32> -> vector<16x1xf32>
    %374 = vector.broadcast %373 : vector<16x1xf32> to vector<16x16xf32>
    %375 = arith.mulf %370, %374 : vector<16x16xf32>
    %cst_130 = arith.constant dense<0.000000e+00> : vector<16x16xf32>
    %376 = tpu.matmul %375, %359, %cst_130 {dimension_numbers = #tpu.dot_dimension_numbers<[1], [0], [0], [1], [0, 0, 1, 1], [], []>} : vector<16x16xf32>, vector<16x16xf32>, vector<16x16xf32> -> vector<16x16xf32>
    %377 = tpu.concatenate %316, %336, %356, %376 in 1 : vector<16x16xf32>, vector<16x16xf32>, vector<16x16xf32>, vector<16x16xf32> -> vector<16x64xf32>
    %378 = vector.extract_strided_slice %294 {offsets = [16, 0], sizes = [16, 192], strides = [1, 1]} : vector<32x192xf32> to vector<16x192xf32>
    %379 = vector.extract_strided_slice %25 {offsets = [1, 0], sizes = [1, 16], strides = [1, 1]} : vector<2x16xf32> to vector<1x16xf32>
    %380 = vector.extract_strided_slice %378 {offsets = [0, 0], sizes = [16, 16], strides = [1, 1]} : vector<16x192xf32> to vector<16x16xf32>
    %381 = vector.extract_strided_slice %378 {offsets = [0, 64], sizes = [16, 16], strides = [1, 1]} : vector<16x192xf32> to vector<16x16xf32>
    %382 = vector.extract_strided_slice %378 {offsets = [0, 128], sizes = [16, 16], strides = [1, 1]} : vector<16x192xf32> to vector<16x16xf32>
    %383 = tpu.transpose %381, [1, 0] : vector<16x16xf32> -> vector<16x16xf32>
    %cst_131 = arith.constant dense<0.000000e+00> : vector<16x16xf32>
    %384 = tpu.matmul %380, %383, %cst_131 {dimension_numbers = #tpu.dot_dimension_numbers<[1], [0], [0], [1], [0, 0, 1, 1], [], []>} : vector<16x16xf32>, vector<16x16xf32>, vector<16x16xf32> -> vector<16x16xf32>
    %cst_132 = arith.constant 2.500000e-01 : f32
    %385 = vector.broadcast %cst_132 : f32 to vector<16x16xf32>
    %386 = arith.mulf %384, %385 : vector<16x16xf32>
    %387 = vector.broadcast %379 : vector<1x16xf32> to vector<16x16xf32>
    %388 = arith.addf %386, %387 : vector<16x16xf32>
    %cst_133 = arith.constant dense<0xFF800000> : vector<16xf32>
    %389 = vector.multi_reduction <maximumf>, %388, %cst_133 [1] : vector<16x16xf32> to vector<16xf32>
    %390 = vector.shape_cast %389 : vector<16xf32> to vector<16x1xf32>
    %391 = vector.broadcast %390 : vector<16x1xf32> to vector<16x16xf32>
    %392 = arith.subf %388, %391 : vector<16x16xf32>
    %393 = math.exp %392 : vector<16x16xf32>
    %cst_134 = arith.constant dense<0.000000e+00> : vector<16xf32>
    %394 = vector.multi_reduction <add>, %393, %cst_134 [1] : vector<16x16xf32> to vector<16xf32>
    %395 = vector.shape_cast %394 : vector<16xf32> to vector<16x1xf32>
    %396 = tpu.reciprocal %395 {approx = true} : vector<16x1xf32> -> vector<16x1xf32>
    %397 = vector.broadcast %396 : vector<16x1xf32> to vector<16x16xf32>
    %398 = arith.mulf %393, %397 : vector<16x16xf32>
    %cst_135 = arith.constant dense<0.000000e+00> : vector<16x16xf32>
    %399 = tpu.matmul %398, %382, %cst_135 {dimension_numbers = #tpu.dot_dimension_numbers<[1], [0], [0], [1], [0, 0, 1, 1], [], []>} : vector<16x16xf32>, vector<16x16xf32>, vector<16x16xf32> -> vector<16x16xf32>
    %400 = vector.extract_strided_slice %378 {offsets = [0, 16], sizes = [16, 16], strides = [1, 1]} : vector<16x192xf32> to vector<16x16xf32>
    %401 = vector.extract_strided_slice %378 {offsets = [0, 80], sizes = [16, 16], strides = [1, 1]} : vector<16x192xf32> to vector<16x16xf32>
    %402 = vector.extract_strided_slice %378 {offsets = [0, 144], sizes = [16, 16], strides = [1, 1]} : vector<16x192xf32> to vector<16x16xf32>
    %403 = tpu.transpose %401, [1, 0] : vector<16x16xf32> -> vector<16x16xf32>
    %cst_136 = arith.constant dense<0.000000e+00> : vector<16x16xf32>
    %404 = tpu.matmul %400, %403, %cst_136 {dimension_numbers = #tpu.dot_dimension_numbers<[1], [0], [0], [1], [0, 0, 1, 1], [], []>} : vector<16x16xf32>, vector<16x16xf32>, vector<16x16xf32> -> vector<16x16xf32>
    %cst_137 = arith.constant 2.500000e-01 : f32
    %405 = vector.broadcast %cst_137 : f32 to vector<16x16xf32>
    %406 = arith.mulf %404, %405 : vector<16x16xf32>
    %407 = vector.broadcast %379 : vector<1x16xf32> to vector<16x16xf32>
    %408 = arith.addf %406, %407 : vector<16x16xf32>
    %cst_138 = arith.constant dense<0xFF800000> : vector<16xf32>
    %409 = vector.multi_reduction <maximumf>, %408, %cst_138 [1] : vector<16x16xf32> to vector<16xf32>
    %410 = vector.shape_cast %409 : vector<16xf32> to vector<16x1xf32>
    %411 = vector.broadcast %410 : vector<16x1xf32> to vector<16x16xf32>
    %412 = arith.subf %408, %411 : vector<16x16xf32>
    %413 = math.exp %412 : vector<16x16xf32>
    %cst_139 = arith.constant dense<0.000000e+00> : vector<16xf32>
    %414 = vector.multi_reduction <add>, %413, %cst_139 [1] : vector<16x16xf32> to vector<16xf32>
    %415 = vector.shape_cast %414 : vector<16xf32> to vector<16x1xf32>
    %416 = tpu.reciprocal %415 {approx = true} : vector<16x1xf32> -> vector<16x1xf32>
    %417 = vector.broadcast %416 : vector<16x1xf32> to vector<16x16xf32>
    %418 = arith.mulf %413, %417 : vector<16x16xf32>
    %cst_140 = arith.constant dense<0.000000e+00> : vector<16x16xf32>
    %419 = tpu.matmul %418, %402, %cst_140 {dimension_numbers = #tpu.dot_dimension_numbers<[1], [0], [0], [1], [0, 0, 1, 1], [], []>} : vector<16x16xf32>, vector<16x16xf32>, vector<16x16xf32> -> vector<16x16xf32>
    %420 = vector.extract_strided_slice %378 {offsets = [0, 32], sizes = [16, 16], strides = [1, 1]} : vector<16x192xf32> to vector<16x16xf32>
    %421 = vector.extract_strided_slice %378 {offsets = [0, 96], sizes = [16, 16], strides = [1, 1]} : vector<16x192xf32> to vector<16x16xf32>
    %422 = vector.extract_strided_slice %378 {offsets = [0, 160], sizes = [16, 16], strides = [1, 1]} : vector<16x192xf32> to vector<16x16xf32>
    %423 = tpu.transpose %421, [1, 0] : vector<16x16xf32> -> vector<16x16xf32>
    %cst_141 = arith.constant dense<0.000000e+00> : vector<16x16xf32>
    %424 = tpu.matmul %420, %423, %cst_141 {dimension_numbers = #tpu.dot_dimension_numbers<[1], [0], [0], [1], [0, 0, 1, 1], [], []>} : vector<16x16xf32>, vector<16x16xf32>, vector<16x16xf32> -> vector<16x16xf32>
    %cst_142 = arith.constant 2.500000e-01 : f32
    %425 = vector.broadcast %cst_142 : f32 to vector<16x16xf32>
    %426 = arith.mulf %424, %425 : vector<16x16xf32>
    %427 = vector.broadcast %379 : vector<1x16xf32> to vector<16x16xf32>
    %428 = arith.addf %426, %427 : vector<16x16xf32>
    %cst_143 = arith.constant dense<0xFF800000> : vector<16xf32>
    %429 = vector.multi_reduction <maximumf>, %428, %cst_143 [1] : vector<16x16xf32> to vector<16xf32>
    %430 = vector.shape_cast %429 : vector<16xf32> to vector<16x1xf32>
    %431 = vector.broadcast %430 : vector<16x1xf32> to vector<16x16xf32>
    %432 = arith.subf %428, %431 : vector<16x16xf32>
    %433 = math.exp %432 : vector<16x16xf32>
    %cst_144 = arith.constant dense<0.000000e+00> : vector<16xf32>
    %434 = vector.multi_reduction <add>, %433, %cst_144 [1] : vector<16x16xf32> to vector<16xf32>
    %435 = vector.shape_cast %434 : vector<16xf32> to vector<16x1xf32>
    %436 = tpu.reciprocal %435 {approx = true} : vector<16x1xf32> -> vector<16x1xf32>
    %437 = vector.broadcast %436 : vector<16x1xf32> to vector<16x16xf32>
    %438 = arith.mulf %433, %437 : vector<16x16xf32>
    %cst_145 = arith.constant dense<0.000000e+00> : vector<16x16xf32>
    %439 = tpu.matmul %438, %422, %cst_145 {dimension_numbers = #tpu.dot_dimension_numbers<[1], [0], [0], [1], [0, 0, 1, 1], [], []>} : vector<16x16xf32>, vector<16x16xf32>, vector<16x16xf32> -> vector<16x16xf32>
    %440 = vector.extract_strided_slice %378 {offsets = [0, 48], sizes = [16, 16], strides = [1, 1]} : vector<16x192xf32> to vector<16x16xf32>
    %441 = vector.extract_strided_slice %378 {offsets = [0, 112], sizes = [16, 16], strides = [1, 1]} : vector<16x192xf32> to vector<16x16xf32>
    %442 = vector.extract_strided_slice %378 {offsets = [0, 176], sizes = [16, 16], strides = [1, 1]} : vector<16x192xf32> to vector<16x16xf32>
    %443 = tpu.transpose %441, [1, 0] : vector<16x16xf32> -> vector<16x16xf32>
    %cst_146 = arith.constant dense<0.000000e+00> : vector<16x16xf32>
    %444 = tpu.matmul %440, %443, %cst_146 {dimension_numbers = #tpu.dot_dimension_numbers<[1], [0], [0], [1], [0, 0, 1, 1], [], []>} : vector<16x16xf32>, vector<16x16xf32>, vector<16x16xf32> -> vector<16x16xf32>
    %cst_147 = arith.constant 2.500000e-01 : f32
    %445 = vector.broadcast %cst_147 : f32 to vector<16x16xf32>
    %446 = arith.mulf %444, %445 : vector<16x16xf32>
    %447 = vector.broadcast %379 : vector<1x16xf32> to vector<16x16xf32>
    %448 = arith.addf %446, %447 : vector<16x16xf32>
    %cst_148 = arith.constant dense<0xFF800000> : vector<16xf32>
    %449 = vector.multi_reduction <maximumf>, %448, %cst_148 [1] : vector<16x16xf32> to vector<16xf32>
    %450 = vector.shape_cast %449 : vector<16xf32> to vector<16x1xf32>
    %451 = vector.broadcast %450 : vector<16x1xf32> to vector<16x16xf32>
    %452 = arith.subf %448, %451 : vector<16x16xf32>
    %453 = math.exp %452 : vector<16x16xf32>
    %cst_149 = arith.constant dense<0.000000e+00> : vector<16xf32>
    %454 = vector.multi_reduction <add>, %453, %cst_149 [1] : vector<16x16xf32> to vector<16xf32>
    %455 = vector.shape_cast %454 : vector<16xf32> to vector<16x1xf32>
    %456 = tpu.reciprocal %455 {approx = true} : vector<16x1xf32> -> vector<16x1xf32>
    %457 = vector.broadcast %456 : vector<16x1xf32> to vector<16x16xf32>
    %458 = arith.mulf %453, %457 : vector<16x16xf32>
    %cst_150 = arith.constant dense<0.000000e+00> : vector<16x16xf32>
    %459 = tpu.matmul %458, %442, %cst_150 {dimension_numbers = #tpu.dot_dimension_numbers<[1], [0], [0], [1], [0, 0, 1, 1], [], []>} : vector<16x16xf32>, vector<16x16xf32>, vector<16x16xf32> -> vector<16x16xf32>
    %460 = tpu.concatenate %399, %419, %439, %459 in 1 : vector<16x16xf32>, vector<16x16xf32>, vector<16x16xf32>, vector<16x16xf32> -> vector<16x64xf32>
    %461 = tpu.concatenate %377, %460 in 0 : vector<16x64xf32>, vector<16x64xf32> -> vector<32x64xf32>
    %c1_151 = arith.constant 1 : index
    %c0_152 = arith.constant 0 : index
    %c0_153 = arith.constant 0 : index
    %462 = vector.load %arg6[%c1_151, %c0_152, %c0_153] : memref<2x64x64xf32, #tpu.memory_space<vmem>>, vector<1x64x64xf32>
    %463 = vector.shape_cast %462 : vector<1x64x64xf32> to vector<64x64xf32>
    %cst_154 = arith.constant dense<0.000000e+00> : vector<32x64xf32>
    %464 = tpu.matmul %461, %463, %cst_154 {dimension_numbers = #tpu.dot_dimension_numbers<[1], [0], [0], [1], [0, 0, 1, 1], [], []>} : vector<32x64xf32>, vector<64x64xf32>, vector<32x64xf32> -> vector<32x64xf32>
    %c1_155 = arith.constant 1 : index
    %c0_156 = arith.constant 0 : index
    %c0_157 = arith.constant 0 : index
    %465 = vector.load %arg7[%c1_155, %c0_156, %c0_157] : memref<2x1x64xf32, #tpu.memory_space<vmem>>, vector<1x1x64xf32>
    %466 = vector.shape_cast %465 : vector<1x1x64xf32> to vector<1x64xf32>
    %467 = vector.broadcast %466 : vector<1x64xf32> to vector<32x64xf32>
    %468 = arith.addf %464, %467 : vector<32x64xf32>
    %469 = arith.addf %468, %287 : vector<32x64xf32>
    %c1_158 = arith.constant 1 : index
    %c0_159 = arith.constant 0 : index
    %c0_160 = arith.constant 0 : index
    %470 = vector.load %arg8[%c1_158, %c0_159, %c0_160] : memref<2x1x64xf32, #tpu.memory_space<vmem>>, vector<1x1x64xf32>
    %471 = vector.shape_cast %470 : vector<1x1x64xf32> to vector<1x64xf32>
    %c1_161 = arith.constant 1 : index
    %c0_162 = arith.constant 0 : index
    %c0_163 = arith.constant 0 : index
    %472 = vector.load %arg9[%c1_161, %c0_162, %c0_163] : memref<2x1x64xf32, #tpu.memory_space<vmem>>, vector<1x1x64xf32>
    %473 = vector.shape_cast %472 : vector<1x1x64xf32> to vector<1x64xf32>
    %cst_164 = arith.constant dense<0.000000e+00> : vector<32xf32>
    %474 = vector.multi_reduction <add>, %469, %cst_164 [1] : vector<32x64xf32> to vector<32xf32>
    %475 = vector.shape_cast %474 : vector<32xf32> to vector<32x1xf32>
    %cst_165 = arith.constant 6.400000e+01 : f32
    %476 = vector.broadcast %cst_165 : f32 to vector<32x1xf32>
    %477 = arith.divf %475, %476 : vector<32x1xf32>
    %478 = vector.broadcast %477 : vector<32x1xf32> to vector<32x64xf32>
    %479 = arith.subf %469, %478 : vector<32x64xf32>
    %480 = arith.mulf %479, %479 : vector<32x64xf32>
    %cst_166 = arith.constant dense<0.000000e+00> : vector<32xf32>
    %481 = vector.multi_reduction <add>, %480, %cst_166 [1] : vector<32x64xf32> to vector<32xf32>
    %482 = vector.shape_cast %481 : vector<32xf32> to vector<32x1xf32>
    %cst_167 = arith.constant 6.400000e+01 : f32
    %483 = vector.broadcast %cst_167 : f32 to vector<32x1xf32>
    %484 = arith.divf %482, %483 : vector<32x1xf32>
    %485 = vector.broadcast %477 : vector<32x1xf32> to vector<32x64xf32>
    %486 = arith.subf %469, %485 : vector<32x64xf32>
    %cst_168 = arith.constant 9.99999996E-13 : f32
    %487 = vector.broadcast %cst_168 : f32 to vector<32x1xf32>
    %488 = arith.addf %484, %487 : vector<32x1xf32>
    %489 = math.rsqrt %488 : vector<32x1xf32>
    %490 = vector.broadcast %489 : vector<32x1xf32> to vector<32x64xf32>
    %491 = arith.mulf %486, %490 : vector<32x64xf32>
    %492 = vector.broadcast %471 : vector<1x64xf32> to vector<32x64xf32>
    %493 = arith.mulf %491, %492 : vector<32x64xf32>
    %494 = vector.broadcast %473 : vector<1x64xf32> to vector<32x64xf32>
    %495 = arith.addf %493, %494 : vector<32x64xf32>
    %c1_169 = arith.constant 1 : index
    %c0_170 = arith.constant 0 : index
    %c0_171 = arith.constant 0 : index
    %496 = vector.load %arg10[%c1_169, %c0_170, %c0_171] : memref<2x64x128xf32, #tpu.memory_space<vmem>>, vector<1x64x128xf32>
    %497 = vector.shape_cast %496 : vector<1x64x128xf32> to vector<64x128xf32>
    %cst_172 = arith.constant dense<0.000000e+00> : vector<32x128xf32>
    %498 = tpu.matmul %495, %497, %cst_172 {dimension_numbers = #tpu.dot_dimension_numbers<[1], [0], [0], [1], [0, 0, 1, 1], [], []>} : vector<32x64xf32>, vector<64x128xf32>, vector<32x128xf32> -> vector<32x128xf32>
    %c1_173 = arith.constant 1 : index
    %c0_174 = arith.constant 0 : index
    %c0_175 = arith.constant 0 : index
    %499 = vector.load %arg11[%c1_173, %c0_174, %c0_175] : memref<2x1x128xf32, #tpu.memory_space<vmem>>, vector<1x1x128xf32>
    %500 = vector.shape_cast %499 : vector<1x1x128xf32> to vector<1x128xf32>
    %501 = vector.broadcast %500 : vector<1x128xf32> to vector<32x128xf32>
    %502 = arith.addf %498, %501 : vector<32x128xf32>
    %503 = arith.mulf %502, %502 : vector<32x128xf32>
    %504 = arith.mulf %502, %503 : vector<32x128xf32>
    %cst_176 = arith.constant 4.471500e-02 : f32
    %505 = vector.broadcast %cst_176 : f32 to vector<32x128xf32>
    %506 = arith.mulf %505, %504 : vector<32x128xf32>
    %507 = arith.addf %502, %506 : vector<32x128xf32>
    %cst_177 = arith.constant 0.797884583 : f32
    %508 = vector.broadcast %cst_177 : f32 to vector<32x128xf32>
    %509 = arith.mulf %508, %507 : vector<32x128xf32>
    %510 = math.tanh %509 : vector<32x128xf32>
    %cst_178 = arith.constant 1.000000e+00 : f32
    %511 = vector.broadcast %cst_178 : f32 to vector<32x128xf32>
    %512 = arith.addf %511, %510 : vector<32x128xf32>
    %cst_179 = arith.constant 5.000000e-01 : f32
    %513 = vector.broadcast %cst_179 : f32 to vector<32x128xf32>
    %514 = arith.mulf %513, %512 : vector<32x128xf32>
    %515 = arith.mulf %502, %514 : vector<32x128xf32>
    %c1_180 = arith.constant 1 : index
    %c0_181 = arith.constant 0 : index
    %c0_182 = arith.constant 0 : index
    %516 = vector.load %arg12[%c1_180, %c0_181, %c0_182] : memref<2x128x64xf32, #tpu.memory_space<vmem>>, vector<1x128x64xf32>
    %517 = vector.shape_cast %516 : vector<1x128x64xf32> to vector<128x64xf32>
    %cst_183 = arith.constant dense<0.000000e+00> : vector<32x64xf32>
    %518 = tpu.matmul %515, %517, %cst_183 {dimension_numbers = #tpu.dot_dimension_numbers<[1], [0], [0], [1], [0, 0, 1, 1], [], []>} : vector<32x128xf32>, vector<128x64xf32>, vector<32x64xf32> -> vector<32x64xf32>
    %c1_184 = arith.constant 1 : index
    %c0_185 = arith.constant 0 : index
    %c0_186 = arith.constant 0 : index
    %519 = vector.load %arg13[%c1_184, %c0_185, %c0_186] : memref<2x1x64xf32, #tpu.memory_space<vmem>>, vector<1x1x64xf32>
    %520 = vector.shape_cast %519 : vector<1x1x64xf32> to vector<1x64xf32>
    %521 = vector.broadcast %520 : vector<1x64xf32> to vector<32x64xf32>
    %522 = arith.addf %518, %521 : vector<32x64xf32>
    %523 = arith.addf %522, %495 : vector<32x64xf32>
    %c1_187 = arith.constant 1 : index
    %c0_188 = arith.constant 0 : index
    %c0_189 = arith.constant 0 : index
    %524 = vector.load %arg14[%c1_187, %c0_188, %c0_189] : memref<2x1x64xf32, #tpu.memory_space<vmem>>, vector<1x1x64xf32>
    %525 = vector.shape_cast %524 : vector<1x1x64xf32> to vector<1x64xf32>
    %c1_190 = arith.constant 1 : index
    %c0_191 = arith.constant 0 : index
    %c0_192 = arith.constant 0 : index
    %526 = vector.load %arg15[%c1_190, %c0_191, %c0_192] : memref<2x1x64xf32, #tpu.memory_space<vmem>>, vector<1x1x64xf32>
    %527 = vector.shape_cast %526 : vector<1x1x64xf32> to vector<1x64xf32>
    %cst_193 = arith.constant dense<0.000000e+00> : vector<32xf32>
    %528 = vector.multi_reduction <add>, %523, %cst_193 [1] : vector<32x64xf32> to vector<32xf32>
    %529 = vector.shape_cast %528 : vector<32xf32> to vector<32x1xf32>
    %cst_194 = arith.constant 6.400000e+01 : f32
    %530 = vector.broadcast %cst_194 : f32 to vector<32x1xf32>
    %531 = arith.divf %529, %530 : vector<32x1xf32>
    %532 = vector.broadcast %531 : vector<32x1xf32> to vector<32x64xf32>
    %533 = arith.subf %523, %532 : vector<32x64xf32>
    %534 = arith.mulf %533, %533 : vector<32x64xf32>
    %cst_195 = arith.constant dense<0.000000e+00> : vector<32xf32>
    %535 = vector.multi_reduction <add>, %534, %cst_195 [1] : vector<32x64xf32> to vector<32xf32>
    %536 = vector.shape_cast %535 : vector<32xf32> to vector<32x1xf32>
    %cst_196 = arith.constant 6.400000e+01 : f32
    %537 = vector.broadcast %cst_196 : f32 to vector<32x1xf32>
    %538 = arith.divf %536, %537 : vector<32x1xf32>
    %539 = vector.broadcast %531 : vector<32x1xf32> to vector<32x64xf32>
    %540 = arith.subf %523, %539 : vector<32x64xf32>
    %cst_197 = arith.constant 9.99999996E-13 : f32
    %541 = vector.broadcast %cst_197 : f32 to vector<32x1xf32>
    %542 = arith.addf %538, %541 : vector<32x1xf32>
    %543 = math.rsqrt %542 : vector<32x1xf32>
    %544 = vector.broadcast %543 : vector<32x1xf32> to vector<32x64xf32>
    %545 = arith.mulf %540, %544 : vector<32x64xf32>
    %546 = vector.broadcast %525 : vector<1x64xf32> to vector<32x64xf32>
    %547 = arith.mulf %545, %546 : vector<32x64xf32>
    %548 = vector.broadcast %527 : vector<1x64xf32> to vector<32x64xf32>
    %549 = arith.addf %547, %548 : vector<32x64xf32>
    %550 = vector.extract_strided_slice %549 {offsets = [0, 0], sizes = [1, 64], strides = [1, 1]} : vector<32x64xf32> to vector<1x64xf32>
    %551 = vector.extract_strided_slice %549 {offsets = [16, 0], sizes = [1, 64], strides = [1, 1]} : vector<32x64xf32> to vector<1x64xf32>
    %552 = tpu.concatenate %550, %551 in 0 : vector<1x64xf32>, vector<1x64xf32> -> vector<2x64xf32>
    %c0_198 = arith.constant 0 : index
    %c0_199 = arith.constant 0 : index
    %553 = vector.load %arg16[%c0_198, %c0_199] : memref<64x64xf32, #tpu.memory_space<vmem>>, vector<64x64xf32>
    %cst_200 = arith.constant dense<0.000000e+00> : vector<2x64xf32>
    %554 = tpu.matmul %552, %553, %cst_200 {dimension_numbers = #tpu.dot_dimension_numbers<[1], [0], [0], [1], [0, 0, 1, 1], [], []>} : vector<2x64xf32>, vector<64x64xf32>, vector<2x64xf32> -> vector<2x64xf32>
    %c0_201 = arith.constant 0 : index
    %c0_202 = arith.constant 0 : index
    %555 = vector.load %arg17[%c0_201, %c0_202] : memref<1x64xf32, #tpu.memory_space<vmem>>, vector<1x64xf32>
    %556 = vector.broadcast %555 : vector<1x64xf32> to vector<2x64xf32>
    %557 = arith.addf %554, %556 : vector<2x64xf32>
    %558 = math.tanh %557 : vector<2x64xf32>
    %c0_203 = arith.constant 0 : index
    %c0_204 = arith.constant 0 : index
    %559 = vector.load %arg18[%c0_203, %c0_204] : memref<64x128xf32, #tpu.memory_space<vmem>>, vector<64x128xf32>
    %cst_205 = arith.constant dense<0.000000e+00> : vector<2x128xf32>
    %560 = tpu.matmul %558, %559, %cst_205 {dimension_numbers = #tpu.dot_dimension_numbers<[1], [0], [0], [1], [0, 0, 1, 1], [], []>} : vector<2x64xf32>, vector<64x128xf32>, vector<2x128xf32> -> vector<2x128xf32>
    %c0_206 = arith.constant 0 : index
    %c0_207 = arith.constant 0 : index
    %561 = vector.load %arg19[%c0_206, %c0_207] : memref<1x128xf32, #tpu.memory_space<vmem>>, vector<1x128xf32>
    %562 = vector.broadcast %561 : vector<1x128xf32> to vector<2x128xf32>
    %563 = arith.addf %560, %562 : vector<2x128xf32>
    %c0_208 = arith.constant 0 : index
    %c0_209 = arith.constant 0 : index
    %564 = vector.load %arg20[%c0_208, %c0_209] : memref<2x128xf32, #tpu.memory_space<vmem>>, vector<2x128xf32>
    tpu.vector_store %arg20[%c0_208, %c0_209], %563 {strides = array<i32>} : memref<2x128xf32, #tpu.memory_space<vmem>>, vector<2x128xf32>,
    return
  }
}

</mosaic_0001>

<bundles_post_ra>
// kernel: forward.1
= control target key start
LH: loop header
LB: loop body
LE: loop exit
PB: predicated region body
PF: predicated region fallthrough
CT: control target
= control target key end

     0   :  { %s7841_s0 = inlined_call_operand.vmem [shape: f32[32,64], index: 0, kind: input, shape index: {}]   ;;  %s7842_s1 = inlined_call_operand.vmem [shape: f32[2,16], index: 1, kind: input, shape index: {}]   ;;  %s7843_s2 = inlined_call_operand.vmem [shape: f32[1,64], index: 2, kind: input, shape index: {}]   ;;  %s7844_s3 = inlined_call_operand.vmem [shape: f32[1,64], index: 3, kind: input, shape index: {}]   ;;  %s7845_s4 = inlined_call_operand.vmem [shape: f32[2,64,192], index: 4, kind: input, shape index: {}]   ;;  %s7846_s5 = inlined_call_operand.vmem [shape: f32[2,1,192], index: 5, kind: input, shape index: {}]   ;;  %s7847_s6 = inlined_call_operand.vmem [shape: f32[2,64,64], index: 6, kind: input, shape index: {}]   ;;  %s7848_s7 = inlined_call_operand.vmem [shape: f32[2,1,64], index: 7, kind: input, shape index: {}]   ;;  %s7849_s8 = inlined_call_operand.vmem [shape: f32[2,1,64], index: 8, kind: input, shape index: {}]   ;;  %s7850_s9 = inlined_call_operand.vmem [shape: f32[2,1,64], index: 9, kind: input, shape index: {}]   ;;  %s7851_s10 = inlined_call_operand.vmem [shape: f32[2,64,128], index: 10, kind: input, shape index: {}]   ;;  %s7852_s11 = inlined_call_operand.vmem [shape: f32[2,1,128], index: 11, kind: input, shape index: {}]   ;;  %s7853_s12 = inlined_call_operand.vmem [shape: f32[2,128,64], index: 12, kind: input, shape index: {}]   ;;  %s7854_s13 = inlined_call_operand.vmem [shape: f32[2,1,64], index: 13, kind: input, shape index: {}]   ;;  %s7855_s14 = inlined_call_operand.vmem [shape: f32[2,1,64], index: 14, kind: input, shape index: {}]   ;;  %s7856_s15 = inlined_call_operand.vmem [shape: f32[2,1,64], index: 15, kind: input, shape index: {}]   ;;  %s7857_s16 = inlined_call_operand.vmem [shape: f32[64,64], index: 16, kind: input, shape index: {}]   ;;  %s7858_s17 = inlined_call_operand.vmem [shape: f32[1,64], index: 17, kind: input, shape index: {}]   ;;  %s7859_s18 = inlined_call_operand.vmem [shape: f32[64,128], index: 18, kind: input, shape index: {}]   ;;  %s7860_s19 = inlined_call_operand.vmem [shape: f32[1,128], index: 19, kind: input, shape index: {}]   ;;  %s7861_s20 = inlined_call_operand.hbm [shape: f32[2,128], index: 20, kind: output, shape index: {}]  }
   0x1   :  { %7870 = sst [smem:[#allocation5_spill]] %s7841_s0 }
   0x2   :  { %7871 = sst [smem:[#allocation6_spill]] %s7842_s1 }
   0x3   :  { %7872 = sst [smem:[#allocation7_spill]] %s7843_s2 }
   0x4   :  { %7873 = sst [smem:[#allocation8_spill]] %s7844_s3 }
   0x5   :  { %7874 = sst [smem:[#allocation9_spill]] %s7845_s4 }
   0x6   :  { %s7875_s23 = sld [smem:[#allocation5_spill]]  ;;  %vm72_vm0 = vcmask 523264  }
   0xc   :  { %v66_v0 = vld [vmem:[%s7875_s23] sm:$0xff]  ;;  %v67_v1 = vld [vmem:[%s7875_s23 + $0x8] sm:$0xff] }
   0xd   :  { %25 = vsyncpa [#allocation3], 0  ;;  %v73_v2 = vsel %vm72_vm0, %v66_v0, 0.0  ;;  %v76_v3 = vsel %vm72_vm0, %v67_v1, 0.0  ;;  %s7876_s26 = sld [smem:[#allocation9_spill]]  ;;  %v6556_v33 = vmov 0.0   ;;  %v165_v55 = vlaneseq }
   0xe   :  { %74 = vadd.xlane.f32.xlu0 %v73_v2  ;;  %251 = vmatprep.mubr.f32.mxu0 %v6556_v33  ;;  %s7877_s21 = sld [smem:[#allocation7_spill]]  ;;  %s7878_s24 = sld [smem:[#allocation8_spill]]  ;;  %v163_v58 = vld [vmem:[%s7846_s5] sm:$0x3]  ;;  %vm282_vm1 = vcmask 130048   ;;  %vm1117_vm3 = vcmask 261120  }
   0xf   :  { %v166_v56 = vshrl.u32 %v165_v55, 7  ;;  %s6557_s3 = smov 64   ;;  %vm6788_vm2 = vmpackc.low %vm282_vm1, %vm282_vm1  ;;  %s7881_s4 = sld [smem:[#allocation6_spill]]  ;;  %vm1120_vm4 = vcmask 392192   ;;  %vm6565_vm5 = vmmov 0   ;;  %vm4805_vm6 = vcmask 1040384  }
  0x10   :  { %s6559_s1 = smov 112   ;;  %s6560_s22 = smov 32  }
  0x11   :  { %v6755_v57 = vsub.s32 0, %v166_v56  ;;  %v6763_v60 = vsub.s32 1, %v166_v56  ;;  %s7864_s2 = smov 80   ;;  %s7866_s25 = smov 16  }
  0x12   :  { %77 = vadd.xlane.f32.xlu0 %v76_v3  ;;  %s7883_s29 = smov 16  }
  0x13   :  { %v148_v14 = vld [vmem:[%s7876_s26 + $0x8] sm:$0xff]  ;;  %v150_v15 = vld [vmem:[%s7876_s26 + $0x18] sm:$0xff]  ;;  %v147_v17 = vld [vmem:[%s7876_s26] sm:$0xff]  ;;  %v6761_v59 = vrot.slane %v163_v58, %v6755_v57 }
  0x14   :  { %v5855_v16 = vpack.c.bf16 %v150_v15, %v148_v14  ;;  %v149_v18 = vld [vmem:[%s7876_s26 + $0x10] sm:$0xff]  ;;  %v152_v20 = vld [vmem:[%s7876_s26 + $0x28] sm:$0xff]  ;;  %v154_v21 = vld [vmem:[%s7876_s26 + $0x38] sm:$0xff] }
  0x15   :  { %v5857_v19 = vpack.c.bf16 %v149_v18, %v147_v17  ;;  %v5859_v22 = vpack.c.bf16 %v154_v21, %v152_v20  ;;  %v151_v23 = vld [vmem:[%s7876_s26 + $0x20] sm:$0xff]  ;;  %v153_v24 = vld [vmem:[%s7876_s26 + $0x30] sm:$0xff]  ;;  %v156_v26 = vld [vmem:[%s7876_s26 + $0x48] sm:$0xff] }
  0x16   :  { %5856 = vmatprep.subr.bf16.mxu0 %v5855_v16  ;;  %v5861_v25 = vpack.c.bf16 %v153_v24, %v151_v23  ;;  %v158_v27 = vld [vmem:[%s7876_s26 + $0x58] sm:$0xff]  ;;  %v155_v28 = vld [vmem:[%s7876_s26 + $0x40] sm:$0xff]  ;;  %v157_v30 = vld [vmem:[%s7876_s26 + $0x50] sm:$0xff] }
  0x17   :  { %5858 = vmatpush1.bf16.msra.mxu0 %v5857_v19  ;;  %v5863_v29 = vpack.c.bf16 %v158_v27, %v156_v26  ;;  %v160_v31 = vld [vmem:[%s7876_s26 + $0x68] sm:$0xff]  ;;  %v162_v32 = vld [vmem:[%s7876_s26 + $0x78] sm:$0xff]  ;;  %v5865_v34 = vpack.c.bf16 %v157_v30, %v155_v28  ;;  %v159_v36 = vld [vmem:[%s7876_s26 + $0x60] sm:$0xff] }
  0x18   :  { %5860 = vmatprep.subr.bf16.mxu0 %v5859_v22  ;;  %v5867_v35 = vpack.c.bf16 %v162_v32, %v160_v31  ;;  %v161_v37 = vld [vmem:[%s7876_s26 + $0x70] sm:$0xff]  ;;  %v6734_v46 = vld [vmem:[%s7877_s21] ss:$0 sm:$0xff]  ;;  %v69_v26 = vld [vmem:[%s7875_s23 + $0x18] sm:$0xff] }
  0x19   :  { %v5869_v38 = vpack.c.bf16 %v161_v37, %v159_v36  ;;  %v6739_v48 = vld [vmem:[%s7878_s24] ss:$0 sm:$0xff]  ;;  %v68_v23 = vld [vmem:[%s7875_s23 + $0x10] sm:$0xff]  ;;  %v82_v27 = vsel %vm72_vm0, %v69_v26, 0.0  ;;  %s6558_s23 = smov 48   ;;  %s7868_s24 = smov 96  }
  0x1a   :  { %v6801_v14 = vld [vmem:[%s7881_s4] sm:$0x3] }
  0x1b   :  { %5862 = vmatpush1.bf16.msra.mxu0 %v5861_v25  ;;  %v6805_v15 = vrot.slane %v6801_v14, %v6755_v57  ;;  %v79_v25 = vsel %vm72_vm0, %v68_v23, 0.0 }
  0x1c   :  { %5864 = vmatprep.subr.bf16.mxu0 %v5863_v29 }
  0x1f   :  { %5866 = vmatpush1.bf16.msra.mxu0 %v5865_v34 }
  0x20   :  { %5868 = vmatprep.subr.bf16.mxu0 %v5867_v35 }
  0x23   :  { %5870 = vmatpush1.bf16.msra.mxu0 %v5869_v38 }
  0x9b   :  { %v75_v4 = vpop.xlane.xlu0 %74 }
  0x9c   :  { %v86_v5 = vmul.f32 0.015625, %v75_v4 }
  0x9e   :  { %v90_v6 = vsub.f32 %v66_v0, %v86_v5  ;;  %v6769_v0 = vrot.slane %v163_v58, %v6763_v60 }
  0x9f   :  { %v78_v7 = vpop.xlane.xlu0 %77 }
  0xa0   :  { %v87_v8 = vmul.f32 0.015625, %v78_v7  ;;  %v94_v9 = vmul.f32 %v90_v6, %v90_v6 }
  0xa2   :  { %v91_v10 = vsub.f32 %v67_v1, %v87_v8  ;;  %v98_v11 = vsel %vm72_vm0, %v94_v9, 0.0 }
  0xa3   :  { %99 = vadd.xlane.f32.xlu1 %v98_v11 }
  0xa4   :  { %v95_v12 = vmul.f32 %v91_v10, %v91_v10 }
  0xa6   :  { %v101_v13 = vsel %vm72_vm0, %v95_v12, 0.0 }
  0xa7   :  { %102 = vadd.xlane.f32.xlu1 %v101_v13 }
 0x130   :  { %v100_v39 = vpop.xlane.xlu1 %99 }
 0x131   :  { %v110_v40 = vmul.f32 0.015625, %v100_v39 }
 0x133   :  { %v114_v41 = vadd.f32 1e-12, %v110_v40 }
 0x134   :  { %v103_v42 = vpop.xlane.xlu1 %102 }
 0x135   :  { %6350 = vrsqrt.f32 %v114_v41  ;;  %v111_v43 = vmul.f32 0.015625, %v103_v42 }
 0x137   :  { %v115_v44 = vadd.f32 1e-12, %v111_v43 }
 0x139   :  { %6352 = vrsqrt.f32 %v115_v44 }
 0x13f   :  { %v6351_v45 = vpop.eup %6350 }
 0x140   :  { %v122_v47 = vmul.f32 %v6351_v45, %v90_v6 }
 0x142   :  { %v132_v49 = vmul.f32 %v6734_v46, %v122_v47 }
 0x143   :  { %v6353_v50 = vpop.eup %6352 }
 0x144   :  { %v6743_v51 = vadd.f32 %v6739_v48, %v132_v49  ;;  %v123_v52 = vmul.f32 %v6353_v50, %v91_v10 }
 0x146   :  { %5001 = vmatmul.mubr.msk.f32.vlgmr.msra.gmra.mrb[0].mxu0 %vm72_vm0, %v6743_v51  ;;  %v133_v53 = vmul.f32 %v6734_v46, %v123_v52 }
 0x147   :  { %257 = vmatprep.mubr.f32.mxu0 %v6556_v33 }
 0x148   :  { %v6750_v54 = vadd.f32 %v6739_v48, %v133_v53 }
 0x14a   :  { %5002 = vmatmul.mubr.msk.f32.gmra.mrb[2].mxu0 %vm72_vm0, %v6750_v54 }
 0x14b   :  { %263 = vmatprep.mubr.f32.mxu0 %v6556_v33 }
 0x219   :  { %v253_v61 = vpop.f32.mrb[0].mxu0 }
 0x21a   :  { %v6766_v62 = vadd.f32 %v253_v61, %v6761_v59  ;;  %v255_v63 = vpop.f32.mrb[1].mxu0 }
 0x21b   :  { %v256_v4 = vadd.f32 %v255_v63, %v6769_v0 }
 0x21c   :  { %5433 = vmatprep.mubr.msk.f32.mxu1 %vm282_vm1, %v6766_v62 }
 0x21d   :  { %v259_v1 = vpop.f32.mrb[2].mxu0 }
 0x21e   :  { %v6774_v2 = vadd.f32 %v259_v1, %v6761_v59  ;;  %v261_v3 = vpop.f32.mrb[3].mxu0 }
 0x21f   :  { %v262_v5 = vadd.f32 %v261_v3, %v6769_v0 }
 0x220   :  { %v6780_v6 = vpack.i.bf16 %v6774_v2, %v6766_v62 }
 0x221   :  { %v5877_v7 = vpack.c.bf16 %v262_v5, %v256_v4  ;;  %v6782_v8 = vpack.i.bf16 %v262_v5, %v256_v4 }
 0x222   :  { %6211 = vrot.lane.b32.xlu0 %v6780_v6, %s6557_s3 }
 0x294   :  { %v6212_v9 = vpop.permute.xlu0 %6211 }
 0x295   :  { %v6214_v10 = vunpack.i.h.bf16 %v6212_v9  ;;  %v6213_v11 = vunpack.i.l.bf16 %v6212_v9 }
 0x297   :  { %v5871_v13 = vpack.c.bf16 %v6214_v10, %v6213_v11 }
 0x299   :  { %5873 = vmatprep.subr.msk.bf16.mxu1 %vm6788_vm2, %v5871_v13 }
 0x29a   :  { %5876 = vmatpush3.bf16.xpose.msk.msra.mxu1 %vm6788_vm2, %v5871_v13 }
 0x29b   :  { %5878 = vmatprep.subr.bf16.mxu1 %v5877_v7 }
 0x2a1   :  { %5434 = vmatmul.mubr.msk.f32.vlgmr.msra.gmra.mrb[0].mxu1 %vm282_vm1, %v6774_v2 }
 0x2a2   :  { %5880 = vmatpush3.bf16.msra.mxu1 %v5877_v7 }
 0x374   :  { %v5435_v16 = vpop.f32.mrb[0].mxu1 }
 0x375   :  { %v357_v17 = vpop.f32.mrb[1].mxu1  ;;  %v367_v18 = vmul.f32 0.25, %v5435_v16 }
 0x376   :  { %v366_v19 = vmul.f32 0.25, %v357_v17 }
 0x377   :  { %v373_v22 = vadd.f32 %v6805_v15, %v367_v18 }
 0x378   :  { %v372_v20 = vadd.f32 %v6805_v15, %v366_v19 }
 0x379   :  { %v377_v24 = vsel %vm282_vm1, %v373_v22, -inf }
 0x37a   :  { %v374_v21 = vsel %vm282_vm1, %v372_v20, -inf }
 0x37b   :  { %375 = vmax.xlane.f32.xlu1 %v374_v21 }
 0x37f   :  { %378 = vmax.xlane.f32.xlu1 %v377_v24 }
 0x383   :  { %80 = vadd.xlane.f32.xlu1 %v79_v25 }
 0x387   :  { %83 = vadd.xlane.f32.xlu1 %v82_v27 }
 0x408   :  { %v376_v28 = vpop.xlane.xlu1 %375 }
 0x409   :  { %v380_v45 = vsub.f32 %v372_v20, %v376_v28 }
 0x40b   :  { %v382_v47 = vmul.f32 1.442695, %v380_v45 }
 0x40c   :  { %v379_v29 = vpop.xlane.xlu1 %378 }
 0x40d   :  { %v381_v30 = vsub.f32 %v373_v22, %v379_v29 }
 0x40f   :  { %v384_v31 = vmul.f32 1.442695, %v381_v30 }
 0x410   :  { %v81_v32 = vpop.xlane.xlu1 %80 }
 0x411   :  { %6354 = vpow2.f32 %v384_v31  ;;  %v88_v34 = vmul.f32 0.015625, %v81_v32 }
 0x412   :  { %6356 = vpow2.f32 %v382_v47 }
 0x413   :  { %v92_v35 = vsub.f32 %v68_v23, %v88_v34 }
 0x414   :  { %v84_v36 = vpop.xlane.xlu1 %83 }
 0x415   :  { %v89_v37 = vmul.f32 0.015625, %v84_v36  ;;  %v96_v38 = vmul.f32 %v92_v35, %v92_v35 }
 0x417   :  { %v93_v39 = vsub.f32 %v69_v26, %v89_v37  ;;  %v104_v40 = vsel %vm72_vm0, %v96_v38, 0.0 }
 0x418   :  { %105 = vadd.xlane.f32.xlu1 %v104_v40 }
 0x419   :  { %v97_v41 = vmul.f32 %v93_v39, %v93_v39 }
 0x41b   :  { %v6355_v42 = vpop.eup %6354  ;;  %v107_v43 = vsel %vm72_vm0, %v97_v41, 0.0 }
 0x41c   :  { %108 = vadd.xlane.f32.xlu1 %v107_v43  ;;  %v389_v44 = vsel %vm282_vm1, %v6355_v42, 0.0  ;;  %v6357_v49 = vpop.eup %6356 }
 0x41d   :  { %390 = vadd.xlane.f32.xlu0 %v389_v44  ;;  %v386_v50 = vsel %vm282_vm1, %v6357_v49, 0.0 }
 0x42d   :  { %6216 = vrot.lane.b32.xlu1 %v6780_v6, %s6558_s23 }
 0x431   :  { %477 = vrot.lane.b32.xlu1 %v6766_v62, %s6559_s1 }
 0x433   :  { %479 = vrot.lane.b32.xlu0 %v6774_v2, %s6559_s1 }
 0x455   :  { %387 = vadd.xlane.f32.xlu1 %v386_v50 }
 0x466   :  { %6221 = vrot.lane.b32.xlu1 %v6780_v6, %s6560_s22 }
 0x46a   :  { %683 = vrot.lane.b32.xlu1 %v6766_v62, %s7868_s24 }
 0x46e   :  { %685 = vrot.lane.b32.xlu1 %v6774_v2, %s7868_s24 }
 0x4a5   :  { %v106_v52 = vpop.xlane.xlu1 %105 }
 0x4a6   :  { %v112_v53 = vmul.f32 0.015625, %v106_v52 }
 0x4a8   :  { %v116_v55 = vadd.f32 1e-12, %v112_v53 }
 0x4a9   :  { %v109_v56 = vpop.xlane.xlu1 %108 }
 0x4aa   :  { %6358 = vrsqrt.f32 %v116_v55  ;;  %v113_v58 = vmul.f32 0.015625, %v109_v56  ;;  %v391_v19 = vpop.xlane.xlu0 %390 }
 0x4ac   :  { %v117_v61 = vadd.f32 1e-12, %v113_v58 }
 0x4ad   :  { %v6217_v63 = vpop.permute.xlu1 %6216 }
 0x4ae   :  { %6360 = vrsqrt.f32 %v117_v61  ;;  %v6219_v1 = vunpack.i.h.bf16 %v6217_v63  ;;  %v6218_v3 = vunpack.i.l.bf16 %v6217_v63  ;;  %v480_v29 = vpop.permute.xlu0 %479 }
 0x4af   :  { %6362 = vrcp.f32 %v391_v19 }
 0x4b0   :  { %v5881_v4 = vpack.c.bf16 %v6219_v1, %v6218_v3 }
 0x4b1   :  { %v478_v18 = vpop.permute.xlu1 %477 }
 0x4b2   :  { %5883 = vmatprep.subr.msk.bf16.mxu1 %vm6788_vm2, %v5881_v4 }
 0x4b4   :  { %v6359_v5 = vpop.eup %6358 }
 0x4b5   :  { %v124_v7 = vmul.f32 %v6359_v5, %v92_v35 }
 0x4b7   :  { %v134_v9 = vmul.f32 %v6734_v46, %v124_v7 }
 0x4b8   :  { %v6361_v10 = vpop.eup %6360 }
 0x4b9   :  { %v6839_v11 = vadd.f32 %v6739_v48, %v134_v9  ;;  %v125_v13 = vmul.f32 %v6361_v10, %v93_v39 }
 0x4bb   :  { %5003 = vmatmul.mubr.msk.f32.gmra.mrb[4].mxu0 %vm72_vm0, %v6839_v11  ;;  %v135_v16 = vmul.f32 %v6734_v46, %v125_v13  ;;  %v6363_v46 = vpop.eup %6362 }
 0x4bc   :  { %269 = vmatprep.mubr.f32.mxu0 %v6556_v33  ;;  %v395_v27 = vmul.f32 %v6363_v46, %v6355_v42 }
 0x4bd   :  { %v6846_v17 = vadd.f32 %v6739_v48, %v135_v16 }
 0x4bf   :  { %5004 = vmatmul.mubr.msk.f32.gmra.mrb[6].mxu0 %vm72_vm0, %v6846_v17 }
 0x4e2   :  { %v388_v20 = vpop.xlane.xlu1 %387 }
 0x4e3   :  { %6364 = vrcp.f32 %v388_v20 }
 0x4e6   :  { %v6222_v21 = vpop.permute.xlu1 %6221 }
 0x4e7   :  { %v6224_v22 = vunpack.i.h.bf16 %v6222_v21  ;;  %v6223_v23 = vunpack.i.l.bf16 %v6222_v21 }
 0x4e9   :  { %v5891_v24 = vpack.c.bf16 %v6224_v22, %v6223_v23 }
 0x4ea   :  { %v684_v25 = vpop.permute.xlu1 %683 }
 0x4eb   :  { %5893 = vmatprep.subr.msk.bf16.mxu0 %vm6788_vm2, %v5891_v24  ;;  %5461 = vmatprep.mubr.msk.f32.mxu0 %vm282_vm1, %v684_v25 }
 0x4ec   :  { %5896 = vmatpush3.bf16.xpose.msk.msra.mxu0 %vm6788_vm2, %v5891_v24 }
 0x4ed   :  { %v6365_v48 = vpop.eup %6364 }
 0x4ee   :  { %v394_v26 = vmul.f32 %v6365_v48, %v6357_v49  ;;  %v686_v28 = vpop.permute.xlu1 %685 }
 0x4f0   :  { %5440 = vmatprep.mubr.msk.f32.mxu1 %vm282_vm1, %v394_v26 }
 0x4f1   :  { %5441 = vmatmul.mubr.msk.f32.vlgmr.msra.gmra.mrb[2].mxu1 %vm282_vm1, %v395_v27 }
 0x4f2   :  { %5886 = vmatpush3.bf16.xpose.msk.msra.mxu1 %vm6788_vm2, %v5881_v4  ;;  %5447 = vmatprep.mubr.msk.f32.mxu1 %vm282_vm1, %v478_v18 }
 0x4f3   :  { %5462 = vmatmul.mubr.msk.f32.vlgmr.msra.gmra.mrb[8].mxu0 %vm282_vm1, %v686_v28 }
 0x4f9   :  { %5448 = vmatmul.mubr.msk.f32.vlgmr.msra.gmra.mrb[4].mxu1 %vm282_vm1, %v480_v29 }
 0x58e   :  { %v6862_v30 = vpop.f32.mrb[4].mxu0 }
 0x58f   :  { %v267_v31 = vpop.f32.mrb[5].mxu0 }
 0x590   :  { %v268_v35 = vadd.f32 %v267_v31, %v6769_v0 }
 0x592   :  { %v6864_v32 = vpop.f32.mrb[6].mxu0 }
 0x593   :  { %v273_v34 = vpop.f32.mrb[7].mxu0 }
 0x594   :  { %v274_v36 = vadd.f32 %v273_v34, %v6769_v0 }
 0x596   :  { %v6868_v37 = vpack.c.bf16 %v274_v36, %v268_v35  ;;  %v6870_v38 = vpack.i.bf16 %v274_v36, %v268_v35 }
 0x5c4   :  { %v6872_v39 = vpop.f32.mrb[2].mxu1 }
 0x5c5   :  { %v6874_v40 = vpop.f32.mrb[3].mxu1 }
 0x5c6   :  { %v5463_v41 = vpop.f32.mrb[8].mxu0 }
 0x5c7   :  { %v765_v42 = vpop.f32.mrb[9].mxu0  ;;  %v775_v53 = vmul.f32 0.25, %v5463_v41 }
 0x5c8   :  { %v774_v47 = vmul.f32 0.25, %v765_v42 }
 0x5c9   :  { %v777_v61 = vadd.f32 %v775_v53, %v6805_v15 }
 0x5ca   :  { %v776_v56 = vadd.f32 %v774_v47, %v6805_v15 }
 0x5cb   :  { %v781_v63 = vsel %vm282_vm1, %v777_v61, -inf }
 0x5cc   :  { %v5449_v43 = vpop.f32.mrb[4].mxu1  ;;  %v778_v58 = vsel %vm282_vm1, %v776_v56, -inf }
 0x5cd   :  { %v569_v44 = vmul.f32 0.25, %v5449_v43  ;;  %v559_v45 = vpop.f32.mrb[5].mxu1 }
 0x5ce   :  { %v568_v49 = vmul.f32 0.25, %v559_v45 }
 0x5cf   :  { %v571_v50 = vadd.f32 %v569_v44, %v6805_v15 }
 0x5d0   :  { %v570_v52 = vadd.f32 %v568_v49, %v6805_v15 }
 0x5d1   :  { %v575_v0 = vsel %vm282_vm1, %v571_v50, -inf }
 0x5d2   :  { %576 = vmax.xlane.f32.xlu0 %v575_v0  ;;  %v572_v55 = vsel %vm282_vm1, %v570_v52, -inf }
 0x5d3   :  { %573 = vmax.xlane.f32.xlu1 %v572_v55 }
 0x5d7   :  { %779 = vmax.xlane.f32.xlu1 %v778_v58 }
 0x5db   :  { %782 = vmax.xlane.f32.xlu1 %v781_v63 }
 0x65f   :  { %v577_v3 = vpop.xlane.xlu0 %576 }
 0x660   :  { %v574_v1 = vpop.xlane.xlu1 %573  ;;  %v579_v7 = vsub.f32 %v571_v50, %v577_v3 }
 0x661   :  { %v578_v25 = vsub.f32 %v570_v52, %v574_v1 }
 0x662   :  { %v582_v16 = vmul.f32 1.442695, %v579_v7 }
 0x663   :  { %v580_v46 = vmul.f32 1.442695, %v578_v25 }
 0x664   :  { %v780_v4 = vpop.xlane.xlu1 %779 }
 0x665   :  { %v784_v5 = vsub.f32 %v776_v56, %v780_v4 }
 0x667   :  { %v786_v9 = vmul.f32 1.442695, %v784_v5 }
 0x668   :  { %v783_v10 = vpop.xlane.xlu1 %782 }
 0x669   :  { %6366 = vpow2.f32 %v786_v9  ;;  %v785_v13 = vsub.f32 %v777_v61, %v783_v10 }
 0x66b   :  { %v788_v18 = vmul.f32 1.442695, %v785_v13 }
 0x66d   :  { %6368 = vpow2.f32 %v788_v18 }
 0x66e   :  { %6370 = vpow2.f32 %v582_v16 }
 0x66f   :  { %6372 = vpow2.f32 %v580_v46 }
 0x673   :  { %v6367_v19 = vpop.eup %6366 }
 0x674   :  { %v790_v20 = vsel %vm282_vm1, %v6367_v19, 0.0 }
 0x675   :  { %791 = vadd.xlane.f32.xlu1 %v790_v20 }
 0x677   :  { %v6369_v21 = vpop.eup %6368 }
 0x678   :  { %v793_v22 = vsel %vm282_vm1, %v6369_v21, 0.0  ;;  %v6371_v23 = vpop.eup %6370 }
 0x679   :  { %794 = vadd.xlane.f32.xlu0 %v793_v22  ;;  %v587_v24 = vsel %vm282_vm1, %v6371_v23, 0.0  ;;  %v6373_v48 = vpop.eup %6372 }
 0x67a   :  { %v584_v26 = vsel %vm282_vm1, %v6373_v48, 0.0 }
 0x67d   :  { %588 = vadd.xlane.f32.xlu0 %v587_v24 }
 0x686   :  { %6226 = vrot.lane.b32.xlu1 %v6782_v8, %s6559_s1 }
 0x693   :  { %6231 = vrot.lane.b32.xlu0 %v6782_v8, %s7868_s24 }
 0x697   :  { %889 = vrot.lane.b32.xlu0 %v6774_v2, %s7864_s2 }
 0x6aa   :  { %585 = vadd.xlane.f32.xlu1 %v584_v26 }
 0x6bb   :  { %6236 = vrot.lane.b32.xlu1 %v6780_v6, %s7866_s25 }
 0x6bf   :  { %887 = vrot.lane.b32.xlu1 %v6766_v62, %s7864_s2 }
 0x702   :  { %v792_v27 = vpop.xlane.xlu1 %791 }
 0x703   :  { %6374 = vrcp.f32 %v792_v27 }
 0x706   :  { %v795_v28 = vpop.xlane.xlu0 %794  ;;  %v6227_v29 = vpop.permute.xlu1 %6226 }
 0x707   :  { %v6229_v31 = vunpack.i.h.bf16 %v6227_v29  ;;  %v6228_v34 = vunpack.i.l.bf16 %v6227_v29  ;;  %v6930_v29 = vadd.f32 %v6862_v30, %v6761_v59 }
 0x709   :  { %v5887_v35 = vpack.c.bf16 %v6229_v31, %v6228_v34 }
 0x70a   :  { %v589_v2 = vpop.xlane.xlu0 %588 }
 0x70b   :  { %5888 = vmatprep.subr.bf16.mxu1 %v5887_v35  ;;  %6376 = vrcp.f32 %v589_v2 }
 0x70c   :  { %5890 = vmatpush3.bf16.msra.mxu1 %v5887_v35 }
 0x70d   :  { %v6375_v44 = vpop.eup %6374 }
 0x70e   :  { %v6232_v36 = vpop.permute.xlu0 %6231  ;;  %v798_v55 = vmul.f32 %v6375_v44, %v6367_v19 }
 0x70f   :  { %v6234_v41 = vunpack.i.h.bf16 %v6232_v36  ;;  %v6233_v42 = vunpack.i.l.bf16 %v6232_v36 }
 0x711   :  { %v5897_v43 = vpack.c.bf16 %v6234_v41, %v6233_v42 }
 0x712   :  { %v890_v63 = vpop.permute.xlu0 %889 }
 0x713   :  { %5898 = vmatprep.subr.bf16.mxu1 %v5897_v43 }
 0x715   :  { %v6377_v45 = vpop.eup %6376 }
 0x716   :  { %v593_v0 = vmul.f32 %v6377_v45, %v6371_v23 }
 0x737   :  { %v586_v6 = vpop.xlane.xlu1 %585 }
 0x738   :  { %6378 = vrcp.f32 %v586_v6 }
 0x739   :  { %6380 = vrcp.f32 %v795_v28  ;;  %v6926_v28 = vadd.f32 %v6864_v32, %v6761_v59 }
 0x73b   :  { %v6237_v62 = vpop.permute.xlu1 %6236  ;;  %v6934_v31 = vpack.i.bf16 %v6926_v28, %v6930_v29 }
 0x73c   :  { %v6239_v49 = vunpack.i.h.bf16 %v6237_v62  ;;  %v6238_v50 = vunpack.i.l.bf16 %v6237_v62 }
 0x73e   :  { %v5901_v56 = vpack.c.bf16 %v6239_v49, %v6238_v50  ;;  %v6956_v49 = vrot.slane %v6801_v14, %v6763_v60 }
 0x73f   :  { %v888_v61 = vpop.permute.xlu1 %887 }
 0x742   :  { %v6379_v47 = vpop.eup %6378 }
 0x743   :  { %v592_v52 = vmul.f32 %v6379_v47, %v6373_v48  ;;  %v6381_v53 = vpop.eup %6380 }
 0x744   :  { %v799_v58 = vmul.f32 %v6381_v53, %v6369_v21 }
 0x745   :  { %5454 = vmatprep.mubr.msk.f32.mxu1 %vm282_vm1, %v592_v52 }
 0x746   :  { %5455 = vmatmul.mubr.msk.f32.vlgmr.msra.gmra.mrb[6].mxu1 %vm282_vm1, %v593_v0 }
 0x747   :  { %5900 = vmatpush3.bf16.msra.mxu1 %v5897_v43  ;;  %5468 = vmatprep.mubr.msk.f32.mxu1 %vm282_vm1, %v798_v55 }
 0x748   :  { %5903 = vmatprep.subr.msk.bf16.mxu1 %vm6788_vm2, %v5901_v56 }
 0x74a   :  { %5469 = vmatmul.mubr.msk.f32.vlgmr.msra.gmra.mrb[8].mxu1 %vm282_vm1, %v799_v58 }
 0x74b   :  { %5475 = vmatprep.mubr.msk.f32.mxu1 %vm282_vm1, %v888_v61 }
 0x750   :  { %5906 = vmatpush3.bf16.xpose.msk.msra.mxu1 %vm6788_vm2, %v5901_v56 }
 0x751   :  { %5918 = vmatprep.subr.bf16.mxu1 %v6868_v37 }
 0x757   :  { %5476 = vmatmul.mubr.msk.f32.vlgmr.msra.gmra.mrb[10].mxu1 %vm282_vm1, %v890_v63 }
 0x758   :  { %5920 = vmatpush3.bf16.msra.mxu1 %v6868_v37 }
 0x819   :  { %v6910_v1 = vpop.f32.mrb[6].mxu1 }
 0x81a   :  { %v6912_v3 = vpop.f32.mrb[7].mxu1 }
 0x81d   :  { %v6914_v4 = vpop.f32.mrb[8].mxu1 }
 0x81e   :  { %v6916_v5 = vpop.f32.mrb[9].mxu1 }
 0x82a   :  { %v5477_v7 = vpop.f32.mrb[10].mxu1 }
 0x82b   :  { %v979_v9 = vmul.f32 0.25, %v5477_v7  ;;  %v969_v10 = vpop.f32.mrb[11].mxu1 }
 0x82c   :  { %v978_v13 = vmul.f32 0.25, %v969_v10 }
 0x82d   :  { %v981_v16 = vadd.f32 %v979_v9, %v6805_v15 }
 0x82e   :  { %v980_v18 = vadd.f32 %v978_v13, %v6805_v15 }
 0x82f   :  { %v985_v19 = vsel %vm282_vm1, %v981_v16, -inf }
 0x830   :  { %986 = vmax.xlane.f32.xlu0 %v985_v19  ;;  %v982_v37 = vsel %vm282_vm1, %v980_v18, -inf }
 0x831   :  { %983 = vmax.xlane.f32.xlu1 %v982_v37 }
 0x8bd   :  { %v987_v20 = vpop.xlane.xlu0 %986 }
 0x8be   :  { %v989_v21 = vsub.f32 %v981_v16, %v987_v20  ;;  %v984_v22 = vpop.xlane.xlu1 %983 }
 0x8bf   :  { %v988_v23 = vsub.f32 %v980_v18, %v984_v22 }
 0x8c0   :  { %v992_v24 = vmul.f32 1.442695, %v989_v21 }
 0x8c1   :  { %v990_v25 = vmul.f32 1.442695, %v988_v23 }
 0x8c2   :  { %6382 = vpow2.f32 %v992_v24 }
 0x8c3   :  { %6384 = vpow2.f32 %v990_v25 }
 0x8cc   :  { %v6383_v46 = vpop.eup %6382 }
 0x8cd   :  { %v6385_v48 = vpop.eup %6384  ;;  %v997_v26 = vsel %vm282_vm1, %v6383_v46, 0.0 }
 0x8ce   :  { %998 = vadd.xlane.f32.xlu1 %v997_v26  ;;  %v994_v27 = vsel %vm282_vm1, %v6385_v48, 0.0 }
 0x8cf   :  { %995 = vadd.xlane.f32.xlu0 %v994_v27 }
 0x8df   :  { %6246 = vrot.lane.b32.xlu1 %v6934_v31, %s6557_s3 }
 0x8e5   :  { %6241 = vrot.lane.b32.xlu0 %v6782_v8, %s7864_s2 }
 0x95b   :  { %v999_v34 = vpop.xlane.xlu1 %998 }
 0x95c   :  { %6386 = vrcp.f32 %v999_v34  ;;  %v996_v35 = vpop.xlane.xlu0 %995 }
 0x95d   :  { %6388 = vrcp.f32 %v996_v35 }
 0x95f   :  { %v6247_v32 = vpop.permute.xlu1 %6246 }
 0x960   :  { %v6242_v2 = vpop.permute.xlu0 %6241  ;;  %v6249_v36 = vunpack.i.h.bf16 %v6247_v32  ;;  %v6248_v41 = vunpack.i.l.bf16 %v6247_v32 }
 0x961   :  { %v6244_v59 = vunpack.i.h.bf16 %v6242_v2  ;;  %v6243_v30 = vunpack.i.l.bf16 %v6242_v2 }
 0x962   :  { %v5911_v43 = vpack.c.bf16 %v6249_v36, %v6248_v41 }
 0x963   :  { %v5907_v42 = vpack.c.bf16 %v6244_v59, %v6243_v30 }
 0x965   :  { %5908 = vmatprep.subr.bf16.mxu0 %v5907_v42 }
 0x966   :  { %v6387_v6 = vpop.eup %6386  ;;  %5910 = vmatpush3.bf16.msra.mxu0 %v5907_v42 }
 0x967   :  { %v6389_v62 = vpop.eup %6388  ;;  %5913 = vmatprep.subr.msk.bf16.mxu0 %vm6788_vm2, %v5911_v43  ;;  %v1003_v44 = vmul.f32 %v6387_v6, %v6383_v46 }
 0x968   :  { %v1002_v8 = vmul.f32 %v6389_v62, %v6385_v48 }
 0x96a   :  { %5482 = vmatprep.mubr.msk.f32.mxu0 %vm282_vm1, %v1002_v8 }
 0x96b   :  { %5483 = vmatmul.mubr.msk.f32.vlgmr.msra.gmra.mrb[10].mxu0 %vm282_vm1, %v1003_v44 }
 0x96c   :  { %5489 = vmatprep.mubr.msk.f32.mxu0 %vm282_vm1, %v6930_v29 }
 0x96f   :  { %5916 = vmatpush3.bf16.xpose.msk.msra.mxu0 %vm6788_vm2, %v5911_v43 }
 0x976   :  { %5490 = vmatmul.mubr.msk.f32.vlgmr.msra.gmra.mrb[12].mxu0 %vm282_vm1, %v6926_v28 }
 0xa3e   :  { %v6950_v45 = vpop.f32.mrb[10].mxu0 }
 0xa3f   :  { %v6952_v47 = vpop.f32.mrb[11].mxu0 }
 0xa49   :  { %v5491_v50 = vpop.f32.mrb[12].mxu0 }
 0xa4a   :  { %v1213_v52 = vmul.f32 0.25, %v5491_v50  ;;  %v1203_v0 = vpop.f32.mrb[13].mxu0 }
 0xa4b   :  { %v1212_v53 = vmul.f32 0.25, %v1203_v0 }
 0xa4c   :  { %v1219_v55 = vadd.f32 %v6956_v49, %v1213_v52 }
 0xa4d   :  { %v1218_v56 = vadd.f32 %v6956_v49, %v1212_v53 }
 0xa4e   :  { %v1223_v58 = vsel %vm282_vm1, %v1219_v55, -inf }
 0xa4f   :  { %1224 = vmax.xlane.f32.xlu0 %v1223_v58  ;;  %v1220_v61 = vsel %vm282_vm1, %v1218_v56, -inf }
 0xa50   :  { %1221 = vmax.xlane.f32.xlu1 %v1220_v61 }
 0xadc   :  { %v1225_v63 = vpop.xlane.xlu0 %1224 }
 0xadd   :  { %v1227_v7 = vsub.f32 %v1219_v55, %v1225_v63  ;;  %v1222_v9 = vpop.xlane.xlu1 %1221 }
 0xade   :  { %v1226_v10 = vsub.f32 %v1218_v56, %v1222_v9 }
 0xadf   :  { %v1230_v14 = vmul.f32 1.442695, %v1227_v7 }
 0xae0   :  { %v1228_v13 = vmul.f32 1.442695, %v1226_v10 }
 0xae1   :  { %6390 = vpow2.f32 %v1230_v14 }
 0xae2   :  { %6392 = vpow2.f32 %v1228_v13 }
 0xaeb   :  { %v6391_v16 = vpop.eup %6390 }
 0xaec   :  { %v6393_v18 = vpop.eup %6392  ;;  %v1235_v19 = vsel %vm282_vm1, %v6391_v16, 0.0 }
 0xaed   :  { %1236 = vadd.xlane.f32.xlu1 %v1235_v19  ;;  %v1232_v37 = vsel %vm282_vm1, %v6393_v18, 0.0 }
 0xaee   :  { %1233 = vadd.xlane.f32.xlu0 %v1232_v37 }
 0xafe   :  { %1323 = vrot.lane.b32.xlu1 %v6930_v29, %s6559_s1 }
 0xb02   :  { %1325 = vrot.lane.b32.xlu1 %v6926_v28, %s6559_s1 }
 0xb04   :  { %6251 = vrot.lane.b32.xlu0 %v6934_v31, %s6558_s23 }
 0xb7a   :  { %v1237_v20 = vpop.xlane.xlu1 %1236 }
 0xb7b   :  { %6394 = vrcp.f32 %v1237_v20  ;;  %v1234_v21 = vpop.xlane.xlu0 %1233 }
 0xb7c   :  { %6396 = vrcp.f32 %v1234_v21 }
 0xb7e   :  { %v1324_v34 = vpop.permute.xlu1 %1323 }
 0xb7f   :  { %v6252_v22 = vpop.permute.xlu0 %6251 }
 0xb80   :  { %v6254_v23 = vunpack.i.h.bf16 %v6252_v22  ;;  %v6253_v24 = vunpack.i.l.bf16 %v6252_v22 }
 0xb82   :  { %v5921_v25 = vpack.c.bf16 %v6254_v23, %v6253_v24  ;;  %v1326_v35 = vpop.permute.xlu1 %1325 }
 0xb84   :  { %5923 = vmatprep.subr.msk.bf16.mxu1 %vm6788_vm2, %v5921_v25 }
 0xb85   :  { %v6395_v46 = vpop.eup %6394 }
 0xb86   :  { %v6397_v48 = vpop.eup %6396  ;;  %v1241_v27 = vmul.f32 %v6395_v46, %v6391_v16 }
 0xb87   :  { %v1240_v26 = vmul.f32 %v6397_v48, %v6393_v18 }
 0xb89   :  { %5496 = vmatprep.mubr.msk.f32.mxu1 %vm282_vm1, %v1240_v26 }
 0xb8a   :  { %5497 = vmatmul.mubr.msk.f32.vlgmr.msra.gmra.mrb[12].mxu1 %vm282_vm1, %v1241_v27 }
 0xb8b   :  { %5926 = vmatpush3.bf16.xpose.msk.msra.mxu1 %vm6788_vm2, %v5921_v25  ;;  %5503 = vmatprep.mubr.msk.f32.mxu1 %vm282_vm1, %v1324_v34 }
 0xb92   :  { %5504 = vmatmul.mubr.msk.f32.vlgmr.msra.gmra.mrb[14].mxu1 %vm282_vm1, %v1326_v35 }
 0xc5d   :  { %v6978_v32 = vpop.f32.mrb[12].mxu1 }
 0xc5e   :  { %v6980_v2 = vpop.f32.mrb[13].mxu1 }
 0xc65   :  { %v5505_v36 = vpop.f32.mrb[14].mxu1 }
 0xc66   :  { %v1415_v41 = vmul.f32 0.25, %v5505_v36  ;;  %v1405_v59 = vpop.f32.mrb[15].mxu1 }
 0xc67   :  { %v1414_v30 = vmul.f32 0.25, %v1405_v59 }
 0xc68   :  { %v1417_v42 = vadd.f32 %v1415_v41, %v6956_v49 }
 0xc69   :  { %v1416_v43 = vadd.f32 %v1414_v30, %v6956_v49 }
 0xc6a   :  { %v1421_v6 = vsel %vm282_vm1, %v1417_v42, -inf }
 0xc6b   :  { %1422 = vmax.xlane.f32.xlu1 %v1421_v6  ;;  %v1418_v62 = vsel %vm282_vm1, %v1416_v43, -inf }
 0xc6c   :  { %1419 = vmax.xlane.f32.xlu0 %v1418_v62 }
 0xc7c   :  { %6256 = vrot.lane.b32.xlu1 %v6870_v38, %s6559_s1 }
 0xc80   :  { %1529 = vrot.lane.b32.xlu1 %v6930_v29, %s7868_s24 }
 0xc84   :  { %1531 = vrot.lane.b32.xlu1 %v6926_v28, %s7868_s24 }
 0xcf8   :  { %v1423_v8 = vpop.xlane.xlu1 %1422 }
 0xcf9   :  { %v1425_v44 = vsub.f32 %v1417_v42, %v1423_v8  ;;  %v1420_v50 = vpop.xlane.xlu0 %1419 }
 0xcfa   :  { %v1424_v52 = vsub.f32 %v1416_v43, %v1420_v50 }
 0xcfb   :  { %v1428_v0 = vmul.f32 1.442695, %v1425_v44 }
 0xcfc   :  { %v1426_v53 = vmul.f32 1.442695, %v1424_v52  ;;  %v6257_v55 = vpop.permute.xlu1 %6256 }
 0xcfd   :  { %6398 = vpow2.f32 %v1428_v0  ;;  %v6259_v56 = vunpack.i.h.bf16 %v6257_v55  ;;  %v6258_v58 = vunpack.i.l.bf16 %v6257_v55 }
 0xcfe   :  { %6400 = vpow2.f32 %v1426_v53 }
 0xcff   :  { %v5927_v61 = vpack.c.bf16 %v6259_v56, %v6258_v58 }
 0xd00   :  { %v1530_v24 = vpop.permute.xlu1 %1529 }
 0xd01   :  { %5928 = vmatprep.subr.bf16.mxu0 %v5927_v61 }
 0xd02   :  { %5930 = vmatpush3.bf16.msra.mxu0 %v5927_v61 }
 0xd04   :  { %v1532_v25 = vpop.permute.xlu1 %1531 }
 0xd07   :  { %v6399_v63 = vpop.eup %6398 }
 0xd08   :  { %v1433_v7 = vsel %vm282_vm1, %v6399_v63, 0.0  ;;  %v6401_v9 = vpop.eup %6400 }
 0xd09   :  { %1434 = vadd.xlane.f32.xlu0 %v1433_v7  ;;  %v1430_v10 = vsel %vm282_vm1, %v6401_v9, 0.0 }
 0xd0d   :  { %1431 = vadd.xlane.f32.xlu0 %v1430_v10 }
 0xd23   :  { %6261 = vrot.lane.b32.xlu0 %v6934_v31, %s6560_s22 }
 0xd96   :  { %v1435_v14 = vpop.xlane.xlu0 %1434 }
 0xd97   :  { %6402 = vrcp.f32 %v1435_v14 }
 0xd9a   :  { %v1432_v13 = vpop.xlane.xlu0 %1431 }
 0xd9b   :  { %6404 = vrcp.f32 %v1432_v13 }
 0xd9e   :  { %v6262_v16 = vpop.permute.xlu0 %6261 }
 0xd9f   :  { %v6264_v18 = vunpack.i.h.bf16 %v6262_v16  ;;  %v6263_v19 = vunpack.i.l.bf16 %v6262_v16 }
 0xda1   :  { %v5931_v37 = vpack.c.bf16 %v6264_v18, %v6263_v19  ;;  %v6403_v20 = vpop.eup %6402 }
 0xda2   :  { %v1439_v23 = vmul.f32 %v6403_v20, %v6399_v63 }
 0xda3   :  { %5933 = vmatprep.subr.msk.bf16.mxu0 %vm6788_vm2, %v5931_v37 }
 0xda5   :  { %v6405_v21 = vpop.eup %6404 }
 0xda6   :  { %v1438_v22 = vmul.f32 %v6405_v21, %v6401_v9 }
 0xda8   :  { %5510 = vmatprep.mubr.msk.f32.mxu0 %vm282_vm1, %v1438_v22 }
 0xda9   :  { %5511 = vmatmul.mubr.msk.f32.vlgmr.msra.gmra.mrb[14].mxu0 %vm282_vm1, %v1439_v23 }
 0xdaa   :  { %5936 = vmatpush3.bf16.xpose.msk.msra.mxu0 %vm6788_vm2, %v5931_v37  ;;  %5517 = vmatprep.mubr.msk.f32.mxu0 %vm282_vm1, %v1530_v24 }
 0xdb1   :  { %5518 = vmatmul.mubr.msk.f32.vlgmr.msra.gmra.mrb[16].mxu0 %vm282_vm1, %v1532_v25 }
 0xe7c   :  { %v7004_v46 = vpop.f32.mrb[14].mxu0 }
 0xe7d   :  { %v7006_v48 = vpop.f32.mrb[15].mxu0 }
 0xe84   :  { %v5519_v26 = vpop.f32.mrb[16].mxu0 }
 0xe85   :  { %v1621_v27 = vmul.f32 0.25, %v5519_v26  ;;  %v1611_v34 = vpop.f32.mrb[17].mxu0 }
 0xe86   :  { %v1620_v35 = vmul.f32 0.25, %v1611_v34 }
 0xe87   :  { %v1623_v36 = vadd.f32 %v1621_v27, %v6956_v49 }
 0xe88   :  { %v1622_v41 = vadd.f32 %v1620_v35, %v6956_v49 }
 0xe89   :  { %v1627_v59 = vsel %vm282_vm1, %v1623_v36, -inf }
 0xe8a   :  { %1628 = vmax.xlane.f32.xlu1 %v1627_v59  ;;  %v1624_v30 = vsel %vm282_vm1, %v1622_v41, -inf }
 0xe8b   :  { %1625 = vmax.xlane.f32.xlu0 %v1624_v30 }
 0xe9b   :  { %6266 = vrot.lane.b32.xlu1 %v6870_v38, %s7868_s24  ;;  %s7884_s24 = smov 80  }
 0xe9f   :  { %1733 = vrot.lane.b32.xlu1 %v6930_v29, %s7864_s2 }
 0xea3   :  { %1735 = vrot.lane.b32.xlu1 %v6926_v28, %s7864_s2 }
 0xf17   :  { %v1629_v42 = vpop.xlane.xlu1 %1628 }
 0xf18   :  { %v1631_v43 = vsub.f32 %v1623_v36, %v1629_v42  ;;  %v1626_v6 = vpop.xlane.xlu0 %1625 }
 0xf19   :  { %v1630_v62 = vsub.f32 %v1622_v41, %v1626_v6 }
 0xf1a   :  { %v1634_v8 = vmul.f32 1.442695, %v1631_v43 }
 0xf1b   :  { %v1632_v44 = vmul.f32 1.442695, %v1630_v62  ;;  %v6267_v50 = vpop.permute.xlu1 %6266 }
 0xf1c   :  { %6406 = vpow2.f32 %v1634_v8  ;;  %v6269_v52 = vunpack.i.h.bf16 %v6267_v50  ;;  %v6268_v0 = vunpack.i.l.bf16 %v6267_v50  ;;  %v1967_v8 = vld [vmem:[%s7847_s6] sm:$0xff] }
 0xf1d   :  { %6408 = vpow2.f32 %v1632_v44  ;;  %v1968_v44 = vld [vmem:[%s7847_s6 + $0x8] sm:$0xff] }
 0xf1e   :  { %v5937_v53 = vpack.c.bf16 %v6269_v52, %v6268_v0  ;;  %v5951_v50 = vpack.c.bf16 %v1968_v44, %v1967_v8 }
 0xf1f   :  { %v1734_v19 = vpop.permute.xlu1 %1733 }
 0xf20   :  { %5938 = vmatprep.subr.bf16.mxu1 %v5937_v53 }
 0xf21   :  { %5940 = vmatpush3.bf16.msra.mxu1 %v5937_v53 }
 0xf26   :  { %v6407_v55 = vpop.eup %6406 }
 0xf27   :  { %v1639_v29 = vsel %vm282_vm1, %v6407_v55, 0.0  ;;  %v6409_v56 = vpop.eup %6408 }
 0xf28   :  { %1640 = vadd.xlane.f32.xlu0 %v1639_v29  ;;  %v1636_v28 = vsel %vm282_vm1, %v6409_v56, 0.0 }
 0xf2c   :  { %1637 = vadd.xlane.f32.xlu0 %v1636_v28 }
 0xf42   :  { %6271 = vrot.lane.b32.xlu0 %v6934_v31, %s7866_s25  ;;  %v1736_v31 = vpop.permute.xlu1 %1735 }
 0xfb5   :  { %v1641_v58 = vpop.xlane.xlu0 %1640 }
 0xfb6   :  { %6410 = vrcp.f32 %v1641_v58 }
 0xfb9   :  { %v1638_v61 = vpop.xlane.xlu0 %1637 }
 0xfba   :  { %6412 = vrcp.f32 %v1638_v61 }
 0xfbd   :  { %v6272_v63 = vpop.permute.xlu0 %6271 }
 0xfbe   :  { %v6274_v7 = vunpack.i.h.bf16 %v6272_v63  ;;  %v6273_v9 = vunpack.i.l.bf16 %v6272_v63 }
 0xfc0   :  { %v5941_v10 = vpack.c.bf16 %v6274_v7, %v6273_v9  ;;  %v6411_v14 = vpop.eup %6410  ;;  %v1972_v9 = vld [vmem:[%s7847_s6 + $0x28] sm:$0xff] }
 0xfc1   :  { %v1645_v18 = vmul.f32 %v6411_v14, %v6407_v55 }
 0xfc2   :  { %5943 = vmatprep.subr.msk.bf16.mxu1 %vm6788_vm2, %v5941_v10 }
 0xfc4   :  { %v6413_v13 = vpop.eup %6412 }
 0xfc5   :  { %v1644_v16 = vmul.f32 %v6413_v13, %v6409_v56  ;;  %v1973_v13 = vld [vmem:[%s7847_s6 + $0x30] sm:$0xff] }
 0xfc7   :  { %5524 = vmatprep.mubr.msk.f32.mxu1 %vm282_vm1, %v1644_v16  ;;  %v1974_v16 = vld [vmem:[%s7847_s6 + $0x38] sm:$0xff] }
 0xfc8   :  { %5525 = vmatmul.mubr.msk.f32.vlgmr.msra.gmra.mrb[16].mxu1 %vm282_vm1, %v1645_v18 }
 0xfc9   :  { %5946 = vmatpush3.bf16.xpose.msk.msra.mxu1 %vm6788_vm2, %v5941_v10  ;;  %5531 = vmatprep.mubr.msk.f32.mxu1 %vm282_vm1, %v1734_v19  ;;  %v5963_v19 = vpack.c.bf16 %v1974_v16, %v1973_v13  ;;  %v7144_v16 = vld [vmem:[%s7849_s8] ss:$0 sm:$0xff] }
 0xfd0   :  { %5532 = vmatmul.mubr.msk.f32.vlgmr.msra.gmra.mrb[18].mxu1 %vm282_vm1, %v1736_v31 }
0x109b   :  { %v5526_v37 = vpop.f32.mrb[16].mxu1 }
0x109c   :  { %v1724_v20 = vpop.f32.mrb[17].mxu1 }
0x10a3   :  { %v5533_v21 = vpop.f32.mrb[18].mxu1 }
0x10a4   :  { %v1825_v22 = vmul.f32 0.25, %v5533_v21  ;;  %v1815_v23 = vpop.f32.mrb[19].mxu1 }
0x10a5   :  { %v1824_v24 = vmul.f32 0.25, %v1815_v23 }
0x10a6   :  { %v1827_v25 = vadd.f32 %v1825_v22, %v6956_v49 }
0x10a7   :  { %v1826_v26 = vadd.f32 %v1824_v24, %v6956_v49  ;;  %v7097_v24 = vld [vmem:[%s7848_s7] ss:$0 sm:$0xff] }
0x10a8   :  { %v1831_v27 = vsel %vm282_vm1, %v1827_v25, -inf }
0x10a9   :  { %1832 = vmax.xlane.f32.xlu1 %v1831_v27  ;;  %v1828_v34 = vsel %vm282_vm1, %v1826_v26, -inf }
0x10aa   :  { %1829 = vmax.xlane.f32.xlu0 %v1828_v34 }
0x10ba   :  { %6276 = vrot.lane.b32.xlu1 %v6870_v38, %s7864_s2 }
0x10be   :  { %1095 = vrot.lane.b32.xlu1 %v6910_v1, %s7866_s25 }
0x10c2   :  { %1101 = vrot.lane.b32.xlu1 %v6916_v5, %s6560_s22 }
0x10c6   :  { %1109 = vrot.lane.b32.xlu1 %v6952_v47, %s6558_s23 }
0x10ca   :  { %1939 = vrot.lane.b32.xlu1 %v7006_v48, %s7866_s25 }
0x10ce   :  { %1947 = vrot.lane.b32.xlu1 %v1724_v20, %s6560_s22 }
0x1136   :  { %v1833_v35 = vpop.xlane.xlu1 %1832 }
0x1137   :  { %v1835_v36 = vsub.f32 %v1827_v25, %v1833_v35  ;;  %v1830_v41 = vpop.xlane.xlu0 %1829 }
0x1138   :  { %v1834_v59 = vsub.f32 %v1826_v26, %v1830_v41 }
0x1139   :  { %v1838_v30 = vmul.f32 1.442695, %v1835_v36 }
0x113a   :  { %v1836_v38 = vmul.f32 1.442695, %v1834_v59  ;;  %v6277_v42 = vpop.permute.xlu1 %6276 }
0x113b   :  { %v6279_v43 = vunpack.i.h.bf16 %v6277_v42  ;;  %v6278_v1 = vunpack.i.l.bf16 %v6277_v42 }
0x113c   :  { %6414 = vpow2.f32 %v1836_v38 }
0x113d   :  { %v5947_v6 = vpack.c.bf16 %v6279_v43, %v6278_v1  ;;  %6416 = vpow2.f32 %v1838_v30 }
0x113e   :  { %v1096_v0 = vpop.permute.xlu1 %1095 }
0x113f   :  { %5948 = vmatprep.subr.bf16.mxu0 %v5947_v6 }
0x1140   :  { %5950 = vmatpush3.bf16.msra.mxu0 %v5947_v6 }
0x1141   :  { %5952 = vmatprep.subr.bf16.mxu0 %v5951_v50 }
0x1142   :  { %v1102_v29 = vpop.permute.xlu1 %1101 }
0x1146   :  { %v6415_v5 = vpop.eup %6414  ;;  %v1110_v7 = vpop.permute.xlu1 %1109 }
0x1147   :  { %v1840_v47 = vsel %vm282_vm1, %v6415_v5, 0.0  ;;  %v6417_v48 = vpop.eup %6416 }
0x1148   :  { %1841 = vadd.xlane.f32.xlu0 %v1840_v47  ;;  %v1843_v62 = vsel %vm282_vm1, %v6417_v48, 0.0 }
0x114a   :  { %v1940_v59 = vpop.permute.xlu1 %1939 }
0x114b   :  { %v1961_v42 = vsel %vm282_vm1, %v6980_v2, %v1940_v59 }
0x114c   :  { %1844 = vadd.xlane.f32.xlu0 %v1843_v62 }
0x114e   :  { %v1948_v38 = vpop.permute.xlu1 %1947 }
0x114f   :  { %v1963_v43 = vsel %vm1117_vm3, %v1961_v42, %v1948_v38  ;;  %v2307_v42 = vld [vmem:[%s7853_s12 + $0x10] sm:$0xff] }
0x1162   :  { %1093 = vrot.lane.b32.xlu0 %v6912_v3, %s7866_s25 }
0x1166   :  { %1103 = vrot.lane.b32.xlu0 %v6914_v4, %s6560_s22 }
0x116a   :  { %1111 = vrot.lane.b32.xlu0 %v6950_v45, %s6558_s23  ;;  %v1969_v45 = vld [vmem:[%s7847_s6 + $0x10] sm:$0xff] }
0x116e   :  { %1941 = vrot.lane.b32.xlu0 %v7004_v46, %s7866_s25  ;;  %v1970_v46 = vld [vmem:[%s7847_s6 + $0x18] sm:$0xff] }
0x116f   :  { %v5955_v63 = vpack.c.bf16 %v1970_v46, %v1969_v45  ;;  %v2160_v45 = vld [vmem:[%s7851_s10 + $0x18] sm:$0xff] }
0x1172   :  { %1949 = vrot.lane.b32.xlu0 %v5526_v37, %s6560_s22  ;;  %v1116_v37 = vsel %vm282_vm1, %v6872_v39, %v1096_v0 }
0x11d5   :  { %v1842_v3 = vpop.xlane.xlu0 %1841 }
0x11d6   :  { %6418 = vrcp.f32 %v1842_v3 }
0x11d9   :  { %v1845_v52 = vpop.xlane.xlu0 %1844 }
0x11da   :  { %6420 = vrcp.f32 %v1845_v52 }
0x11dd   :  { %v1094_v53 = vpop.permute.xlu0 %1093 }
0x11de   :  { %v1115_v4 = vsel %vm282_vm1, %v6874_v40, %v1094_v53  ;;  %v1971_v40 = vld [vmem:[%s7847_s6 + $0x20] sm:$0xff] }
0x11df   :  { %v1118_v58 = vsel %vm1117_vm3, %v1115_v4, %v1102_v29  ;;  %v5959_v14 = vpack.c.bf16 %v1972_v9, %v1971_v40  ;;  %v2158_v29 = vld [vmem:[%s7851_s10 + $0x8] sm:$0xff] }
0x11e0   :  { %v6419_v55 = vpop.eup %6418  ;;  %v1121_v10 = vsel %vm1120_vm4, %v1118_v58, %v1110_v7  ;;  %v2162_v58 = vld [vmem:[%s7851_s10 + $0x28] sm:$0xff]  ;;  %v2164_v7 = vld [vmem:[%s7851_s10 + $0x38] sm:$0xff] }
0x11e1   :  { %v1848_v56 = vmul.f32 %v6419_v55, %v6415_v5  ;;  %v1104_v18 = vpop.permute.xlu0 %1103  ;;  %v2157_v55 = vld [vmem:[%s7851_s10] sm:$0xff] }
0x11e2   :  { %v1119_v20 = vsel %vm1117_vm3, %v1116_v37, %v1104_v18  ;;  %v5967_v4 = vpack.c.bf16 %v2158_v29, %v2157_v55  ;;  %v2320_v55 = vld [vmem:[%s7853_s12 + $0x78] sm:$0xff] }
0x11e3   :  { %5538 = vmatprep.mubr.msk.f32.mxu0 %vm282_vm1, %v1848_v56  ;;  %v2159_v56 = vld [vmem:[%s7851_s10 + $0x10] sm:$0xff] }
0x11e4   :  { %v6421_v28 = vpop.eup %6420  ;;  %5968 = vmatprep.subr.bf16.mxu1 %v5967_v4  ;;  %v5971_v46 = vpack.c.bf16 %v2160_v45, %v2159_v56 }
0x11e5   :  { %v1849_v61 = vmul.f32 %v6421_v28, %v6417_v48  ;;  %v1112_v31 = vpop.permute.xlu0 %1111  ;;  %5970 = vmatpush3.bf16.msra.mxu1 %v5967_v4  ;;  %v2161_v28 = vld [vmem:[%s7851_s10 + $0x20] sm:$0xff] }
0x11e6   :  { %v1122_v21 = vsel %vm1120_vm4, %v1119_v20, %v1112_v31  ;;  %5972 = vmatprep.subr.bf16.mxu1 %v5971_v46 }
0x11e7   :  { %5539 = vmatmul.mubr.msk.f32.vlgmr.msra.gmra.mrb[18].mxu0 %vm282_vm1, %v1849_v61  ;;  %v5975_v61 = vpack.c.bf16 %v2162_v58, %v2161_v28 }
0x11e8   :  { %5954 = vmatpush3.bf16.msra.mxu0 %v5951_v50  ;;  %5557 = vmatprep.mubr.msk.f32.mxu0 %vm72_vm0, %v1121_v10 }
0x11e9   :  { %5956 = vmatprep.subr.bf16.mxu0 %v5955_v63  ;;  %v1942_v30 = vpop.permute.xlu0 %1941  ;;  %5974 = vmatpush3.bf16.msra.mxu1 %v5971_v46 }
0x11ea   :  { %5976 = vmatprep.subr.bf16.mxu1 %v5975_v61 }
0x11ec   :  { %5958 = vmatpush3.bf16.msra.mxu0 %v5955_v63  ;;  %v2163_v63 = vld [vmem:[%s7851_s10 + $0x30] sm:$0xff] }
0x11ed   :  { %5960 = vmatprep.subr.bf16.mxu0 %v5959_v14  ;;  %5978 = vmatpush3.bf16.msra.mxu1 %v5975_v61  ;;  %v5979_v40 = vpack.c.bf16 %v2164_v7, %v2163_v63 }
0x11ef   :  { %5980 = vmatprep.subr.bf16.mxu1 %v5979_v40 }
0x11f0   :  { %5962 = vmatpush3.bf16.msra.mxu0 %v5959_v14 }
0x11f1   :  { %5964 = vmatprep.subr.bf16.mxu0 %v5963_v19  ;;  %5982 = vmatpush3.bf16.msra.mxu1 %v5979_v40 }
0x11f4   :  { %5966 = vmatpush3.bf16.msra.mxu0 %v5963_v19  ;;  %v7149_v19 = vld [vmem:[%s7850_s9] ss:$0 sm:$0xff] }
0x11f7   :  { %5558 = vmatmul.mubr.msk.f32.vlgmr.msra.gmra.mrb[20].mxu0 %vm72_vm0, %v1122_v21 }
0x12ba   :  { %v5540_v22 = vpop.f32.mrb[18].mxu0 }
0x12bb   :  { %v1928_v23 = vpop.f32.mrb[19].mxu0 }
0x12bc   :  { %1955 = vrot.lane.b32.xlu1 %v1928_v23, %s6558_s23 }
0x12c0   :  { %1957 = vrot.lane.b32.xlu1 %v5540_v22, %s6558_s23 }
0x12ca   :  { %v5559_v25 = vpop.f32.mrb[20].mxu0 }
0x12cb   :  { %v2060_v39 = vpop.f32.mrb[21].mxu0  ;;  %v2066_v35 = vadd.f32 %v5559_v25, %v7097_v24 }
0x12cc   :  { %v2061_v26 = vadd.f32 %v7097_v24, %v2060_v39 }
0x12cd   :  { %v2080_v36 = vadd.f32 %v2066_v35, %v6750_v54  ;;  %v1962_v54 = vsel %vm282_vm1, %v6978_v32, %v1942_v30 }
0x12ce   :  { %v2079_v27 = vadd.f32 %v2061_v26, %v6743_v51  ;;  %v1950_v51 = vpop.permute.xlu0 %1949 }
0x12cf   :  { %v2088_v41 = vsel %vm72_vm0, %v2080_v36, 0.0  ;;  %v1964_v5 = vsel %vm1117_vm3, %v1962_v54, %v1950_v51  ;;  %v2309_v51 = vld [vmem:[%s7853_s12 + $0x20] sm:$0xff] }
0x12d0   :  { %v2085_v34 = vsel %vm72_vm0, %v2079_v27, 0.0 }
0x12d1   :  { %2086 = vadd.xlane.f32.xlu0 %v2085_v34 }
0x12e4   :  { %2089 = vadd.xlane.f32.xlu1 %v2088_v41 }
0x132e   :  { %v1956_v1 = vpop.permute.xlu1 %1955 }
0x132f   :  { %v1965_v6 = vsel %vm1120_vm4, %v1963_v43, %v1956_v1  ;;  %v2308_v43 = vld [vmem:[%s7853_s12 + $0x18] sm:$0xff] }
0x1330   :  { %5560 = vmatprep.mubr.msk.f32.mxu0 %vm72_vm0, %v1965_v6  ;;  %v5987_v1 = vpack.c.bf16 %v2308_v43, %v2307_v42  ;;  %v2310_v6 = vld [vmem:[%s7853_s12 + $0x28] sm:$0xff] }
0x1331   :  { %v5991_v54 = vpack.c.bf16 %v2310_v6, %v2309_v51 }
0x1332   :  { %v1958_v47 = vpop.permute.xlu1 %1957 }
0x1333   :  { %v1966_v48 = vsel %vm1120_vm4, %v1964_v5, %v1958_v47  ;;  %v2311_v5 = vld [vmem:[%s7853_s12 + $0x30] sm:$0xff]  ;;  %v2312_v47 = vld [vmem:[%s7853_s12 + $0x38] sm:$0xff] }
0x1334   :  { %5561 = vmatmul.mubr.msk.f32.gmra.mrb[22].mxu0 %vm72_vm0, %v1966_v48  ;;  %v5995_v48 = vpack.c.bf16 %v2312_v47, %v2311_v5 }
0x135e   :  { %v2087_v62 = vpop.xlane.xlu0 %2086 }
0x135f   :  { %v2097_v2 = vmul.f32 0.015625, %v2087_v62  ;;  %v2313_v62 = vld [vmem:[%s7853_s12 + $0x40] sm:$0xff] }
0x1361   :  { %v2101_v8 = vsub.f32 %v2079_v27, %v2097_v2  ;;  %v2314_v2 = vld [vmem:[%s7853_s12 + $0x48] sm:$0xff] }
0x1363   :  { %v2105_v44 = vmul.f32 %v2101_v8, %v2101_v8 }
0x1365   :  { %v2109_v50 = vsel %vm72_vm0, %v2105_v44, 0.0  ;;  %v2315_v44 = vld [vmem:[%s7853_s12 + $0x50] sm:$0xff] }
0x1366   :  { %2110 = vadd.xlane.f32.xlu0 %v2109_v50  ;;  %v2316_v50 = vld [vmem:[%s7853_s12 + $0x58] sm:$0xff] }
0x1371   :  { %v2090_v3 = vpop.xlane.xlu1 %2089 }
0x1372   :  { %v2098_v52 = vmul.f32 0.015625, %v2090_v3  ;;  %v6003_v3 = vpack.c.bf16 %v2316_v50, %v2315_v44 }
0x1374   :  { %v2102_v0 = vsub.f32 %v2080_v36, %v2098_v52  ;;  %v2317_v52 = vld [vmem:[%s7853_s12 + $0x60] sm:$0xff] }
0x1376   :  { %v2106_v53 = vmul.f32 %v2102_v0, %v2102_v0 }
0x1378   :  { %v2112_v32 = vsel %vm72_vm0, %v2106_v53, 0.0 }
0x1379   :  { %2113 = vadd.xlane.f32.xlu0 %v2112_v32  ;;  %v2319_v32 = vld [vmem:[%s7853_s12 + $0x70] sm:$0xff] }
0x137a   :  { %v6011_v29 = vpack.c.bf16 %v2320_v55, %v2319_v32 }
0x13f3   :  { %v2111_v9 = vpop.xlane.xlu0 %2110 }
0x13f4   :  { %v2121_v10 = vmul.f32 0.015625, %v2111_v9  ;;  %v5060_v9 = vld [vmem:[%s7852_s11] ss:$0 sm:$0xff] }
0x13f6   :  { %v2125_v14 = vadd.f32 1e-12, %v2121_v10 }
0x13f8   :  { %6422 = vrsqrt.f32 %v2125_v14 }
0x1402   :  { %v6423_v13 = vpop.eup %6422 }
0x1403   :  { %v2133_v18 = vmul.f32 %v6423_v13, %v2101_v8  ;;  %v5999_v8 = vpack.c.bf16 %v2314_v2, %v2313_v62 }
0x1405   :  { %v2143_v31 = vmul.f32 %v7144_v16, %v2133_v18 }
0x1406   :  { %v2114_v37 = vpop.xlane.xlu0 %2113 }
0x1407   :  { %v2122_v20 = vmul.f32 0.015625, %v2114_v37  ;;  %v5562_v21 = vpop.f32.mrb[22].mxu0  ;;  %v7153_v22 = vadd.f32 %v7149_v19, %v2143_v31 }
0x1408   :  { %v2076_v23 = vadd.f32 %v5562_v21, %v7097_v24  ;;  %v2070_v25 = vpop.f32.mrb[23].mxu0 }
0x1409   :  { %v2126_v39 = vadd.f32 1e-12, %v2122_v20  ;;  %v2071_v26 = vadd.f32 %v7097_v24, %v2070_v25  ;;  %5579 = vmatprep.mubr.msk.f32.mxu1 %vm72_vm0, %v7153_v22 }
0x140a   :  { %v2082_v27 = vadd.f32 %v2076_v23, %v6846_v17  ;;  %v2306_v17 = vld [vmem:[%s7853_s12 + $0x8] sm:$0xff] }
0x140b   :  { %6424 = vrsqrt.f32 %v2126_v39  ;;  %v2081_v34 = vadd.f32 %v2071_v26, %v6839_v11  ;;  %v2305_v11 = vld [vmem:[%s7853_s12] sm:$0xff] }
0x140c   :  { %v2094_v35 = vsel %vm72_vm0, %v2082_v27, 0.0  ;;  %v5983_v38 = vpack.c.bf16 %v2306_v17, %v2305_v11 }
0x140d   :  { %2095 = vadd.xlane.f32.xlu1 %v2094_v35  ;;  %v2091_v36 = vsel %vm72_vm0, %v2081_v34, 0.0 }
0x140e   :  { %2092 = vadd.xlane.f32.xlu0 %v2091_v36  ;;  %5984 = vmatprep.subr.bf16.mxu0 %v5983_v38 }
0x140f   :  { %5986 = vmatpush3.bf16.msra.mxu0 %v5983_v38 }
0x1410   :  { %5988 = vmatprep.subr.bf16.mxu0 %v5987_v1 }
0x1413   :  { %5990 = vmatpush3.bf16.msra.mxu0 %v5987_v1 }
0x1414   :  { %5992 = vmatprep.subr.bf16.mxu0 %v5991_v54 }
0x1415   :  { %v6425_v41 = vpop.eup %6424 }
0x1416   :  { %v2134_v59 = vmul.f32 %v6425_v41, %v2102_v0  ;;  %v2318_v0 = vld [vmem:[%s7853_s12 + $0x68] sm:$0xff] }
0x1417   :  { %5994 = vmatpush3.bf16.msra.mxu0 %v5991_v54  ;;  %v6007_v53 = vpack.c.bf16 %v2318_v0, %v2317_v52 }
0x1418   :  { %v2144_v30 = vmul.f32 %v7144_v16, %v2134_v59  ;;  %5996 = vmatprep.subr.bf16.mxu0 %v5995_v48 }
0x141a   :  { %v7165_v24 = vadd.f32 %v7149_v19, %v2144_v30 }
0x141b   :  { %5998 = vmatpush3.bf16.msra.mxu0 %v5995_v48 }
0x141c   :  { %5580 = vmatmul.mubr.msk.f32.vlgmr.msra.gmra.mrb[20].mxu1 %vm72_vm0, %v7165_v24  ;;  %6000 = vmatprep.subr.bf16.mxu0 %v5999_v8 }
0x141f   :  { %6002 = vmatpush3.bf16.msra.mxu0 %v5999_v8 }
0x1420   :  { %6004 = vmatprep.subr.bf16.mxu0 %v6003_v3 }
0x1423   :  { %6006 = vmatpush3.bf16.msra.mxu0 %v6003_v3  ;;  %v7238_v3 = vld [vmem:[%s7854_s13] ss:$0 sm:$0xff] }
0x1424   :  { %6008 = vmatprep.subr.bf16.mxu0 %v6007_v53 }
0x1427   :  { %6010 = vmatpush3.bf16.msra.mxu0 %v6007_v53 }
0x1428   :  { %6012 = vmatprep.subr.bf16.mxu0 %v6011_v29 }
0x142b   :  { %6014 = vmatpush3.bf16.msra.mxu0 %v6011_v29 }
0x149a   :  { %v2096_v4 = vpop.xlane.xlu1 %2095 }
0x149b   :  { %v2100_v56 = vmul.f32 0.015625, %v2096_v4  ;;  %v2093_v45 = vpop.xlane.xlu0 %2092 }
0x149c   :  { %v2099_v46 = vmul.f32 0.015625, %v2093_v45 }
0x149d   :  { %v2104_v28 = vsub.f32 %v2082_v27, %v2100_v56 }
0x149e   :  { %v2103_v58 = vsub.f32 %v2081_v34, %v2099_v46 }
0x149f   :  { %v2108_v61 = vmul.f32 %v2104_v28, %v2104_v28 }
0x14a0   :  { %v2107_v63 = vmul.f32 %v2103_v58, %v2103_v58 }
0x14a1   :  { %v2118_v7 = vsel %vm72_vm0, %v2108_v61, 0.0 }
0x14a2   :  { %2119 = vadd.xlane.f32.xlu1 %v2118_v7  ;;  %v2115_v40 = vsel %vm72_vm0, %v2107_v63, 0.0 }
0x14a3   :  { %2116 = vadd.xlane.f32.xlu0 %v2115_v40 }
0x14ef   :  { %v5581_v10 = vpop.f32.mrb[20].mxu1 }
0x14f0   :  { %v2256_v14 = vadd.f32 %v5581_v10, %v5060_v9  ;;  %v2250_v13 = vpop.f32.mrb[21].mxu1 }
0x14f1   :  { %v2251_v18 = vadd.f32 %v5060_v9, %v2250_v13 }
0x14f2   :  { %v2270_v31 = vmul.f32 %v2256_v14, %v2256_v14 }
0x14f3   :  { %v2269_v37 = vmul.f32 %v2251_v18, %v2251_v18 }
0x14f4   :  { %v2274_v20 = vmul.f32 %v2270_v31, %v2256_v14 }
0x14f5   :  { %v2273_v21 = vmul.f32 %v2269_v37, %v2251_v18 }
0x14f6   :  { %v2278_v23 = vmul.f32 0.044715, %v2274_v20 }
0x14f7   :  { %v2277_v25 = vmul.f32 0.044715, %v2273_v21 }
0x14f8   :  { %v2282_v39 = vadd.f32 %v2278_v23, %v2256_v14 }
0x14f9   :  { %v2281_v26 = vadd.f32 %v2277_v25, %v2251_v18 }
0x14fa   :  { %v2286_v27 = vmul.f32 0.7978846, %v2282_v39 }
0x14fb   :  { %v2285_v34 = vmul.f32 0.7978846, %v2281_v26 }
0x14fc   :  { %6426 = vtanh.f32 %v2286_v27 }
0x14fd   :  { %6428 = vtanh.f32 %v2285_v34 }
0x1506   :  { %v6427_v35 = vpop.eup %6426 }
0x1507   :  { %v6429_v36 = vpop.eup %6428  ;;  %v2294_v41 = vadd.f32 1.0, %v6427_v35 }
0x1508   :  { %v2293_v59 = vadd.f32 1.0, %v6429_v36 }
0x1509   :  { %v2298_v30 = vmul.f32 0.5, %v2294_v41 }
0x150a   :  { %v2297_v11 = vmul.f32 0.5, %v2293_v59 }
0x150b   :  { %v2302_v38 = vmul.f32 %v2298_v30, %v2256_v14 }
0x150c   :  { %v2301_v17 = vmul.f32 %v2297_v11, %v2251_v18  ;;  %v5069_v11 = vld [vmem:[%s7876_s26 + $0x88] sm:$0xff] }
0x150e   :  { %5617 = vmatprep.mubr.f32.mxu0 %v2301_v17  ;;  %v5071_v17 = vld [vmem:[%s7876_s26 + $0x98] sm:$0xff] }
0x150f   :  { %5618 = vmatmul.mubr.f32.vlgmr.msra.gmra.mrb[24].mxu0 %v2302_v38  ;;  %v5068_v38 = vld [vmem:[%s7876_s26 + $0x80] sm:$0xff] }
0x152f   :  { %v2120_v42 = vpop.xlane.xlu1 %2119 }
0x1530   :  { %v2124_v43 = vmul.f32 0.015625, %v2120_v42  ;;  %v2117_v1 = vpop.xlane.xlu0 %2116  ;;  %v5070_v42 = vld [vmem:[%s7876_s26 + $0x90] sm:$0xff] }
0x1531   :  { %v2123_v51 = vmul.f32 0.015625, %v2117_v1  ;;  %v6017_v1 = vpack.c.bf16 %v5070_v42, %v5068_v38 }
0x1532   :  { %v2128_v6 = vadd.f32 1e-12, %v2124_v43  ;;  %v6015_v43 = vpack.c.bf16 %v5071_v17, %v5069_v11  ;;  %v5084_v11 = vld [vmem:[%s7846_s5 + $0x2] sm:$0x3]  ;;  %s7882_s5 = smov 96  }
0x1533   :  { %v2127_v54 = vadd.f32 1e-12, %v2123_v51  ;;  %v5073_v51 = vld [vmem:[%s7876_s26 + $0xa8] sm:$0xff]  ;;  %v7324_v38 = vrot.slane %v5084_v11, %v6755_v57 }
0x1534   :  { %6430 = vrsqrt.f32 %v2128_v6  ;;  %6016 = vmatprep.subr.bf16.mxu1 %v6015_v43  ;;  %v5075_v6 = vld [vmem:[%s7876_s26 + $0xb8] sm:$0xff]  ;;  %v7327_v43 = vrot.slane %v5084_v11, %v6763_v60 }
0x1535   :  { %6432 = vrsqrt.f32 %v2127_v54  ;;  %6018 = vmatpush1.bf16.msra.mxu1 %v6017_v1  ;;  %v6019_v54 = vpack.c.bf16 %v5075_v6, %v5073_v51 }
0x1537   :  { %6020 = vmatprep.subr.bf16.mxu1 %v6019_v54 }
0x153e   :  { %v6431_v5 = vpop.eup %6430 }
0x153f   :  { %v6433_v47 = vpop.eup %6432  ;;  %v2136_v48 = vmul.f32 %v6431_v5, %v2104_v28  ;;  %v5072_v5 = vld [vmem:[%s7876_s26 + $0xa0] sm:$0xff] }
0x1540   :  { %v2135_v62 = vmul.f32 %v6433_v47, %v2103_v58  ;;  %v5074_v47 = vld [vmem:[%s7876_s26 + $0xb0] sm:$0xff] }
0x1541   :  { %v2146_v2 = vmul.f32 %v7144_v16, %v2136_v48  ;;  %v6021_v48 = vpack.c.bf16 %v5074_v47, %v5072_v5 }
0x1542   :  { %v2145_v8 = vmul.f32 %v7144_v16, %v2135_v62  ;;  %v5077_v62 = vld [vmem:[%s7876_s26 + $0xc8] sm:$0xff] }
0x1543   :  { %v7228_v50 = vadd.f32 %v7149_v19, %v2146_v2  ;;  %v5079_v2 = vld [vmem:[%s7876_s26 + $0xd8] sm:$0xff]  ;;  %6022 = vmatpush1.bf16.msra.mxu1 %v6021_v48 }
0x1544   :  { %v7225_v44 = vadd.f32 %v7149_v19, %v2145_v8  ;;  %v6023_v8 = vpack.c.bf16 %v5079_v2, %v5077_v62 }
0x1546   :  { %5582 = vmatprep.mubr.msk.f32.mxu1 %vm72_vm0, %v7225_v44  ;;  %6024 = vmatprep.subr.bf16.mxu1 %v6023_v8 }
0x1547   :  { %5583 = vmatmul.mubr.msk.f32.gmra.mrb[22].mxu1 %vm72_vm0, %v7228_v50 }
0x1548   :  { %2597 = vmatprep.mubr.f32.mxu1 %v6556_v33 }
0x15e2   :  { %v5619_v16 = vpop.f32.mrb[24].mxu0 }
0x15e3   :  { %v2400_v52 = vadd.f32 %v5619_v16, %v7238_v3  ;;  %v2394_v0 = vpop.f32.mrb[25].mxu0  ;;  %v5076_v16 = vld [vmem:[%s7876_s26 + $0xc0] sm:$0xff] }
0x15e4   :  { %v2395_v19 = vadd.f32 %v7238_v3, %v2394_v0 }
0x15e5   :  { %v2414_v53 = vadd.f32 %v2400_v52, %v7165_v24  ;;  %v5078_v52 = vld [vmem:[%s7876_s26 + $0xd0] sm:$0xff] }
0x15e6   :  { %v2413_v32 = vadd.f32 %v2395_v19, %v7153_v22  ;;  %v6025_v0 = vpack.c.bf16 %v5078_v52, %v5076_v16  ;;  %v5081_v19 = vld [vmem:[%s7876_s26 + $0xe8] sm:$0xff] }
0x15e7   :  { %v2422_v55 = vsel %vm72_vm0, %v2414_v53, 0.0 }
0x15e8   :  { %2423 = vadd.xlane.f32.xlu1 %v2422_v55  ;;  %v2419_v29 = vsel %vm72_vm0, %v2413_v32, 0.0  ;;  %6026 = vmatpush1.bf16.msra.mxu1 %v6025_v0  ;;  %v5080_v55 = vld [vmem:[%s7876_s26 + $0xe0] sm:$0xff] }
0x15e9   :  { %2420 = vadd.xlane.f32.xlu0 %v2419_v29  ;;  %v5082_v29 = vld [vmem:[%s7876_s26 + $0xf0] sm:$0xff] }
0x161a   :  { %v5584_v4 = vpop.f32.mrb[22].mxu1 }
0x161b   :  { %v2266_v56 = vadd.f32 %v5584_v4, %v5060_v9  ;;  %v2260_v45 = vpop.f32.mrb[23].mxu1  ;;  %v6029_v4 = vpack.c.bf16 %v5082_v29, %v5080_v55 }
0x161c   :  { %v2261_v46 = vadd.f32 %v5060_v9, %v2260_v45 }
0x161d   :  { %v2272_v28 = vmul.f32 %v2266_v56, %v2266_v56 }
0x161e   :  { %v2271_v58 = vmul.f32 %v2261_v46, %v2261_v46 }
0x161f   :  { %v2276_v61 = vmul.f32 %v2272_v28, %v2266_v56 }
0x1620   :  { %v2275_v63 = vmul.f32 %v2271_v58, %v2261_v46 }
0x1621   :  { %v2280_v7 = vmul.f32 0.044715, %v2276_v61 }
0x1622   :  { %v2279_v40 = vmul.f32 0.044715, %v2275_v63 }
0x1623   :  { %v2284_v10 = vadd.f32 %v2280_v7, %v2266_v56 }
0x1624   :  { %v2283_v24 = vadd.f32 %v2279_v40, %v2261_v46 }
0x1625   :  { %v2288_v14 = vmul.f32 0.7978846, %v2284_v10 }
0x1626   :  { %v2287_v22 = vmul.f32 0.7978846, %v2283_v24 }
0x1627   :  { %6434 = vtanh.f32 %v2288_v14 }
0x1628   :  { %6436 = vtanh.f32 %v2287_v22 }
0x1631   :  { %v6435_v13 = vpop.eup %6434 }
0x1632   :  { %v6437_v18 = vpop.eup %6436  ;;  %v2296_v31 = vadd.f32 1.0, %v6435_v13 }
0x1633   :  { %v2295_v37 = vadd.f32 1.0, %v6437_v18 }
0x1634   :  { %v2300_v20 = vmul.f32 0.5, %v2296_v31 }
0x1635   :  { %v2299_v21 = vmul.f32 0.5, %v2295_v37  ;;  %v5066_v37 = vld [vmem:[%s7855_s14] ss:$0 sm:$0xff] }
0x1636   :  { %v2304_v9 = vmul.f32 %v2300_v20, %v2266_v56 }
0x1637   :  { %v2303_v23 = vmul.f32 %v2299_v21, %v2261_v46 }
0x1639   :  { %5620 = vmatprep.mubr.f32.mxu0 %v2303_v23 }
0x163a   :  { %5621 = vmatmul.mubr.f32.gmra.mrb[26].mxu0 %v2304_v9 }
0x1675   :  { %v2424_v25 = vpop.xlane.xlu1 %2423 }
0x1676   :  { %v2432_v39 = vmul.f32 0.015625, %v2424_v25  ;;  %v2421_v26 = vpop.xlane.xlu0 %2420 }
0x1677   :  { %v2431_v27 = vmul.f32 0.015625, %v2421_v26 }
0x1678   :  { %v2436_v34 = vsub.f32 %v2414_v53, %v2432_v39  ;;  %v5083_v53 = vld [vmem:[%s7876_s26 + $0xf8] sm:$0xff] }
0x1679   :  { %v2435_v35 = vsub.f32 %v2413_v32, %v2431_v27  ;;  %v6027_v32 = vpack.c.bf16 %v5083_v53, %v5081_v19 }
0x167a   :  { %v2440_v36 = vmul.f32 %v2436_v34, %v2436_v34 }
0x167b   :  { %v2439_v41 = vmul.f32 %v2435_v35, %v2435_v35  ;;  %6028 = vmatprep.subr.bf16.mxu1 %v6027_v32 }
0x167c   :  { %v2446_v59 = vsel %vm72_vm0, %v2440_v36, 0.0  ;;  %6030 = vmatpush1.bf16.msra.mxu1 %v6029_v4 }
0x167d   :  { %2447 = vadd.xlane.f32.xlu1 %v2446_v59  ;;  %v2443_v30 = vsel %vm72_vm0, %v2439_v41, 0.0 }
0x167e   :  { %2444 = vadd.xlane.f32.xlu0 %v2443_v30 }
0x170a   :  { %v2448_v56 = vpop.xlane.xlu1 %2447 }
0x170b   :  { %v2456_v45 = vmul.f32 0.015625, %v2448_v56  ;;  %v2445_v46 = vpop.xlane.xlu0 %2444 }
0x170c   :  { %v2455_v28 = vmul.f32 0.015625, %v2445_v46 }
0x170d   :  { %v2460_v58 = vadd.f32 1e-12, %v2456_v45  ;;  %v5622_v61 = vpop.f32.mrb[26].mxu0 }
0x170e   :  { %v2459_v63 = vadd.f32 1e-12, %v2455_v28  ;;  %v2410_v7 = vadd.f32 %v5622_v61, %v7238_v3  ;;  %v2404_v40 = vpop.f32.mrb[27].mxu0 }
0x170f   :  { %6438 = vrsqrt.f32 %v2460_v58  ;;  %v2405_v10 = vadd.f32 %v7238_v3, %v2404_v40 }
0x1710   :  { %6440 = vrsqrt.f32 %v2459_v63  ;;  %v2416_v24 = vadd.f32 %v2410_v7, %v7228_v50  ;;  %v5067_v50 = vld [vmem:[%s7856_s15] ss:$0 sm:$0xff] }
0x1711   :  { %v2415_v14 = vadd.f32 %v2405_v10, %v7225_v44 }
0x1712   :  { %v2428_v22 = vsel %vm72_vm0, %v2416_v24, 0.0 }
0x1713   :  { %2429 = vadd.xlane.f32.xlu1 %v2428_v22  ;;  %v2425_v13 = vsel %vm72_vm0, %v2415_v14, 0.0 }
0x1714   :  { %2426 = vadd.xlane.f32.xlu0 %v2425_v13 }
0x1719   :  { %v6439_v18 = vpop.eup %6438 }
0x171a   :  { %v6441_v31 = vpop.eup %6440  ;;  %v2468_v21 = vmul.f32 %v6439_v18, %v2436_v34 }
0x171b   :  { %v2467_v20 = vmul.f32 %v6441_v31, %v2435_v35 }
0x171c   :  { %v2478_v23 = vmul.f32 %v5066_v37, %v2468_v21 }
0x171d   :  { %v2477_v3 = vmul.f32 %v5066_v37, %v2467_v20 }
0x171e   :  { %v7313_v9 = vadd.f32 %v5067_v50, %v2478_v23 }
0x171f   :  { %v7308_v44 = vadd.f32 %v5067_v50, %v2477_v3 }
0x1721   :  { %5085 = vmatmul.mubr.msk.f32.vlgmr.msra.gmra.mrb[24].mxu1 %vm72_vm0, %v7308_v44 }
0x1722   :  { %2603 = vmatprep.mubr.f32.mxu1 %v6556_v33 }
0x1725   :  { %5086 = vmatmul.mubr.msk.f32.gmra.mrb[26].mxu1 %vm72_vm0, %v7313_v9 }
0x1726   :  { %2609 = vmatprep.mubr.f32.mxu1 %v6556_v33 }
0x17a0   :  { %v2430_v25 = vpop.xlane.xlu1 %2429 }
0x17a1   :  { %v2434_v39 = vmul.f32 0.015625, %v2430_v25  ;;  %v2427_v26 = vpop.xlane.xlu0 %2426 }
0x17a2   :  { %v2433_v27 = vmul.f32 0.015625, %v2427_v26 }
0x17a3   :  { %v2438_v34 = vsub.f32 %v2416_v24, %v2434_v39 }
0x17a4   :  { %v2437_v35 = vsub.f32 %v2415_v14, %v2433_v27 }
0x17a5   :  { %v2442_v36 = vmul.f32 %v2438_v34, %v2438_v34 }
0x17a6   :  { %v2441_v41 = vmul.f32 %v2437_v35, %v2437_v35 }
0x17a7   :  { %v2452_v59 = vsel %vm72_vm0, %v2442_v36, 0.0 }
0x17a8   :  { %2453 = vadd.xlane.f32.xlu1 %v2452_v59  ;;  %v2449_v30 = vsel %vm72_vm0, %v2441_v41, 0.0 }
0x17a9   :  { %2450 = vadd.xlane.f32.xlu0 %v2449_v30 }
0x17f4   :  { %v2599_v17 = vpop.f32.mrb[24].mxu1 }
0x17f5   :  { %v2601_v42 = vpop.f32.mrb[25].mxu1  ;;  %v7330_v51 = vadd.f32 %v2599_v17, %v7324_v38 }
0x17f6   :  { %v2602_v5 = vadd.f32 %v2601_v42, %v7327_v43 }
0x17f8   :  { %v2605_v1 = vpop.f32.mrb[26].mxu1 }
0x17f9   :  { %v7333_v6 = vadd.f32 %v2605_v1, %v7324_v38  ;;  %v2607_v54 = vpop.f32.mrb[27].mxu1 }
0x17fa   :  { %v2608_v47 = vadd.f32 %v2607_v54, %v7327_v43 }
0x17fb   :  { %v7339_v57 = vpack.i.bf16 %v7333_v6, %v7330_v51 }
0x17fc   :  { %v6037_v48 = vpack.c.bf16 %v2608_v47, %v2602_v5  ;;  %v7341_v62 = vpack.i.bf16 %v2608_v47, %v2602_v5 }
0x17fd   :  { %6286 = vrot.lane.b32.xlu1 %v7339_v57, %s6558_s23  ;;  %6281 = vrot.lane.b32.xlu0 %v7339_v57, %s6557_s3 }
0x1801   :  { %2818 = vrot.lane.b32.xlu1 %v7330_v51, %s6559_s1  ;;  %6291 = vrot.lane.b32.xlu0 %v7339_v57, %s6560_s22 }
0x1805   :  { %2820 = vrot.lane.b32.xlu1 %v7333_v6, %s6559_s1  ;;  %3024 = vrot.lane.b32.xlu0 %v7330_v51, %s7882_s5 }
0x1809   :  { %3026 = vrot.lane.b32.xlu1 %v7333_v6, %s7882_s5 }
0x1835   :  { %v2454_v60 = vpop.xlane.xlu1 %2453 }
0x1836   :  { %v2458_v2 = vmul.f32 0.015625, %v2454_v60  ;;  %v2451_v8 = vpop.xlane.xlu0 %2450 }
0x1837   :  { %v2457_v16 = vmul.f32 0.015625, %v2451_v8 }
0x1838   :  { %v2462_v52 = vadd.f32 1e-12, %v2458_v2 }
0x1839   :  { %v2461_v0 = vadd.f32 1e-12, %v2457_v16 }
0x183a   :  { %6442 = vrsqrt.f32 %v2462_v52 }
0x183b   :  { %6444 = vrsqrt.f32 %v2461_v0 }
0x1844   :  { %v6443_v19 = vpop.eup %6442 }
0x1845   :  { %v6445_v53 = vpop.eup %6444  ;;  %v2470_v55 = vmul.f32 %v6443_v19, %v2438_v34 }
0x1846   :  { %v2469_v32 = vmul.f32 %v6445_v53, %v2437_v35 }
0x1847   :  { %v2480_v56 = vmul.f32 %v5066_v37, %v2470_v55 }
0x1848   :  { %v2479_v29 = vmul.f32 %v5066_v37, %v2469_v32 }
0x1849   :  { %v7362_v45 = vadd.f32 %v5067_v50, %v2480_v56 }
0x184a   :  { %v7357_v4 = vadd.f32 %v5067_v50, %v2479_v29 }
0x184c   :  { %5087 = vmatmul.mubr.msk.f32.gmra.mrb[28].mxu1 %vm72_vm0, %v7357_v4 }
0x184d   :  { %2615 = vmatprep.mubr.f32.mxu1 %v6556_v33 }
0x1850   :  { %5088 = vmatmul.mubr.msk.f32.gmra.mrb[30].mxu1 %vm72_vm0, %v7362_v45 }
0x1851   :  { %5627 = vmatprep.mubr.msk.f32.mxu1 %vm282_vm1, %v7330_v51 }
0x186f   :  { %v6287_v46 = vpop.permute.xlu1 %6286  ;;  %v6282_v28 = vpop.permute.xlu0 %6281 }
0x1870   :  { %v6289_v58 = vunpack.i.h.bf16 %v6287_v46  ;;  %v6288_v61 = vunpack.i.l.bf16 %v6287_v46  ;;  %v6284_v63 = vunpack.i.h.bf16 %v6282_v28  ;;  %v6283_v7 = vunpack.i.l.bf16 %v6282_v28 }
0x1872   :  { %v6041_v40 = vpack.c.bf16 %v6289_v58, %v6288_v61  ;;  %v6031_v10 = vpack.c.bf16 %v6284_v63, %v6283_v7 }
0x1873   :  { %v2819_v24 = vpop.permute.xlu1 %2818  ;;  %v6292_v14 = vpop.permute.xlu0 %6291 }
0x1874   :  { %v6294_v22 = vunpack.i.h.bf16 %v6292_v14  ;;  %v6293_v13 = vunpack.i.l.bf16 %v6292_v14  ;;  %6033 = vmatprep.subr.msk.bf16.mxu1 %vm6788_vm2, %v6031_v10  ;;  %6043 = vmatprep.subr.msk.bf16.mxu0 %vm6788_vm2, %v6041_v40 }
0x1875   :  { %5641 = vmatprep.mubr.msk.f32.mxu0 %vm282_vm1, %v2819_v24  ;;  %6036 = vmatpush3.bf16.xpose.msk.msra.mxu1 %vm6788_vm2, %v6031_v10 }
0x1876   :  { %v6051_v18 = vpack.c.bf16 %v6294_v22, %v6293_v13  ;;  %6046 = vmatpush3.bf16.xpose.msk.msra.mxu0 %vm6788_vm2, %v6041_v40  ;;  %6038 = vmatprep.subr.bf16.mxu1 %v6037_v48 }
0x1877   :  { %v2821_v31 = vpop.permute.xlu1 %2820  ;;  %v3025_v37 = vpop.permute.xlu0 %3024 }
0x1878   :  { %6053 = vmatprep.subr.msk.bf16.mxu0 %vm6788_vm2, %v6051_v18 }
0x187b   :  { %v3027_v20 = vpop.permute.xlu1 %3026 }
0x187c   :  { %5628 = vmatmul.mubr.msk.f32.vlgmr.msra.gmra.mrb[32].mxu1 %vm282_vm1, %v7333_v6 }
0x187d   :  { %5642 = vmatmul.mubr.msk.f32.vlgmr.msra.gmra.mrb[28].mxu0 %vm282_vm1, %v2821_v31  ;;  %6040 = vmatpush3.bf16.msra.mxu1 %v6037_v48 }
0x187e   :  { %6056 = vmatpush3.bf16.xpose.msk.msra.mxu0 %vm6788_vm2, %v6051_v18  ;;  %5655 = vmatprep.mubr.msk.f32.mxu0 %vm282_vm1, %v3025_v37 }
0x1885   :  { %5656 = vmatmul.mubr.msk.f32.vlgmr.msra.gmra.mrb[30].mxu0 %vm282_vm1, %v3027_v20 }
0x191f   :  { %v7386_v21 = vpop.f32.mrb[28].mxu1 }
0x1920   :  { %v2613_v50 = vpop.f32.mrb[29].mxu1 }
0x1921   :  { %v2614_v25 = vadd.f32 %v2613_v50, %v7327_v43 }
0x1923   :  { %v7388_v3 = vpop.f32.mrb[30].mxu1 }
0x1924   :  { %v2619_v23 = vpop.f32.mrb[31].mxu1 }
0x1925   :  { %v2620_v39 = vadd.f32 %v2619_v23, %v7327_v43 }
0x1927   :  { %v7392_v26 = vpack.c.bf16 %v2620_v39, %v2614_v25  ;;  %v7394_v27 = vpack.i.bf16 %v2620_v39, %v2614_v25 }
0x194f   :  { %v5629_v34 = vpop.f32.mrb[32].mxu1 }
0x1950   :  { %v2712_v35 = vmul.f32 0.25, %v5629_v34  ;;  %v5643_v36 = vpop.f32.mrb[28].mxu0  ;;  %v2702_v41 = vpop.f32.mrb[33].mxu1 }
0x1951   :  { %v2711_v59 = vmul.f32 0.25, %v2702_v41  ;;  %v2900_v30 = vpop.f32.mrb[29].mxu0  ;;  %v2910_v54 = vmul.f32 0.25, %v5643_v36 }
0x1952   :  { %v2714_v11 = vadd.f32 %v2712_v35, %v6805_v15  ;;  %v2909_v17 = vmul.f32 0.25, %v2900_v30 }
0x1953   :  { %v2713_v42 = vadd.f32 %v2711_v59, %v6805_v15  ;;  %v2912_v8 = vadd.f32 %v2910_v54, %v6805_v15 }
0x1954   :  { %v2718_v1 = vsel %vm282_vm1, %v2714_v11, -inf  ;;  %v2911_v5 = vadd.f32 %v2909_v17, %v6805_v15 }
0x1955   :  { %2719 = vmax.xlane.f32.xlu1 %v2718_v1  ;;  %v2715_v43 = vsel %vm282_vm1, %v2713_v42, -inf  ;;  %v2916_v0 = vsel %vm282_vm1, %v2912_v8, -inf }
0x1956   :  { %2716 = vmax.xlane.f32.xlu0 %v2715_v43  ;;  %v2913_v2 = vsel %vm282_vm1, %v2911_v5, -inf }
0x1958   :  { %v5657_v47 = vpop.f32.mrb[30].mxu0 }
0x1959   :  { %v3116_v48 = vmul.f32 0.25, %v5657_v47  ;;  %v3106_v60 = vpop.f32.mrb[31].mxu0 }
0x195a   :  { %v3115_v16 = vmul.f32 0.25, %v3106_v60  ;;  %2914 = vmax.xlane.f32.xlu0 %v2913_v2 }
0x195b   :  { %v3118_v19 = vadd.f32 %v3116_v48, %v6805_v15 }
0x195c   :  { %v3117_v52 = vadd.f32 %v3115_v16, %v6805_v15 }
0x195d   :  { %v3122_v32 = vsel %vm282_vm1, %v3118_v19, -inf }
0x195e   :  { %v3119_v53 = vsel %vm282_vm1, %v3117_v52, -inf  ;;  %2917 = vmax.xlane.f32.xlu0 %v2916_v0 }
0x195f   :  { %3120 = vmax.xlane.f32.xlu1 %v3119_v53 }
0x1962   :  { %3123 = vmax.xlane.f32.xlu0 %v3122_v32 }
0x1970   :  { %6296 = vrot.lane.b32.xlu1 %v7341_v62, %s6559_s1 }
0x19e2   :  { %v2720_v55 = vpop.xlane.xlu1 %2719 }
0x19e3   :  { %v2722_v29 = vsub.f32 %v2714_v11, %v2720_v55  ;;  %v2717_v56 = vpop.xlane.xlu0 %2716 }
0x19e4   :  { %v2721_v46 = vsub.f32 %v2713_v42, %v2717_v56 }
0x19e5   :  { %v2725_v28 = vmul.f32 1.442695, %v2722_v29 }
0x19e6   :  { %v2723_v58 = vmul.f32 1.442695, %v2721_v46 }
0x19e7   :  { %6446 = vpow2.f32 %v2725_v28  ;;  %v2915_v61 = vpop.xlane.xlu0 %2914 }
0x19e8   :  { %6448 = vpow2.f32 %v2723_v58  ;;  %v2919_v63 = vsub.f32 %v2911_v5, %v2915_v61 }
0x19ea   :  { %v2921_v7 = vmul.f32 1.442695, %v2919_v63 }
0x19eb   :  { %v2918_v40 = vpop.xlane.xlu0 %2917 }
0x19ec   :  { %6450 = vpow2.f32 %v2921_v7  ;;  %v3121_v10 = vpop.xlane.xlu1 %3120  ;;  %v2920_v24 = vsub.f32 %v2912_v8, %v2918_v40 }
0x19ed   :  { %v3125_v17 = vsub.f32 %v3117_v52, %v3121_v10 }
0x19ee   :  { %v2923_v14 = vmul.f32 1.442695, %v2920_v24 }
0x19ef   :  { %v3124_v22 = vpop.xlane.xlu0 %3123  ;;  %v3127_v42 = vmul.f32 1.442695, %v3125_v17 }
0x19f0   :  { %6452 = vpow2.f32 %v2923_v14  ;;  %v6297_v13 = vpop.permute.xlu1 %6296  ;;  %v3126_v18 = vsub.f32 %v3118_v19, %v3124_v22 }
0x19f1   :  { %v6447_v31 = vpop.eup %6446  ;;  %v6299_v37 = vunpack.i.h.bf16 %v6297_v13  ;;  %v6298_v20 = vunpack.i.l.bf16 %v6297_v13 }
0x19f2   :  { %v6449_v50 = vpop.eup %6448  ;;  %v3129_v23 = vmul.f32 1.442695, %v3126_v18  ;;  %v2730_v25 = vsel %vm282_vm1, %v6447_v31, 0.0 }
0x19f3   :  { %v6047_v39 = vpack.c.bf16 %v6299_v37, %v6298_v20  ;;  %2731 = vadd.xlane.f32.xlu0 %v2730_v25  ;;  %v2727_v34 = vsel %vm282_vm1, %v6449_v50, 0.0 }
0x19f4   :  { %6454 = vpow2.f32 %v3129_v23  ;;  %2728 = vadd.xlane.f32.xlu1 %v2727_v34 }
0x19f5   :  { %6048 = vmatprep.subr.bf16.mxu1 %v6047_v39  ;;  %6456 = vpow2.f32 %v3127_v42 }
0x19f6   :  { %v6451_v35 = vpop.eup %6450 }
0x19f7   :  { %v2925_v36 = vsel %vm282_vm1, %v6451_v35, 0.0 }
0x19f8   :  { %2926 = vadd.xlane.f32.xlu1 %v2925_v36 }
0x19fa   :  { %v6453_v41 = vpop.eup %6452 }
0x19fb   :  { %v2928_v59 = vsel %vm282_vm1, %v6453_v41, 0.0 }
0x19fc   :  { %2929 = vadd.xlane.f32.xlu0 %v2928_v59 }
0x19fe   :  { %v6455_v30 = vpop.eup %6454 }
0x19ff   :  { %v3134_v11 = vsel %vm282_vm1, %v6455_v30, 0.0  ;;  %v6457_v1 = vpop.eup %6456 }
0x1a00   :  { %3135 = vadd.xlane.f32.xlu0 %v3134_v11  ;;  %v3131_v54 = vsel %vm282_vm1, %v6457_v1, 0.0 }
0x1a09   :  { %6306 = vrot.lane.b32.xlu1 %v7339_v57, %s7883_s29 }
0x1a16   :  { %6301 = vrot.lane.b32.xlu0 %v7341_v62, %s7882_s5 }
0x1a1a   :  { %3230 = vrot.lane.b32.xlu0 %v7333_v6, %s7884_s24 }
0x1a2d   :  { %3132 = vadd.xlane.f32.xlu1 %v3131_v54 }
0x1a3e   :  { %3228 = vrot.lane.b32.xlu1 %v7330_v51, %s7884_s24 }
0x1a80   :  { %v2732_v43 = vpop.xlane.xlu0 %2731 }
0x1a81   :  { %6458 = vrcp.f32 %v2732_v43  ;;  %v2729_v5 = vpop.xlane.xlu1 %2728  ;;  %v7458_v43 = vadd.f32 %v7388_v3, %v7324_v38 }
0x1a82   :  { %6460 = vrcp.f32 %v2729_v5  ;;  %v7462_v5 = vadd.f32 %v7386_v21, %v7324_v38 }
0x1a85   :  { %v2927_v57 = vpop.xlane.xlu1 %2926 }
0x1a86   :  { %6462 = vrcp.f32 %v2927_v57  ;;  %v7466_v57 = vpack.i.bf16 %v7458_v43, %v7462_v5 }
0x1a89   :  { %v2930_v47 = vpop.xlane.xlu0 %2929  ;;  %v6307_v52 = vpop.permute.xlu1 %6306 }
0x1a8a   :  { %6464 = vrcp.f32 %v2930_v47  ;;  %v6309_v32 = vunpack.i.h.bf16 %v6307_v52  ;;  %v6308_v55 = vunpack.i.l.bf16 %v6307_v52 }
0x1a8b   :  { %v6459_v48 = vpop.eup %6458 }
0x1a8c   :  { %v6461_v60 = vpop.eup %6460  ;;  %v2736_v8 = vmul.f32 %v6459_v48, %v6447_v31  ;;  %v6061_v28 = vpack.c.bf16 %v6309_v32, %v6308_v55 }
0x1a8d   :  { %v3136_v6 = vpop.xlane.xlu0 %3135  ;;  %v2735_v2 = vmul.f32 %v6461_v60, %v6449_v50 }
0x1a8e   :  { %6466 = vrcp.f32 %v3136_v6 }
0x1a8f   :  { %5634 = vmatprep.mubr.msk.f32.mxu1 %vm282_vm1, %v2735_v2 }
0x1a90   :  { %v6463_v16 = vpop.eup %6462  ;;  %5635 = vmatmul.mubr.msk.f32.vlgmr.msra.gmra.mrb[34].mxu1 %vm282_vm1, %v2736_v8 }
0x1a91   :  { %6050 = vmatpush3.bf16.msra.mxu1 %v6047_v39  ;;  %v6302_v51 = vpop.permute.xlu0 %6301  ;;  %v2933_v0 = vmul.f32 %v6463_v16, %v6451_v35 }
0x1a92   :  { %v6304_v19 = vunpack.i.h.bf16 %v6302_v51  ;;  %v6303_v53 = vunpack.i.l.bf16 %v6302_v51 }
0x1a93   :  { %5648 = vmatprep.mubr.msk.f32.mxu1 %vm282_vm1, %v2933_v0 }
0x1a94   :  { %v6465_v29 = vpop.eup %6464  ;;  %v6057_v56 = vpack.c.bf16 %v6304_v19, %v6303_v53 }
0x1a95   :  { %v2934_v46 = vmul.f32 %v6465_v29, %v6453_v41  ;;  %v3231_v24 = vpop.permute.xlu0 %3230 }
0x1a96   :  { %6058 = vmatprep.subr.bf16.mxu1 %v6057_v56 }
0x1a97   :  { %5649 = vmatmul.mubr.msk.f32.vlgmr.msra.gmra.mrb[36].mxu1 %vm282_vm1, %v2934_v46 }
0x1a98   :  { %6060 = vmatpush3.bf16.msra.mxu1 %v6057_v56  ;;  %v6467_v61 = vpop.eup %6466 }
0x1a99   :  { %6063 = vmatprep.subr.msk.bf16.mxu1 %vm6788_vm2, %v6061_v28  ;;  %v3140_v40 = vmul.f32 %v6467_v61, %v6455_v30 }
0x1aba   :  { %v3133_v58 = vpop.xlane.xlu1 %3132 }
0x1abb   :  { %6468 = vrcp.f32 %v3133_v58 }
0x1abe   :  { %v3229_v10 = vpop.permute.xlu1 %3228 }
0x1ac5   :  { %v6469_v63 = vpop.eup %6468 }
0x1ac6   :  { %v3139_v7 = vmul.f32 %v6469_v63, %v6457_v1 }
0x1ac8   :  { %5662 = vmatprep.mubr.msk.f32.mxu1 %vm282_vm1, %v3139_v7 }
0x1ac9   :  { %5663 = vmatmul.mubr.msk.f32.vlgmr.msra.gmra.mrb[38].mxu1 %vm282_vm1, %v3140_v40 }
0x1aca   :  { %6066 = vmatpush3.bf16.xpose.msk.msra.mxu1 %vm6788_vm2, %v6061_v28  ;;  %5669 = vmatprep.mubr.msk.f32.mxu1 %vm282_vm1, %v3229_v10 }
0x1acb   :  { %6078 = vmatprep.subr.bf16.mxu1 %v7392_v26 }
0x1ad1   :  { %5670 = vmatmul.mubr.msk.f32.vlgmr.msra.gmra.mrb[40].mxu1 %vm282_vm1, %v3231_v24 }
0x1ad2   :  { %6080 = vmatpush3.bf16.msra.mxu1 %v7392_v26 }
0x1b63   :  { %v7438_v14 = vpop.f32.mrb[34].mxu1 }
0x1b64   :  { %v7440_v22 = vpop.f32.mrb[35].mxu1 }
0x1b6a   :  { %v7442_v13 = vpop.f32.mrb[36].mxu1 }
0x1b6b   :  { %v7444_v18 = vpop.f32.mrb[37].mxu1 }
0x1b9c   :  { %v7446_v31 = vpop.f32.mrb[38].mxu1 }
0x1b9d   :  { %v7448_v37 = vpop.f32.mrb[39].mxu1 }
0x1ba4   :  { %v5671_v20 = vpop.f32.mrb[40].mxu1 }
0x1ba5   :  { %v3320_v50 = vmul.f32 0.25, %v5671_v20  ;;  %v3310_v23 = vpop.f32.mrb[41].mxu1 }
0x1ba6   :  { %v3319_v25 = vmul.f32 0.25, %v3310_v23 }
0x1ba7   :  { %v3322_v39 = vadd.f32 %v3320_v50, %v6805_v15 }
0x1ba8   :  { %v3321_v26 = vadd.f32 %v3319_v25, %v6805_v15 }
0x1ba9   :  { %v3326_v34 = vsel %vm282_vm1, %v3322_v39, -inf }
0x1baa   :  { %3327 = vmax.xlane.f32.xlu0 %v3326_v34  ;;  %v3323_v35 = vsel %vm282_vm1, %v3321_v26, -inf }
0x1bab   :  { %3324 = vmax.xlane.f32.xlu1 %v3323_v35 }
0x1c37   :  { %v3328_v36 = vpop.xlane.xlu0 %3327 }
0x1c38   :  { %v3330_v41 = vsub.f32 %v3322_v39, %v3328_v36  ;;  %v3325_v59 = vpop.xlane.xlu1 %3324 }
0x1c39   :  { %v3329_v30 = vsub.f32 %v3321_v26, %v3325_v59 }
0x1c3a   :  { %v3333_v11 = vmul.f32 1.442695, %v3330_v41 }
0x1c3b   :  { %v3331_v17 = vmul.f32 1.442695, %v3329_v30 }
0x1c3c   :  { %6470 = vpow2.f32 %v3333_v11 }
0x1c3d   :  { %6472 = vpow2.f32 %v3331_v17 }
0x1c46   :  { %v6471_v42 = vpop.eup %6470 }
0x1c47   :  { %v6473_v1 = vpop.eup %6472  ;;  %v3338_v54 = vsel %vm282_vm1, %v6471_v42, 0.0 }
0x1c48   :  { %3339 = vadd.xlane.f32.xlu1 %v3338_v54  ;;  %v3335_v15 = vsel %vm282_vm1, %v6473_v1, 0.0 }
0x1c49   :  { %3336 = vadd.xlane.f32.xlu0 %v3335_v15 }
0x1c59   :  { %6316 = vrot.lane.b32.xlu1 %v7466_v57, %s6557_s3 }
0x1c5f   :  { %6311 = vrot.lane.b32.xlu0 %v7341_v62, %s7884_s24 }
0x1cd5   :  { %v3340_v47 = vpop.xlane.xlu1 %3339 }
0x1cd6   :  { %6474 = vrcp.f32 %v3340_v47  ;;  %v3337_v48 = vpop.xlane.xlu0 %3336 }
0x1cd7   :  { %6476 = vrcp.f32 %v3337_v48 }
0x1cd9   :  { %v6317_v3 = vpop.permute.xlu1 %6316 }
0x1cda   :  { %v6312_v60 = vpop.permute.xlu0 %6311  ;;  %v6319_v6 = vunpack.i.h.bf16 %v6317_v3  ;;  %v6318_v2 = vunpack.i.l.bf16 %v6317_v3 }
0x1cdb   :  { %v6314_v38 = vunpack.i.h.bf16 %v6312_v60  ;;  %v6313_v21 = vunpack.i.l.bf16 %v6312_v60 }
0x1cdc   :  { %v6071_v16 = vpack.c.bf16 %v6319_v6, %v6318_v2 }
0x1cdd   :  { %v6067_v8 = vpack.c.bf16 %v6314_v38, %v6313_v21 }
0x1cdf   :  { %6068 = vmatprep.subr.bf16.mxu0 %v6067_v8 }
0x1ce0   :  { %v6475_v52 = vpop.eup %6474  ;;  %6070 = vmatpush3.bf16.msra.mxu0 %v6067_v8 }
0x1ce1   :  { %v6477_v51 = vpop.eup %6476  ;;  %6073 = vmatprep.subr.msk.bf16.mxu0 %vm6788_vm2, %v6071_v16  ;;  %v3344_v0 = vmul.f32 %v6475_v52, %v6471_v42 }
0x1ce2   :  { %v3343_v62 = vmul.f32 %v6477_v51, %v6473_v1 }
0x1ce4   :  { %5676 = vmatprep.mubr.msk.f32.mxu0 %vm282_vm1, %v3343_v62 }
0x1ce5   :  { %5677 = vmatmul.mubr.msk.f32.vlgmr.msra.gmra.mrb[32].mxu0 %vm282_vm1, %v3344_v0 }
0x1ce6   :  { %5683 = vmatprep.mubr.msk.f32.mxu0 %vm282_vm1, %v7462_v5 }
0x1ce9   :  { %6076 = vmatpush3.bf16.xpose.msk.msra.mxu0 %vm6788_vm2, %v6071_v16 }
0x1cf0   :  { %5684 = vmatmul.mubr.msk.f32.vlgmr.msra.gmra.mrb[34].mxu0 %vm282_vm1, %v7458_v43 }
0x1db8   :  { %v7482_v19 = vpop.f32.mrb[32].mxu0 }
0x1db9   :  { %v7484_v53 = vpop.f32.mrb[33].mxu0 }
0x1dc3   :  { %v5685_v32 = vpop.f32.mrb[34].mxu0 }
0x1dc4   :  { %v3552_v55 = vmul.f32 0.25, %v5685_v32  ;;  %v3542_v29 = vpop.f32.mrb[35].mxu0 }
0x1dc5   :  { %v3551_v56 = vmul.f32 0.25, %v3542_v29 }
0x1dc6   :  { %v3554_v46 = vadd.f32 %v3552_v55, %v6956_v49 }
0x1dc7   :  { %v3553_v28 = vadd.f32 %v3551_v56, %v6956_v49 }
0x1dc8   :  { %v3558_v58 = vsel %vm282_vm1, %v3554_v46, -inf }
0x1dc9   :  { %3559 = vmax.xlane.f32.xlu0 %v3558_v58  ;;  %v3555_v61 = vsel %vm282_vm1, %v3553_v28, -inf }
0x1dca   :  { %3556 = vmax.xlane.f32.xlu1 %v3555_v61 }
0x1e56   :  { %v3560_v63 = vpop.xlane.xlu0 %3559 }
0x1e57   :  { %v3562_v7 = vsub.f32 %v3554_v46, %v3560_v63  ;;  %v3557_v40 = vpop.xlane.xlu1 %3556 }
0x1e58   :  { %v3561_v10 = vsub.f32 %v3553_v28, %v3557_v40 }
0x1e59   :  { %v3565_v24 = vmul.f32 1.442695, %v3562_v7 }
0x1e5a   :  { %v3563_v20 = vmul.f32 1.442695, %v3561_v10 }
0x1e5b   :  { %6478 = vpow2.f32 %v3565_v24 }
0x1e5c   :  { %6480 = vpow2.f32 %v3563_v20 }
0x1e65   :  { %v6479_v50 = vpop.eup %6478 }
0x1e66   :  { %v6481_v23 = vpop.eup %6480  ;;  %v3570_v25 = vsel %vm282_vm1, %v6479_v50, 0.0 }
0x1e67   :  { %3571 = vadd.xlane.f32.xlu1 %v3570_v25  ;;  %v3567_v39 = vsel %vm282_vm1, %v6481_v23, 0.0 }
0x1e68   :  { %3568 = vadd.xlane.f32.xlu0 %v3567_v39 }
0x1e78   :  { %3658 = vrot.lane.b32.xlu1 %v7462_v5, %s6559_s1 }
0x1e7c   :  { %3660 = vrot.lane.b32.xlu1 %v7458_v43, %s6559_s1 }
0x1e7e   :  { %6321 = vrot.lane.b32.xlu0 %v7466_v57, %s6558_s23 }
0x1ef4   :  { %v3572_v26 = vpop.xlane.xlu1 %3571 }
0x1ef5   :  { %6482 = vrcp.f32 %v3572_v26  ;;  %v3569_v34 = vpop.xlane.xlu0 %3568 }
0x1ef6   :  { %6484 = vrcp.f32 %v3569_v34 }
0x1ef8   :  { %v3659_v1 = vpop.permute.xlu1 %3658 }
0x1ef9   :  { %v6322_v35 = vpop.permute.xlu0 %6321 }
0x1efa   :  { %v6324_v36 = vunpack.i.h.bf16 %v6322_v35  ;;  %v6323_v41 = vunpack.i.l.bf16 %v6322_v35 }
0x1efc   :  { %v6081_v59 = vpack.c.bf16 %v6324_v36, %v6323_v41  ;;  %v3661_v54 = vpop.permute.xlu1 %3660 }
0x1efe   :  { %6083 = vmatprep.subr.msk.bf16.mxu1 %vm6788_vm2, %v6081_v59 }
0x1eff   :  { %v6483_v30 = vpop.eup %6482 }
0x1f00   :  { %v6485_v11 = vpop.eup %6484  ;;  %v3576_v42 = vmul.f32 %v6483_v30, %v6479_v50 }
0x1f01   :  { %v3575_v17 = vmul.f32 %v6485_v11, %v6481_v23 }
0x1f03   :  { %5690 = vmatprep.mubr.msk.f32.mxu1 %vm282_vm1, %v3575_v17 }
0x1f04   :  { %5691 = vmatmul.mubr.msk.f32.vlgmr.msra.gmra.mrb[42].mxu1 %vm282_vm1, %v3576_v42 }
0x1f05   :  { %6086 = vmatpush3.bf16.xpose.msk.msra.mxu1 %vm6788_vm2, %v6081_v59  ;;  %5697 = vmatprep.mubr.msk.f32.mxu1 %vm282_vm1, %v3659_v1 }
0x1f0c   :  { %5698 = vmatmul.mubr.msk.f32.vlgmr.msra.gmra.mrb[44].mxu1 %vm282_vm1, %v3661_v54 }
0x1fd7   :  { %v7506_v15 = vpop.f32.mrb[42].mxu1 }
0x1fd8   :  { %v7508_v47 = vpop.f32.mrb[43].mxu1 }
0x1fdf   :  { %v5699_v48 = vpop.f32.mrb[44].mxu1 }
0x1fe0   :  { %v3750_v3 = vmul.f32 0.25, %v5699_v48  ;;  %v3740_v60 = vpop.f32.mrb[45].mxu1 }
0x1fe1   :  { %v3749_v6 = vmul.f32 0.25, %v3740_v60 }
0x1fe2   :  { %v3752_v2 = vadd.f32 %v3750_v3, %v6956_v49 }
0x1fe3   :  { %v3751_v38 = vadd.f32 %v3749_v6, %v6956_v49 }
0x1fe4   :  { %v3756_v21 = vsel %vm282_vm1, %v3752_v2, -inf }
0x1fe5   :  { %3757 = vmax.xlane.f32.xlu1 %v3756_v21  ;;  %v3753_v8 = vsel %vm282_vm1, %v3751_v38, -inf }
0x1fe6   :  { %3754 = vmax.xlane.f32.xlu0 %v3753_v8 }
0x1ff6   :  { %6326 = vrot.lane.b32.xlu1 %v7394_v27, %s6559_s1 }
0x1ffa   :  { %3864 = vrot.lane.b32.xlu1 %v7462_v5, %s7882_s5 }
0x1ffe   :  { %3866 = vrot.lane.b32.xlu1 %v7458_v43, %s7882_s5 }
0x2072   :  { %v3758_v16 = vpop.xlane.xlu1 %3757 }
0x2073   :  { %v3760_v52 = vsub.f32 %v3752_v2, %v3758_v16  ;;  %v3755_v51 = vpop.xlane.xlu0 %3754 }
0x2074   :  { %v3759_v62 = vsub.f32 %v3751_v38, %v3755_v51 }
0x2075   :  { %v3763_v0 = vmul.f32 1.442695, %v3760_v52 }
0x2076   :  { %v3761_v32 = vmul.f32 1.442695, %v3759_v62  ;;  %v6327_v55 = vpop.permute.xlu1 %6326 }
0x2077   :  { %6486 = vpow2.f32 %v3763_v0  ;;  %v6329_v29 = vunpack.i.h.bf16 %v6327_v55  ;;  %v6328_v56 = vunpack.i.l.bf16 %v6327_v55 }
0x2078   :  { %6488 = vpow2.f32 %v3761_v32 }
0x2079   :  { %v6087_v46 = vpack.c.bf16 %v6329_v29, %v6328_v56 }
0x207a   :  { %v3865_v34 = vpop.permute.xlu1 %3864 }
0x207b   :  { %6088 = vmatprep.subr.bf16.mxu0 %v6087_v46 }
0x207c   :  { %6090 = vmatpush3.bf16.msra.mxu0 %v6087_v46 }
0x207e   :  { %v3867_v35 = vpop.permute.xlu1 %3866 }
0x2081   :  { %v6487_v28 = vpop.eup %6486 }
0x2082   :  { %v3768_v58 = vsel %vm282_vm1, %v6487_v28, 0.0  ;;  %v6489_v61 = vpop.eup %6488 }
0x2083   :  { %3769 = vadd.xlane.f32.xlu0 %v3768_v58  ;;  %v3765_v63 = vsel %vm282_vm1, %v6489_v61, 0.0 }
0x2087   :  { %3766 = vadd.xlane.f32.xlu0 %v3765_v63 }
0x209d   :  { %6331 = vrot.lane.b32.xlu0 %v7466_v57, %s6560_s22 }
0x2110   :  { %v3770_v7 = vpop.xlane.xlu0 %3769 }
0x2111   :  { %6490 = vrcp.f32 %v3770_v7 }
0x2114   :  { %v3767_v40 = vpop.xlane.xlu0 %3766 }
0x2115   :  { %6492 = vrcp.f32 %v3767_v40 }
0x2118   :  { %v6332_v10 = vpop.permute.xlu0 %6331 }
0x2119   :  { %v6334_v24 = vunpack.i.h.bf16 %v6332_v10  ;;  %v6333_v20 = vunpack.i.l.bf16 %v6332_v10 }
0x211b   :  { %v6091_v50 = vpack.c.bf16 %v6334_v24, %v6333_v20  ;;  %v6491_v23 = vpop.eup %6490 }
0x211c   :  { %v3774_v26 = vmul.f32 %v6491_v23, %v6487_v28 }
0x211d   :  { %6093 = vmatprep.subr.msk.bf16.mxu0 %vm6788_vm2, %v6091_v50 }
0x211f   :  { %v6493_v25 = vpop.eup %6492 }
0x2120   :  { %v3773_v39 = vmul.f32 %v6493_v25, %v6489_v61 }
0x2122   :  { %5704 = vmatprep.mubr.msk.f32.mxu0 %vm282_vm1, %v3773_v39 }
0x2123   :  { %5705 = vmatmul.mubr.msk.f32.vlgmr.msra.gmra.mrb[36].mxu0 %vm282_vm1, %v3774_v26 }
0x2124   :  { %6096 = vmatpush3.bf16.xpose.msk.msra.mxu0 %vm6788_vm2, %v6091_v50  ;;  %5711 = vmatprep.mubr.msk.f32.mxu0 %vm282_vm1, %v3865_v34 }
0x212b   :  { %5712 = vmatmul.mubr.msk.f32.vlgmr.msra.gmra.mrb[38].mxu0 %vm282_vm1, %v3867_v35 }
0x21f6   :  { %v7532_v36 = vpop.f32.mrb[36].mxu0 }
0x21f7   :  { %v7534_v41 = vpop.f32.mrb[37].mxu0 }
0x21fe   :  { %v5713_v59 = vpop.f32.mrb[38].mxu0 }
0x21ff   :  { %v3956_v30 = vmul.f32 0.25, %v5713_v59  ;;  %v3946_v11 = vpop.f32.mrb[39].mxu0 }
0x2200   :  { %v3955_v17 = vmul.f32 0.25, %v3946_v11 }
0x2201   :  { %v3958_v42 = vadd.f32 %v3956_v30, %v6956_v49 }
0x2202   :  { %v3957_v1 = vadd.f32 %v3955_v17, %v6956_v49 }
0x2203   :  { %v3962_v54 = vsel %vm282_vm1, %v3958_v42, -inf }
0x2204   :  { %3963 = vmax.xlane.f32.xlu1 %v3962_v54  ;;  %v3959_v48 = vsel %vm282_vm1, %v3957_v1, -inf }
0x2205   :  { %3960 = vmax.xlane.f32.xlu0 %v3959_v48  ;;  %v5137_v48 = vld [vmem:[%s7847_s6 + $0x40] sm:$0xff] }
0x2215   :  { %6336 = vrot.lane.b32.xlu1 %v7394_v27, %s7882_s5 }
0x2219   :  { %4068 = vrot.lane.b32.xlu1 %v7462_v5, %s7884_s24 }
0x221d   :  { %4070 = vrot.lane.b32.xlu1 %v7458_v43, %s7884_s24 }
0x2291   :  { %v3964_v3 = vpop.xlane.xlu1 %3963 }
0x2292   :  { %v3966_v60 = vsub.f32 %v3958_v42, %v3964_v3  ;;  %v3961_v6 = vpop.xlane.xlu0 %3960  ;;  %v5138_v3 = vld [vmem:[%s7847_s6 + $0x48] sm:$0xff] }
0x2293   :  { %v3965_v2 = vsub.f32 %v3957_v1, %v3961_v6 }
0x2294   :  { %v3969_v38 = vmul.f32 1.442695, %v3966_v60  ;;  %v6111_v60 = vpack.c.bf16 %v5138_v3, %v5137_v48 }
0x2295   :  { %v3967_v21 = vmul.f32 1.442695, %v3965_v2  ;;  %v6337_v8 = vpop.permute.xlu1 %6336 }
0x2296   :  { %6494 = vpow2.f32 %v3969_v38  ;;  %v6339_v16 = vunpack.i.h.bf16 %v6337_v8  ;;  %v6338_v52 = vunpack.i.l.bf16 %v6337_v8 }
0x2297   :  { %6496 = vpow2.f32 %v3967_v21 }
0x2298   :  { %v6097_v51 = vpack.c.bf16 %v6339_v16, %v6338_v52 }
0x2299   :  { %v4069_v40 = vpop.permute.xlu1 %4068 }
0x229a   :  { %6098 = vmatprep.subr.bf16.mxu1 %v6097_v51 }
0x229b   :  { %6100 = vmatpush3.bf16.msra.mxu1 %v6097_v51 }
0x22a0   :  { %v6495_v62 = vpop.eup %6494 }
0x22a1   :  { %v3974_v5 = vsel %vm282_vm1, %v6495_v62, 0.0  ;;  %v6497_v0 = vpop.eup %6496 }
0x22a2   :  { %3975 = vadd.xlane.f32.xlu0 %v3974_v5  ;;  %v3971_v43 = vsel %vm282_vm1, %v6497_v0, 0.0 }
0x22a6   :  { %3972 = vadd.xlane.f32.xlu0 %v3971_v43  ;;  %v5142_v43 = vld [vmem:[%s7847_s6 + $0x68] sm:$0xff] }
0x22bc   :  { %6341 = vrot.lane.b32.xlu0 %v7466_v57, %s7883_s29  ;;  %v4071_v57 = vpop.permute.xlu1 %4070 }
0x232f   :  { %v3976_v32 = vpop.xlane.xlu0 %3975 }
0x2330   :  { %6498 = vrcp.f32 %v3976_v32 }
0x2333   :  { %v3973_v55 = vpop.xlane.xlu0 %3972 }
0x2334   :  { %6500 = vrcp.f32 %v3973_v55 }
0x2337   :  { %v6342_v29 = vpop.permute.xlu0 %6341 }
0x2338   :  { %v6344_v56 = vunpack.i.h.bf16 %v6342_v29  ;;  %v6343_v46 = vunpack.i.l.bf16 %v6342_v29  ;;  %v5143_v29 = vld [vmem:[%s7847_s6 + $0x70] sm:$0xff] }
0x233a   :  { %v6101_v28 = vpack.c.bf16 %v6344_v56, %v6343_v46  ;;  %v6499_v58 = vpop.eup %6498  ;;  %v5144_v56 = vld [vmem:[%s7847_s6 + $0x78] sm:$0xff] }
0x233b   :  { %v3980_v7 = vmul.f32 %v6499_v58, %v6495_v62 }
0x233c   :  { %6103 = vmatprep.subr.msk.bf16.mxu1 %vm6788_vm2, %v6101_v28 }
0x233e   :  { %v6501_v61 = vpop.eup %6500 }
0x233f   :  { %v3979_v63 = vmul.f32 %v6501_v61, %v6497_v0 }
0x2341   :  { %5718 = vmatprep.mubr.msk.f32.mxu1 %vm282_vm1, %v3979_v63 }
0x2342   :  { %5719 = vmatmul.mubr.msk.f32.vlgmr.msra.gmra.mrb[46].mxu1 %vm282_vm1, %v3980_v7 }
0x2343   :  { %6106 = vmatpush3.bf16.xpose.msk.msra.mxu1 %vm6788_vm2, %v6101_v28  ;;  %5725 = vmatprep.mubr.msk.f32.mxu1 %vm282_vm1, %v4069_v40  ;;  %v6123_v28 = vpack.c.bf16 %v5144_v56, %v5143_v29 }
0x234a   :  { %5726 = vmatmul.mubr.msk.f32.vlgmr.msra.gmra.mrb[48].mxu1 %vm282_vm1, %v4071_v57 }
0x2415   :  { %v5720_v10 = vpop.f32.mrb[46].mxu1 }
0x2416   :  { %v4059_v24 = vpop.f32.mrb[47].mxu1 }
0x241d   :  { %v5727_v20 = vpop.f32.mrb[48].mxu1 }
0x241e   :  { %v4160_v50 = vmul.f32 0.25, %v5727_v20  ;;  %v4150_v23 = vpop.f32.mrb[49].mxu1  ;;  %v5146_v20 = vld [vmem:[%s7848_s7 + $0x1] ss:$0 sm:$0xff] }
0x241f   :  { %v4159_v25 = vmul.f32 0.25, %v4150_v23 }
0x2420   :  { %v4162_v39 = vadd.f32 %v4160_v50, %v6956_v49 }
0x2421   :  { %v4161_v26 = vadd.f32 %v4159_v25, %v6956_v49 }
0x2422   :  { %v4166_v34 = vsel %vm282_vm1, %v4162_v39, -inf }
0x2423   :  { %4167 = vmax.xlane.f32.xlu1 %v4166_v34  ;;  %v4163_v12 = vsel %vm282_vm1, %v4161_v26, -inf }
0x2424   :  { %4164 = vmax.xlane.f32.xlu0 %v4163_v12 }
0x2434   :  { %6346 = vrot.lane.b32.xlu1 %v7394_v27, %s7884_s24 }
0x2438   :  { %3436 = vrot.lane.b32.xlu1 %v7442_v13, %s7883_s29 }
0x243c   :  { %3442 = vrot.lane.b32.xlu1 %v7448_v37, %s6560_s22 }
0x2440   :  { %3450 = vrot.lane.b32.xlu1 %v7484_v53, %s6558_s23 }
0x2444   :  { %4274 = vrot.lane.b32.xlu1 %v7534_v41, %s7883_s29 }
0x2448   :  { %4282 = vrot.lane.b32.xlu1 %v4059_v24, %s6560_s22 }
0x24b0   :  { %v4168_v49 = vpop.xlane.xlu1 %4167 }
0x24b1   :  { %v4170_v35 = vsub.f32 %v4162_v39, %v4168_v49  ;;  %v4165_v59 = vpop.xlane.xlu0 %4164 }
0x24b2   :  { %v4169_v30 = vsub.f32 %v4161_v26, %v4165_v59 }
0x24b3   :  { %v4173_v11 = vmul.f32 1.442695, %v4170_v35 }
0x24b4   :  { %v4171_v27 = vmul.f32 1.442695, %v4169_v30  ;;  %v6347_v17 = vpop.permute.xlu1 %6346 }
0x24b5   :  { %v6349_v42 = vunpack.i.h.bf16 %v6347_v17  ;;  %v6348_v13 = vunpack.i.l.bf16 %v6347_v17 }
0x24b6   :  { %6502 = vpow2.f32 %v4171_v27 }
0x24b7   :  { %v6107_v1 = vpack.c.bf16 %v6349_v42, %v6348_v13  ;;  %6504 = vpow2.f32 %v4173_v11 }
0x24b8   :  { %v3437_v2 = vpop.permute.xlu1 %3436 }
0x24b9   :  { %6108 = vmatprep.subr.bf16.mxu0 %v6107_v1  ;;  %v3457_v61 = vsel %vm282_vm1, %v7438_v14, %v3437_v2 }
0x24ba   :  { %6110 = vmatpush3.bf16.msra.mxu0 %v6107_v1 }
0x24bb   :  { %6112 = vmatprep.subr.bf16.mxu0 %v6111_v60 }
0x24bc   :  { %v3443_v8 = vpop.permute.xlu1 %3442 }
0x24c0   :  { %v6503_v37 = vpop.eup %6502  ;;  %v3451_v0 = vpop.permute.xlu1 %3450 }
0x24c1   :  { %v4175_v53 = vsel %vm282_vm1, %v6503_v37, 0.0  ;;  %v6505_v41 = vpop.eup %6504 }
0x24c2   :  { %4176 = vadd.xlane.f32.xlu0 %v4175_v53  ;;  %v4178_v54 = vsel %vm282_vm1, %v6505_v41, 0.0 }
0x24c4   :  { %v4275_v12 = vpop.permute.xlu1 %4274 }
0x24c5   :  { %v4296_v59 = vsel %vm282_vm1, %v7508_v47, %v4275_v12 }
0x24c6   :  { %4179 = vadd.xlane.f32.xlu0 %v4178_v54 }
0x24c8   :  { %v4283_v35 = vpop.permute.xlu1 %4282 }
0x24c9   :  { %v4298_v11 = vsel %vm1117_vm3, %v4296_v59, %v4283_v35 }
0x24dc   :  { %3434 = vrot.lane.b32.xlu0 %v7444_v18, %s7883_s29 }
0x24e0   :  { %3444 = vrot.lane.b32.xlu0 %v7446_v31, %s6560_s22 }
0x24e4   :  { %3452 = vrot.lane.b32.xlu0 %v7482_v19, %s6558_s23  ;;  %v5139_v19 = vld [vmem:[%s7847_s6 + $0x50] sm:$0xff] }
0x24e8   :  { %4276 = vrot.lane.b32.xlu0 %v7532_v36, %s7883_s29  ;;  %v5140_v36 = vld [vmem:[%s7847_s6 + $0x58] sm:$0xff] }
0x24e9   :  { %v6115_v5 = vpack.c.bf16 %v5140_v36, %v5139_v19  ;;  %v5157_v19 = vld [vmem:[%s7851_s10 + $0x50] sm:$0xff]  ;;  %v5158_v36 = vld [vmem:[%s7851_s10 + $0x58] sm:$0xff] }
0x24ec   :  { %4284 = vrot.lane.b32.xlu0 %v5720_v10, %s6560_s22 }
0x254f   :  { %v4177_v18 = vpop.xlane.xlu0 %4176 }
0x2550   :  { %6506 = vrcp.f32 %v4177_v18 }
0x2553   :  { %v4180_v6 = vpop.xlane.xlu0 %4179 }
0x2554   :  { %6508 = vrcp.f32 %v4180_v6 }
0x2557   :  { %v3435_v38 = vpop.permute.xlu0 %3434 }
0x2558   :  { %v3456_v31 = vsel %vm282_vm1, %v7440_v22, %v3435_v38  ;;  %v5141_v22 = vld [vmem:[%s7847_s6 + $0x60] sm:$0xff] }
0x2559   :  { %v3458_v51 = vsel %vm1117_vm3, %v3456_v31, %v3443_v8  ;;  %v6119_v55 = vpack.c.bf16 %v5142_v43, %v5141_v22  ;;  %v5162_v22 = vld [vmem:[%s7851_s10 + $0x78] sm:$0xff] }
0x255a   :  { %v6507_v21 = vpop.eup %6506  ;;  %v3460_v32 = vsel %vm1120_vm4, %v3458_v51, %v3451_v0  ;;  %v5159_v51 = vld [vmem:[%s7851_s10 + $0x60] sm:$0xff]  ;;  %v5161_v0 = vld [vmem:[%s7851_s10 + $0x70] sm:$0xff] }
0x255b   :  { %v4183_v16 = vmul.f32 %v6507_v21, %v6503_v37  ;;  %v3445_v46 = vpop.permute.xlu0 %3444  ;;  %v6139_v43 = vpack.c.bf16 %v5162_v22, %v5161_v0 }
0x255c   :  { %v3459_v63 = vsel %vm1117_vm3, %v3457_v61, %v3445_v46 }
0x255d   :  { %5732 = vmatprep.mubr.msk.f32.mxu0 %vm282_vm1, %v4183_v16 }
0x255e   :  { %v6509_v52 = vpop.eup %6508 }
0x255f   :  { %v4184_v62 = vmul.f32 %v6509_v52, %v6505_v41  ;;  %v3453_v58 = vpop.permute.xlu0 %3452  ;;  %v6131_v52 = vpack.c.bf16 %v5158_v36, %v5157_v19 }
0x2560   :  { %v3461_v7 = vsel %vm1120_vm4, %v3459_v63, %v3453_v58 }
0x2561   :  { %5733 = vmatmul.mubr.msk.f32.vlgmr.msra.gmra.mrb[40].mxu0 %vm282_vm1, %v4184_v62  ;;  %v5160_v62 = vld [vmem:[%s7851_s10 + $0x68] sm:$0xff] }
0x2562   :  { %6114 = vmatpush3.bf16.msra.mxu0 %v6111_v60  ;;  %5751 = vmatprep.mubr.msk.f32.mxu0 %vm72_vm0, %v3460_v32 }
0x2563   :  { %6116 = vmatprep.subr.bf16.mxu0 %v6115_v5  ;;  %v4277_v34 = vpop.permute.xlu0 %4276 }
0x2566   :  { %6118 = vmatpush3.bf16.msra.mxu0 %v6115_v5  ;;  %v6135_v5 = vpack.c.bf16 %v5160_v62, %v5159_v51 }
0x2567   :  { %6120 = vmatprep.subr.bf16.mxu0 %v6119_v55  ;;  %v4285_v49 = vpop.permute.xlu0 %4284 }
0x256a   :  { %6122 = vmatpush3.bf16.msra.mxu0 %v6119_v55 }
0x256b   :  { %6124 = vmatprep.subr.bf16.mxu0 %v6123_v28 }
0x256e   :  { %6126 = vmatpush3.bf16.msra.mxu0 %v6123_v28 }
0x2571   :  { %5752 = vmatmul.mubr.msk.f32.vlgmr.msra.gmra.mrb[42].mxu0 %vm72_vm0, %v3461_v7 }
0x2634   :  { %v5734_v40 = vpop.f32.mrb[40].mxu0 }
0x2635   :  { %4292 = vrot.lane.b32.xlu0 %v5734_v40, %s6558_s23  ;;  %v4263_v57 = vpop.f32.mrb[41].mxu0 }
0x2636   :  { %4290 = vrot.lane.b32.xlu1 %v4263_v57, %s6558_s23 }
0x2644   :  { %v5753_v10 = vpop.f32.mrb[42].mxu0 }
0x2645   :  { %v4397_v24 = vpop.f32.mrb[43].mxu0  ;;  %v4403_v14 = vadd.f32 %v5753_v10, %v5146_v20 }
0x2646   :  { %v4398_v23 = vadd.f32 %v5146_v20, %v4397_v24 }
0x2647   :  { %v4417_v50 = vadd.f32 %v4403_v14, %v7313_v9  ;;  %v4297_v9 = vsel %vm282_vm1, %v7506_v15, %v4277_v34  ;;  %v5154_v34 = vld [vmem:[%s7850_s9 + $0x1] ss:$0 sm:$0xff] }
0x2648   :  { %v4416_v39 = vadd.f32 %v4398_v23, %v7308_v44  ;;  %v4299_v17 = vsel %vm1117_vm3, %v4297_v9, %v4285_v49  ;;  %v7682_v23 = vld [vmem:[%s7849_s8 + $0x1] ss:$0 sm:$0xff] }
0x2649   :  { %v4427_v25 = vsel %vm72_vm0, %v4417_v50, 0.0 }
0x264a   :  { %v4424_v26 = vsel %vm72_vm0, %v4416_v39, 0.0 }
0x2654   :  { %4428 = vadd.xlane.f32.xlu0 %v4427_v25 }
0x265a   :  { %4425 = vadd.xlane.f32.xlu1 %v4424_v26 }
0x26a7   :  { %v4293_v30 = vpop.permute.xlu0 %4292 }
0x26a8   :  { %v4291_v27 = vpop.permute.xlu1 %4290  ;;  %v4301_v42 = vsel %vm1120_vm4, %v4299_v17, %v4293_v30  ;;  %v5169_v30 = vld [vmem:[%s7853_s12 + $0x80] sm:$0xff]  ;;  %v5172_v17 = vld [vmem:[%s7853_s12 + $0x98] sm:$0xff] }
0x26a9   :  { %v4300_v44 = vsel %vm1120_vm4, %v4298_v11, %v4291_v27  ;;  %v5170_v11 = vld [vmem:[%s7853_s12 + $0x88] sm:$0xff]  ;;  %v5171_v27 = vld [vmem:[%s7853_s12 + $0x90] sm:$0xff] }
0x26aa   :  { %5754 = vmatprep.mubr.msk.f32.mxu0 %vm72_vm0, %v4300_v44  ;;  %v6143_v9 = vpack.c.bf16 %v5170_v11, %v5169_v30  ;;  %v6147_v44 = vpack.c.bf16 %v5172_v17, %v5171_v27 }
0x26ab   :  { %5755 = vmatmul.mubr.msk.f32.gmra.mrb[44].mxu0 %vm72_vm0, %v4301_v42  ;;  %v5173_v42 = vld [vmem:[%s7853_s12 + $0xa0] sm:$0xff] }
0x26ac   :  { %6144 = vmatprep.subr.bf16.mxu0 %v6143_v9 }
0x26ad   :  { %6146 = vmatpush3.bf16.msra.mxu0 %v6143_v9 }
0x26ae   :  { %6148 = vmatprep.subr.bf16.mxu0 %v6147_v44 }
0x26b1   :  { %6150 = vmatpush3.bf16.msra.mxu0 %v6147_v44 }
0x26e1   :  { %v4429_v13 = vpop.xlane.xlu0 %4428 }
0x26e2   :  { %v4437_v47 = vmul.f32 0.015625, %v4429_v13  ;;  %v5174_v13 = vld [vmem:[%s7853_s12 + $0xa8] sm:$0xff] }
0x26e4   :  { %v4441_v41 = vsub.f32 %v4417_v50, %v4437_v47  ;;  %v5175_v47 = vld [vmem:[%s7853_s12 + $0xb0] sm:$0xff] }
0x26e6   :  { %v4445_v2 = vmul.f32 %v4441_v41, %v4441_v41 }
0x26e7   :  { %v4426_v1 = vpop.xlane.xlu1 %4425 }
0x26e8   :  { %v4436_v37 = vmul.f32 0.015625, %v4426_v1  ;;  %v4451_v8 = vsel %vm72_vm0, %v4445_v2, 0.0  ;;  %v6151_v1 = vpack.c.bf16 %v5174_v13, %v5173_v42 }
0x26ea   :  { %v4440_v15 = vsub.f32 %v4416_v39, %v4436_v37  ;;  %6152 = vmatprep.subr.bf16.mxu0 %v6151_v1  ;;  %v5176_v37 = vld [vmem:[%s7853_s12 + $0xb8] sm:$0xff] }
0x26eb   :  { %6154 = vmatpush3.bf16.msra.mxu0 %v6151_v1 }
0x26ec   :  { %v4444_v21 = vmul.f32 %v4440_v15, %v4440_v15 }
0x26ee   :  { %v4448_v31 = vsel %vm72_vm0, %v4444_v21, 0.0  ;;  %v5184_v21 = vld [vmem:[%s7853_s12 + $0xf8] sm:$0xff] }
0x277e   :  { %v5756_v53 = vpop.f32.mrb[44].mxu0 }
0x277f   :  { %v4413_v54 = vadd.f32 %v5756_v53, %v5146_v20  ;;  %v4407_v48 = vpop.f32.mrb[45].mxu0  ;;  %v6155_v53 = vpack.c.bf16 %v5176_v37, %v5175_v47 }
0x2780   :  { %v4408_v3 = vadd.f32 %v5146_v20, %v4407_v48 }
0x2781   :  { %v4419_v60 = vadd.f32 %v4413_v54, %v7362_v45  ;;  %v5155_v45 = vld [vmem:[%s7851_s10 + $0x40] sm:$0xff]  ;;  %6156 = vmatprep.subr.bf16.mxu0 %v6155_v53  ;;  %v5178_v54 = vld [vmem:[%s7853_s12 + $0xc8] sm:$0xff] }
0x2782   :  { %v4418_v18 = vadd.f32 %v4408_v3, %v7357_v4  ;;  %v5156_v4 = vld [vmem:[%s7851_s10 + $0x48] sm:$0xff]  ;;  %6158 = vmatpush3.bf16.msra.mxu0 %v6155_v53  ;;  %v5180_v3 = vld [vmem:[%s7853_s12 + $0xd8] sm:$0xff] }
0x2783   :  { %v4433_v6 = vsel %vm72_vm0, %v4419_v60, 0.0  ;;  %v6127_v16 = vpack.c.bf16 %v5156_v4, %v5155_v45 }
0x2784   :  { %4434 = vadd.xlane.f32.xlu1 %v4433_v6  ;;  %v4430_v38 = vsel %vm72_vm0, %v4418_v18, 0.0  ;;  %v5182_v6 = vld [vmem:[%s7853_s12 + $0xe8] sm:$0xff] }
0x2785   :  { %4431 = vadd.xlane.f32.xlu0 %v4430_v38  ;;  %6128 = vmatprep.subr.bf16.mxu1 %v6127_v16  ;;  %v5183_v38 = vld [vmem:[%s7853_s12 + $0xf0] sm:$0xff] }
0x2786   :  { %6130 = vmatpush3.bf16.msra.mxu1 %v6127_v16 }
0x2787   :  { %6132 = vmatprep.subr.bf16.mxu1 %v6131_v52 }
0x2788   :  { %4452 = vadd.xlane.f32.xlu1 %v4451_v8  ;;  %v6171_v8 = vpack.c.bf16 %v5184_v21, %v5183_v38  ;;  %v5186_v38 = vld [vmem:[%s7854_s13 + $0x1] ss:$0 sm:$0xff] }
0x2789   :  { %4449 = vadd.xlane.f32.xlu0 %v4448_v31 }
0x278a   :  { %6134 = vmatpush3.bf16.msra.mxu1 %v6131_v52 }
0x278b   :  { %6136 = vmatprep.subr.bf16.mxu1 %v6135_v5 }
0x278e   :  { %6138 = vmatpush3.bf16.msra.mxu1 %v6135_v5 }
0x278f   :  { %6140 = vmatprep.subr.bf16.mxu1 %v6139_v43 }
0x2792   :  { %6142 = vmatpush3.bf16.msra.mxu1 %v6139_v43 }
0x2811   :  { %v4435_v32 = vpop.xlane.xlu1 %4434 }
0x2812   :  { %v4439_v55 = vmul.f32 0.015625, %v4435_v32  ;;  %v4432_v29 = vpop.xlane.xlu0 %4431 }
0x2813   :  { %v4438_v56 = vmul.f32 0.015625, %v4432_v29 }
0x2814   :  { %v7669_v46 = vsub.f32 %v4419_v60, %v4439_v55  ;;  %v5164_v55 = vld [vmem:[%s7852_s11 + $0x1] ss:$0 sm:$0xff] }
0x2815   :  { %v7671_v28 = vsub.f32 %v4418_v18, %v4438_v56  ;;  %v4453_v58 = vpop.xlane.xlu1 %4452  ;;  %v5181_v18 = vld [vmem:[%s7853_s12 + $0xe0] sm:$0xff] }
0x2816   :  { %v4461_v61 = vmul.f32 0.015625, %v4453_v58  ;;  %v4450_v63 = vpop.xlane.xlu0 %4449  ;;  %v4447_v7 = vmul.f32 %v7669_v46, %v7669_v46  ;;  %v6167_v2 = vpack.c.bf16 %v5182_v6, %v5181_v18 }
0x2817   :  { %v4460_v40 = vmul.f32 0.015625, %v4450_v63  ;;  %v4446_v57 = vmul.f32 %v7671_v28, %v7671_v28 }
0x2818   :  { %v4465_v10 = vadd.f32 1e-12, %v4461_v61  ;;  %v4457_v24 = vsel %vm72_vm0, %v4447_v7, 0.0 }
0x2819   :  { %v4464_v20 = vadd.f32 1e-12, %v4460_v40  ;;  %4458 = vadd.xlane.f32.xlu1 %v4457_v24  ;;  %v4454_v14 = vsel %vm72_vm0, %v4446_v57, 0.0 }
0x281a   :  { %6510 = vrsqrt.f32 %v4465_v10  ;;  %4455 = vadd.xlane.f32.xlu0 %v4454_v14 }
0x281b   :  { %6512 = vrsqrt.f32 %v4464_v20 }
0x2824   :  { %v6511_v50 = vpop.eup %6510 }
0x2825   :  { %v6513_v25 = vpop.eup %6512  ;;  %v4473_v39 = vmul.f32 %v6511_v50, %v4441_v41  ;;  %v5177_v41 = vld [vmem:[%s7853_s12 + $0xc0] sm:$0xff] }
0x2826   :  { %v4472_v26 = vmul.f32 %v6513_v25, %v4440_v15  ;;  %v6159_v48 = vpack.c.bf16 %v5178_v54, %v5177_v41  ;;  %v5179_v15 = vld [vmem:[%s7853_s12 + $0xd0] sm:$0xff] }
0x2827   :  { %v4483_v12 = vmul.f32 %v7682_v23, %v4473_v39  ;;  %v6163_v60 = vpack.c.bf16 %v5180_v3, %v5179_v15 }
0x2828   :  { %v4482_v49 = vmul.f32 %v7682_v23, %v4472_v26  ;;  %6160 = vmatprep.subr.bf16.mxu0 %v6159_v48 }
0x2829   :  { %v4493_v59 = vadd.f32 %v5154_v34, %v4483_v12  ;;  %6162 = vmatpush3.bf16.msra.mxu0 %v6159_v48 }
0x282a   :  { %v7689_v35 = vadd.f32 %v5154_v34, %v4482_v49  ;;  %6164 = vmatprep.subr.bf16.mxu0 %v6163_v60 }
0x282c   :  { %5773 = vmatprep.mubr.msk.f32.mxu1 %vm72_vm0, %v7689_v35 }
0x282d   :  { %5774 = vmatmul.mubr.msk.f32.vlgmr.msra.gmra.mrb[50].mxu1 %vm72_vm0, %v4493_v59  ;;  %6166 = vmatpush3.bf16.msra.mxu0 %v6163_v60 }
0x282e   :  { %6168 = vmatprep.subr.bf16.mxu0 %v6167_v2 }
0x2831   :  { %6170 = vmatpush3.bf16.msra.mxu0 %v6167_v2 }
0x2832   :  { %6172 = vmatprep.subr.bf16.mxu0 %v6171_v8 }
0x2835   :  { %6174 = vmatpush3.bf16.msra.mxu0 %v6171_v8 }
0x28a6   :  { %v4459_v31 = vpop.xlane.xlu1 %4458 }
0x28a7   :  { %v4463_v45 = vmul.f32 0.015625, %v4459_v31  ;;  %v4456_v4 = vpop.xlane.xlu0 %4455 }
0x28a8   :  { %v4462_v16 = vmul.f32 0.015625, %v4456_v4 }
0x28a9   :  { %v4467_v19 = vadd.f32 1e-12, %v4463_v45 }
0x28aa   :  { %v4466_v36 = vadd.f32 1e-12, %v4462_v16 }
0x28ab   :  { %6514 = vrsqrt.f32 %v4467_v19 }
0x28ac   :  { %6516 = vrsqrt.f32 %v4466_v36 }
0x28b5   :  { %v6515_v52 = vpop.eup %6514 }
0x28b6   :  { %v6517_v51 = vpop.eup %6516  ;;  %v4475_v62 = vmul.f32 %v6515_v52, %v7669_v46 }
0x28b7   :  { %v4474_v5 = vmul.f32 %v6517_v51, %v7671_v28 }
0x28b8   :  { %v4485_v0 = vmul.f32 %v7682_v23, %v4475_v62 }
0x28b9   :  { %v4484_v22 = vmul.f32 %v7682_v23, %v4474_v5 }
0x28ba   :  { %v4495_v32 = vadd.f32 %v5154_v34, %v4485_v0 }
0x28bb   :  { %v7746_v43 = vadd.f32 %v5154_v34, %v4484_v22 }
0x28bd   :  { %5776 = vmatprep.mubr.msk.f32.mxu1 %vm72_vm0, %v7746_v43 }
0x28be   :  { %5777 = vmatmul.mubr.msk.f32.gmra.mrb[52].mxu1 %vm72_vm0, %v4495_v32 }
0x28bf   :  { %5833 = vmatprep.mubr.msk.f32.mxu1 %vm6565_vm5, %v6556_v33 }
0x2900   :  { %v5775_v29 = vpop.f32.mrb[50].mxu1 }
0x2901   :  { %v4597_v56 = vadd.f32 %v5775_v29, %v5164_v55  ;;  %v4591_v46 = vpop.f32.mrb[51].mxu1 }
0x2902   :  { %v4592_v28 = vadd.f32 %v5164_v55, %v4591_v46 }
0x2903   :  { %v4611_v58 = vmul.f32 %v4597_v56, %v4597_v56 }
0x2904   :  { %v4610_v61 = vmul.f32 %v4592_v28, %v4592_v28 }
0x2905   :  { %v4615_v63 = vmul.f32 %v4611_v58, %v4597_v56 }
0x2906   :  { %v4614_v7 = vmul.f32 %v4610_v61, %v4592_v28  ;;  %v6564_v61 = vmov 0.0|0.0  }
0x2907   :  { %v4619_v40 = vmul.f32 0.044715, %v4615_v63  ;;  %6175 = vmatprep.subr.bf16.mxu1 %v6564_v61  ;;  %v4809_v63 = vld [vmem:[%s7857_s16 + $0x10] sm:$0xff] }
0x2908   :  { %v4618_v57 = vmul.f32 0.044715, %v4614_v7  ;;  %v4810_v7 = vld [vmem:[%s7857_s16 + $0x18] sm:$0xff] }
0x2909   :  { %v4623_v10 = vadd.f32 %v4619_v40, %v4597_v56  ;;  %v6179_v40 = vpack.c.bf16 %v4810_v7, %v4809_v63 }
0x290a   :  { %v4622_v24 = vadd.f32 %v4618_v57, %v4592_v28  ;;  %v4811_v57 = vld [vmem:[%s7857_s16 + $0x20] sm:$0xff] }
0x290b   :  { %v4627_v20 = vmul.f32 0.7978846, %v4623_v10  ;;  %v4812_v10 = vld [vmem:[%s7857_s16 + $0x28] sm:$0xff] }
0x290c   :  { %v4626_v14 = vmul.f32 0.7978846, %v4622_v24  ;;  %v6182_v24 = vpack.c.bf16 %v4812_v10, %v4811_v57 }
0x290d   :  { %6518 = vtanh.f32 %v4627_v20  ;;  %v4813_v20 = vld [vmem:[%s7857_s16 + $0x30] sm:$0xff] }
0x290e   :  { %6520 = vtanh.f32 %v4626_v14  ;;  %v4814_v14 = vld [vmem:[%s7857_s16 + $0x38] sm:$0xff] }
0x2917   :  { %v6519_v50 = vpop.eup %6518 }
0x2918   :  { %v6521_v23 = vpop.eup %6520  ;;  %v4635_v25 = vadd.f32 1.0, %v6519_v50  ;;  %v6185_v50 = vpack.c.bf16 %v4814_v14, %v4813_v20 }
0x2919   :  { %v4634_v39 = vadd.f32 1.0, %v6521_v23 }
0x291a   :  { %v4639_v26 = vmul.f32 0.5, %v4635_v25 }
0x291b   :  { %v4638_v34 = vmul.f32 0.5, %v4634_v39 }
0x291c   :  { %v4643_v49 = vmul.f32 %v4639_v26, %v4597_v56 }
0x291d   :  { %v4642_v12 = vmul.f32 %v4638_v34, %v4592_v28  ;;  %v4808_v28 = vld [vmem:[%s7857_s16 + $0x8] sm:$0xff] }
0x291f   :  { %5811 = vmatprep.mubr.f32.mxu0 %v4642_v12 }
0x2920   :  { %5812 = vmatmul.mubr.f32.vlgmr.msra.gmra.mrb[46].mxu0 %v4643_v49 }
0x2991   :  { %v5778_v59 = vpop.f32.mrb[52].mxu1 }
0x2992   :  { %v4607_v30 = vadd.f32 %v5778_v59, %v5164_v55  ;;  %v4601_v11 = vpop.f32.mrb[53].mxu1 }
0x2993   :  { %v4602_v9 = vadd.f32 %v5164_v55, %v4601_v11  ;;  %v5189_v11 = vld [vmem:[%s7855_s14 + $0x1] ss:$0 sm:$0xff] }
0x2994   :  { %v4613_v27 = vmul.f32 %v4607_v30, %v4607_v30 }
0x2995   :  { %v4612_v17 = vmul.f32 %v4602_v9, %v4602_v9 }
0x2996   :  { %v4617_v44 = vmul.f32 %v4613_v27, %v4607_v30 }
0x2997   :  { %v4616_v42 = vmul.f32 %v4612_v17, %v4602_v9 }
0x2998   :  { %v4621_v13 = vmul.f32 0.044715, %v4617_v44  ;;  %v5190_v44 = vld [vmem:[%s7856_s15 + $0x1] ss:$0 sm:$0xff] }
0x2999   :  { %v4620_v1 = vmul.f32 0.044715, %v4616_v42  ;;  %v4896_v42 = vld [vmem:[%s7859_s18] sm:$0xff] }
0x299a   :  { %v4625_v47 = vadd.f32 %v4621_v13, %v4607_v30  ;;  %v4897_v13 = vld [vmem:[%s7859_s18 + $0x8] sm:$0xff] }
0x299b   :  { %v4624_v37 = vadd.f32 %v4620_v1, %v4602_v9 }
0x299c   :  { %v4629_v53 = vmul.f32 0.7978846, %v4625_v47 }
0x299d   :  { %v4628_v41 = vmul.f32 0.7978846, %v4624_v37 }
0x299e   :  { %6522 = vtanh.f32 %v4629_v53  ;;  %v6188_v53 = vpack.c.bf16 %v4897_v13, %v4896_v42 }
0x299f   :  { %6524 = vtanh.f32 %v4628_v41 }
0x29a8   :  { %v6523_v54 = vpop.eup %6522 }
0x29a9   :  { %v6525_v48 = vpop.eup %6524  ;;  %v4637_v15 = vadd.f32 1.0, %v6523_v54  ;;  %v4898_v54 = vld [vmem:[%s7859_s18 + $0x10] sm:$0xff] }
0x29aa   :  { %v4636_v3 = vadd.f32 1.0, %v6525_v48  ;;  %v4899_v48 = vld [vmem:[%s7859_s18 + $0x18] sm:$0xff] }
0x29ab   :  { %v4641_v60 = vmul.f32 0.5, %v4637_v15  ;;  %v6191_v15 = vpack.c.bf16 %v4899_v48, %v4898_v54 }
0x29ac   :  { %v4640_v18 = vmul.f32 0.5, %v4636_v3  ;;  %v4900_v3 = vld [vmem:[%s7859_s18 + $0x20] sm:$0xff] }
0x29ad   :  { %v4645_v2 = vmul.f32 %v4641_v60, %v4607_v30  ;;  %v4901_v60 = vld [vmem:[%s7859_s18 + $0x28] sm:$0xff] }
0x29ae   :  { %v4644_v6 = vmul.f32 %v4640_v18, %v4602_v9  ;;  %v4902_v18 = vld [vmem:[%s7859_s18 + $0x30] sm:$0xff] }
0x29b0   :  { %5814 = vmatprep.mubr.f32.mxu0 %v4644_v6  ;;  %v4903_v6 = vld [vmem:[%s7859_s18 + $0x38] sm:$0xff]  ;;  %s6566_s18 = smov [#allocation2]  }
0x29b1   :  { %5815 = vmatmul.mubr.f32.gmra.mrb[48].mxu0 %v4645_v2  ;;  %v6197_v2 = vpack.c.bf16 %v4903_v6, %v4902_v18  ;;  %s4991_s9 = sshll.u32 %s6566_s18, 4  ;;  %s4992_s9 = int_to_ptr.vmem [resolvable:$true] %s4991_s9 }
0x29b2   :  { %s6532_s0 = scalar_lea.vmem %s4992_s9, 32  ;;  %p6537_p1 = scmp.lt.s32.totalorder %s4992_s9, %s4992_s9 }
0x29b3   :  { %p6533_p0 = scmp.ne.s32.totalorder %s4992_s9, %s6532_s0  ;;  %p6538_p2 = scmp.lt.s32.totalorder %s6532_s0, %s6532_s0 }
0x29b5   :  { %p6539_p3 = por %p6538_p2, %p6537_p1 }
0x29b7   :  { %p6540_p4 = pnand %p6539_p3, %p6533_p0 }
0x29f3   :  { %v5813_v21 = vpop.f32.mrb[46].mxu0 }
0x29f4   :  { %v4737_v8 = vpop.f32.mrb[47].mxu0 }
0x29f5   :  { %v4738_v31 = vadd.f32 %v5186_v38, %v4737_v8 }
0x29f7   :  { %v4754_v45 = vadd.f32 %v4738_v31, %v7689_v35 }
0x29f9   :  { %v4760_v4 = vsel %vm72_vm0, %v4754_v45, 0.0 }
0x29fa   :  { %4761 = vadd.xlane.f32.xlu1 %v4760_v4  ;;  %v5193_v4 = vld [vmem:[%s7860_s19] ss:$0 sm:$0xff] }
0x2a84   :  { %v5816_v16 = vpop.f32.mrb[48].mxu0 }
0x2a85   :  { %v4746_v19 = vpop.f32.mrb[49].mxu0 }
0x2a86   :  { %v4747_v36 = vadd.f32 %v5186_v38, %v4746_v19  ;;  %v5191_v38 = vld [vmem:[%s7858_s17] ss:$0 sm:$0xff] }
0x2a87   :  { %v4762_v52 = vpop.xlane.xlu1 %4761 }
0x2a88   :  { %v4755_v51 = vadd.f32 %v4747_v36, %v7746_v43  ;;  %v4766_v62 = vmul.f32 0.015625, %v4762_v52  ;;  %v4807_v43 = vld [vmem:[%s7857_s16] sm:$0xff] }
0x2a89   :  { %v6176_v58 = vpack.c.bf16 %v4808_v28, %v4807_v43 }
0x2a8a   :  { %v4768_v5 = vsub.f32 %v4754_v45, %v4766_v62  ;;  %v4763_v0 = vsel %vm72_vm0, %v4755_v51, 0.0 }
0x2a8b   :  { %4764 = vadd.xlane.f32.xlu0 %v4763_v0  ;;  %6177 = vmatpush3.bf16.msra.mxu1 %v6176_v58 }
0x2a8c   :  { %v4770_v22 = vmul.f32 %v4768_v5, %v4768_v5  ;;  %6178 = vmatprep.subr.bf16.mxu1 %v6564_v61 }
0x2a8e   :  { %v4772_v32 = vsel %vm72_vm0, %v4770_v22, 0.0 }
0x2a8f   :  { %4773 = vadd.xlane.f32.xlu1 %v4772_v32  ;;  %6180 = vmatpush3.bf16.msra.mxu1 %v6179_v40 }
0x2a90   :  { %6181 = vmatprep.subr.bf16.mxu1 %v6564_v61 }
0x2a93   :  { %6183 = vmatpush3.bf16.msra.mxu1 %v6182_v24 }
0x2a94   :  { %6184 = vmatprep.subr.bf16.mxu1 %v6564_v61 }
0x2a97   :  { %6186 = vmatpush3.bf16.msra.mxu1 %v6185_v50 }
0x2a98   :  { %6187 = vmatprep.subr.bf16.mxu1 %v6564_v61 }
0x2b18   :  { %v4765_v55 = vpop.xlane.xlu0 %4764 }
0x2b19   :  { %v4767_v35 = vmul.f32 0.015625, %v4765_v55 }
0x2b1b   :  { %v4769_v29 = vsub.f32 %v4755_v51, %v4767_v35 }
0x2b1c   :  { %v4774_v23 = vpop.xlane.xlu1 %4773 }
0x2b1d   :  { %v4771_v56 = vmul.f32 %v4769_v29, %v4769_v29  ;;  %v4778_v25 = vmul.f32 0.015625, %v4774_v23 }
0x2b1f   :  { %v4775_v46 = vsel %vm72_vm0, %v4771_v56, 0.0  ;;  %v4780_v39 = vadd.f32 1e-12, %v4778_v25 }
0x2b20   :  { %4776 = vadd.xlane.f32.xlu0 %v4775_v46 }
0x2b21   :  { %6526 = vrsqrt.f32 %v4780_v39 }
0x2b2b   :  { %v6527_v49 = vpop.eup %6526 }
0x2b2c   :  { %v4784_v59 = vmul.f32 %v6527_v49, %v4768_v5 }
0x2b2e   :  { %v4792_v27 = vmul.f32 %v5189_v11, %v4784_v59 }
0x2b30   :  { %v4800_v47 = vadd.f32 %v5190_v44, %v4792_v27 }
0x2bad   :  { %v4777_v26 = vpop.xlane.xlu0 %4776 }
0x2bae   :  { %v4779_v34 = vmul.f32 0.015625, %v4777_v26 }
0x2bb0   :  { %v4781_v12 = vadd.f32 1e-12, %v4779_v34 }
0x2bb2   :  { %6528 = vrsqrt.f32 %v4781_v12 }
0x2bbc   :  { %v6529_v30 = vpop.eup %6528 }
0x2bbd   :  { %v4785_v9 = vmul.f32 %v6529_v30, %v4769_v29 }
0x2bbf   :  { %v4793_v17 = vmul.f32 %v5189_v11, %v4785_v9 }
0x2bc1   :  { %v4801_v1 = vadd.f32 %v5190_v44, %v4793_v17 }
0x2bc3   :  { %v4803_v37 = vrot.slane %v4801_v1, 7 }
0x2bc5   :  { %v4806_v41 = vsel %vm4805_vm6, %v4800_v47, %v4803_v37 }
0x2bc6   :  { %5834 = vmatmul.mubr.msk.f32.vlgmr.msra.gmra.mrb[54].mxu1 %vm72_vm0, %v4806_v41 }
0x2bc7   :  { %6189 = vmatpush3.bf16.msra.mxu1 %v6188_v53  ;;  %5852 = vmatprep.mubr.msk.f32.mxu1 %vm6565_vm5, %v6556_v33  ;;  %v6194_v33 = vpack.c.bf16 %v4901_v60, %v4900_v3 }
0x2bc8   :  { %6190 = vmatprep.subr.bf16.mxu1 %v6564_v61 }
0x2bcb   :  { %6192 = vmatpush3.bf16.msra.mxu1 %v6191_v15 }
0x2bcc   :  { %6193 = vmatprep.subr.bf16.mxu1 %v6564_v61 }
0x2bcf   :  { %6195 = vmatpush3.bf16.msra.mxu1 %v6194_v33 }
0x2bd0   :  { %6196 = vmatprep.subr.bf16.mxu1 %v6564_v61 }
0x2bd3   :  { %6198 = vmatpush3.bf16.msra.mxu1 %v6197_v2 }
0x2c99   :  { %v4891_v21 = vpop.f32.mrb[54].mxu1 }
0x2c9a   :  { %v4892_v8 = vadd.f32 %v5191_v38, %v4891_v21  ;;  %v5835_v31 = vpop.f32.mrb[55].mxu1 }
0x2c9c   :  { %6530 = vtanh.f32 %v4892_v8 }
0x2ca6   :  { %v6531_v45 = vpop.eup %6530 }
0x2ca7   :  { %5853 = vmatmul.mubr.msk.f32.vlgmr.msra.gmra.mrb[56].mxu1 %vm72_vm0, %v6531_v45 }
0x2d7a   :  { %v4980_v16 = vpop.f32.mrb[56].mxu1 }
0x2d7b   :  { %v4981_v19 = vadd.f32 %v5193_v4, %v4980_v16  ;;  %v5854_v36 = vpop.f32.mrb[57].mxu1 }
0x2d7d   :  { %4984 = vst [vmem:[#allocation2] sm:$0x3] %v4981_v19 }
0x2d7e   :  { %6543 = shalt.err (!%p6540_p4)
}
0x2d7f   :  { %s6544_s16 = scalar_lea.hbm %s7861_s20, 32 }
0x2d80   :  { %p6545_p5 = scmp.ne.s32.totalorder %s7861_s20, %s6544_s16  ;;  %p6548_p6 = scmp.lt.u32.totalorder %s6544_s16, %s7861_s20 }
0x2d82   :  { %p6550_p7 = pnand %p6548_p6, %p6545_p5 }
0x2d84   :  { %6553 = shalt.err (!%p6550_p7)
}
0x2d85   :  { %4994 = dma.vmem_to_hbm [thread:$0]  %s4992_s9, 32, %s7861_s20, [#allocation3]  }
0x2d86   :  { %6554 = dma.done.wait [#allocation3], 32  }
0x2d87   :  { %6555 = vsyncadd [#allocation3], 4294967264 }
0x2d88   :  { %4998 = vsyncpa [#allocation3], 1 }

</bundles_post_ra>
